<compile_context>
chip_gen: v6e
topology: v6e:2x2x1
jax: 0.10.0
libtpu: 0.0.40
codegen_flags: <defaults>
</compile_context>

<pallas_src>
import functools

import jax
import jax.numpy as jnp
from jax.experimental import pallas as pl
from jax.experimental.pallas import tpu as pltpu


# ---------------------------------------------------------------------------
# Pallas kernel: fused 3x3 conv (3 band matmuls) + BN + [PReLU] + [residual]
# ---------------------------------------------------------------------------
def _conv_bn_act_kernel(*refs, apply_prelu, add_residual):
    it = iter(refs)
    xp_ref = next(it)       # (1, H+2, (W+2)*Cin)   padded input rows, one image
    w_ref = next(it)        # (3, (W+2)*Cin, W*Cout) band weights (one per ky)
    scale_ref = next(it)    # (1, W*Cout)  folded BN scale  = gamma / sqrt(var+eps)
    shift_ref = next(it)    # (1, W*Cout)  folded BN shift  = beta - mean*scale
    alpha_ref = next(it) if apply_prelu else None   # (1, 1) scalar PReLU slope
    res_ref = next(it) if add_residual else None    # (1, H, W*Cout) residual slab
    o_ref = next(it)        # (1, H, W*Cout)

    H = o_ref.shape[1]
    x = xp_ref[0]           # (H+2, (W+2)*Cin) -- whole padded image tile in VMEM

    # out_row[h] = sum_ky  x_row[h+ky] @ band[ky]   (single K=(W+2)*Cin matmul per ky)
    y = jnp.dot(x[0:H, :], w_ref[0],
                preferred_element_type=jnp.float32,
                precision=jax.lax.Precision.HIGHEST)
    y = y + jnp.dot(x[1:H + 1, :], w_ref[1],
                    preferred_element_type=jnp.float32,
                    precision=jax.lax.Precision.HIGHEST)
    y = y + jnp.dot(x[2:H + 2, :], w_ref[2],
                    preferred_element_type=jnp.float32,
                    precision=jax.lax.Precision.HIGHEST)

    y = y * scale_ref[...] + shift_ref[...]          # inference batch-norm (folded)
    if apply_prelu:
        y = jnp.where(y > 0, y, alpha_ref[...] * y)  # scalar-weight PReLU
    if add_residual:
        y = y + res_ref[0]                           # fused residual add
    o_ref[0] = y.astype(o_ref.dtype)


# ---------------------------------------------------------------------------
# pallas_call wrapper: one fused conv/BN/act/residual layer, gridded over batch
# ---------------------------------------------------------------------------
def _conv_bn_act(xp_rows, w_band, scale_row, shift_row, alpha=None, residual=None):
    B, Hp2, WCin = xp_rows.shape
    H = Hp2 - 2
    WC = w_band.shape[-1]
    apply_prelu = alpha is not None
    add_residual = residual is not None

    in_specs = [
        pl.BlockSpec((1, Hp2, WCin), lambda b: (b, 0, 0)),       # per-image padded slab
        pl.BlockSpec(w_band.shape, lambda b: (0, 0, 0)),         # weights: VMEM resident
        pl.BlockSpec(scale_row.shape, lambda b: (0, 0)),
        pl.BlockSpec(shift_row.shape, lambda b: (0, 0)),
    ]
    args = [xp_rows, w_band, scale_row, shift_row]
    if apply_prelu:
        in_specs.append(pl.BlockSpec(alpha.shape, lambda b: (0, 0)))
        args.append(alpha)
    if add_residual:
        in_specs.append(pl.BlockSpec((1, H, WC), lambda b: (b, 0, 0)))
        args.append(residual)

    flops = 2 * B * H * 3 * WCin * WC
    bytes_accessed = 4 * (xp_rows.size + w_band.size + 2 * B * H * WC
                          + (residual.size if add_residual else 0))

    return pl.pallas_call(
        functools.partial(_conv_bn_act_kernel,
                          apply_prelu=apply_prelu, add_residual=add_residual),
        grid=(B,),
        in_specs=in_specs,
        out_specs=pl.BlockSpec((1, H, WC), lambda b: (b, 0, 0)),
        out_shape=jax.ShapeDtypeStruct((B, H, WC), jnp.float32),
        compiler_params=pltpu.CompilerParams(
            dimension_semantics=("parallel",),          # both TCs on v7x
            vmem_limit_bytes=32 * 1024 * 1024),          # <= scoped default on v6e/v7x
        cost_estimate=pl.CostEstimate(flops=flops, transcendentals=0,
                                      bytes_accessed=bytes_accessed),
    )(*args)


# ---------------------------------------------------------------------------
# Host-side parameter preprocessing
# ---------------------------------------------------------------------------
def _band_weights(w_hwio, W):
    """Inflate a (3,3,Cin,Cout) conv kernel into 3 band matrices of shape
    ((W+2)*Cin, W*Cout) so that out_row[h] = sum_ky pad_row[h+ky] @ band[ky]."""
    _, _, cin, cout = w_hwio.shape
    wp2 = W + 2
    kx = jnp.arange(wp2)[:, None] - jnp.arange(W)[None, :]      # (W+2, W): kx = iw - w
    valid = (kx >= 0) & (kx < 3)
    blocks = w_hwio[:, jnp.clip(kx, 0, 2)]                      # (3, W+2, W, Cin, Cout)
    blocks = jnp.where(valid[None, :, :, None, None], blocks, 0.0)
    return blocks.transpose(0, 1, 3, 2, 4).reshape(3, wp2 * cin, W * cout)


def _fold_bn(gamma, beta, mean, var, W, eps):
    inv = gamma / jnp.sqrt(var + eps)
    scale = jnp.tile(inv, W)[None, :]                           # (1, W*C): lane = w*C + c
    shift = jnp.tile(beta - mean * inv, W)[None, :]
    return scale.astype(jnp.float32), shift.astype(jnp.float32)


# ---------------------------------------------------------------------------
# Full MetaRes forward (inference: training=False, params=None in PyTorch code)
# ---------------------------------------------------------------------------
def meta_res_forward(x_nchw, params, eps=1e-5):
    x = jnp.transpose(x_nchw, (0, 2, 3, 1)).astype(jnp.float32)  # NCHW -> NHWC (once)
    B, H, W, C = x.shape
    WC = W * C
    x_rows = x.reshape(B, H, WC)                                 # lane-dense slab

    def pad_rows(rows):  # (B, H, W*C) -> (B, H+2, (W+2)*C) with zero border
        t = rows.reshape(B, H, W, C)
        t = jnp.pad(t, ((0, 0), (1, 1), (1, 1), (0, 0)))
        return t.reshape(B, H + 2, (W + 2) * C)

    def layer(name, rows, residual=None, prelu=True):
        wb = _band_weights(params[f"{name}_w"], W)
        scale, shift = _fold_bn(params[f"{name}_gamma"], params[f"{name}_beta"],
                                params[f"{name}_mean"], params[f"{name}_var"], W, eps)
        alpha = params[f"{name}_alpha"].reshape(1, 1) if prelu else None
        return _conv_bn_act(pad_rows(rows), wb, scale, shift,
                            alpha=alpha, residual=residual)

    out = layer("cbr1", x_rows)                     # cbr1
    res = layer("cbr2", out, residual=x_rows)       # cbr2, fused  "+ inp"
    out = layer("cbr3", res)                        # cbr3
    out = layer("cbr4", out, residual=res)          # cbr4, fused  "+ res"
    out = layer("trans", out, prelu=False)          # trans conv + final BN (no PReLU)
    return jnp.transpose(out.reshape(B, H, W, C), (0, 3, 1, 2))  # back to NCHW


# ---------------------------------------------------------------------------
# Deterministic parameter init (shapes mirror MetaRes.__init__)
# ---------------------------------------------------------------------------
def init_params(key, num_filters):
    F = num_filters
    keys = iter(jax.random.split(key, 32))
    p = {}
    for name in ("cbr1", "cbr2", "cbr3", "cbr4", "trans"):
        # MetaConv2dLayer: kaiming_normal_, 3x3, no bias; stored HWIO.
        p[f"{name}_w"] = (jax.random.normal(next(keys), (3, 3, F, F), jnp.float32)
                          * jnp.sqrt(2.0 / (F * 9)))
        # MetaBNLayer affine params + running stats (randomized to exercise folding).
        p[f"{name}_gamma"] = 1.0 + 0.1 * jax.random.normal(next(keys), (F,), jnp.float32)
        p[f"{name}_beta"] = 0.1 * jax.random.normal(next(keys), (F,), jnp.float32)
        p[f"{name}_mean"] = 0.1 * jax.random.normal(next(keys), (F,), jnp.float32)
        p[f"{name}_var"] = 1.0 + 0.1 * jnp.abs(
            jax.random.normal(next(keys), (F,), jnp.float32))
        if name != "trans":
            p[f"{name}_alpha"] = jnp.full((1,), 0.25, jnp.float32)  # MetaPReLU(num_filters=1)
    return p


# ---------------------------------------------------------------------------
# Pure-JAX reference (same math / parameter layout) for the correctness check
# ---------------------------------------------------------------------------
def reference_forward(x_nchw, params, eps=1e-5):
    x = jnp.transpose(x_nchw, (0, 2, 3, 1)).astype(jnp.float32)

    def conv(t, w):
        return jax.lax.conv_general_dilated(
            t, w, window_strides=(1, 1), padding=((1, 1), (1, 1)),
            dimension_numbers=("NHWC", "HWIO", "NHWC"),
            precision=jax.lax.Precision.HIGHEST)

    def bn(t, name):
        inv = params[f"{name}_gamma"] / jnp.sqrt(params[f"{name}_var"] + eps)
        return (t - params[f"{name}_mean"]) * inv + params[f"{name}_beta"]

    def cbp(t, name):
        y = bn(conv(t, params[f"{name}_w"]), name)
        a = params[f"{name}_alpha"][0]
        return jnp.where(y > 0, y, a * y)

    o = cbp(x, "cbr1")
    o = cbp(o, "cbr2")
    res = o + x
    o = cbp(res, "cbr3")
    o = cbp(o, "cbr4")
    o = res + o
    o = bn(conv(o, params["trans_w"]), "trans")
    return jnp.transpose(o, (0, 3, 1, 2))


# ---------------------------------------------------------------------------
if __name__ == "__main__":
    B, num_filters, H, W = 2, 8, 16, 16          # W*C = 128 -> lane-dense rows
    key = jax.random.PRNGKey(0)
    kx, kp = jax.random.split(key)
    x = jax.random.normal(kx, (B, num_filters, H, W), jnp.float32)   # PyTorch NCHW input
    params = init_params(kp, num_filters)

    fwd = jax.jit(meta_res_forward)
    out = jax.block_until_ready(fwd(x, params))
    assert out.shape == (B, num_filters, H, W)

    ref = jax.block_until_ready(reference_forward(x, params))
    if not jnp.allclose(out, ref, rtol=1e-3, atol=1e-3):
        max_err = float(jnp.max(jnp.abs(out - ref)))
        raise AssertionError(f"kernel/reference mismatch, max abs err = {max_err}")

    print("KERNEL_OK")
</pallas_src>

<mosaic_0001>
module attributes {stable_mosaic.version = 11 : i64} {
  func.func @_conv_bn_act_kernel(%arg0: i32, %arg1: memref<1x18x144xf32, #tpu.memory_space<vmem>>, %arg2: memref<3x144x128xf32, #tpu.memory_space<vmem>>, %arg3: memref<1x128xf32, #tpu.memory_space<vmem>>, %arg4: memref<1x128xf32, #tpu.memory_space<vmem>>, %arg5: memref<1x1xf32, #tpu.memory_space<vmem>>, %arg6: memref<1x16x128xf32, #tpu.memory_space<vmem>>) attributes {dimension_semantics = [#tpu.dimension_semantics<parallel>], iteration_bounds = array<i64: 2>, scalar_prefetch = 0 : i64, scratch_operands = 0 : i64, tpu.core_type = #tpu.core_type<tc>, window_params = [{transform_indices = @transform_0, window_bounds = array<i64: 1, 18, 144>}, {pipeline_mode = #tpu.pipeline_mode<synchronous>, transform_indices = @transform_1, window_bounds = array<i64: 3, 144, 128>}, {pipeline_mode = #tpu.pipeline_mode<synchronous>, transform_indices = @transform_2, window_bounds = array<i64: 1, 128>}, {pipeline_mode = #tpu.pipeline_mode<synchronous>, transform_indices = @transform_3, window_bounds = array<i64: 1, 128>}, {pipeline_mode = #tpu.pipeline_mode<synchronous>, transform_indices = @transform_4, window_bounds = array<i64: 1, 1>}, {transform_indices = @transform_5, window_bounds = array<i64: 1, 16, 128>}]} {
    %c0 = arith.constant 0 : index
    %c0_0 = arith.constant 0 : index
    %c0_1 = arith.constant 0 : index
    %0 = vector.load %arg1[%c0, %c0_0, %c0_1] : memref<1x18x144xf32, #tpu.memory_space<vmem>>, vector<1x18x144xf32>
    %1 = vector.shape_cast %0 : vector<1x18x144xf32> to vector<18x144xf32>
    %2 = vector.extract_strided_slice %1 {offsets = [0, 0], sizes = [16, 144], strides = [1, 1]} : vector<18x144xf32> to vector<16x144xf32>
    %c0_2 = arith.constant 0 : index
    %c0_3 = arith.constant 0 : index
    %c0_4 = arith.constant 0 : index
    %3 = vector.load %arg2[%c0_2, %c0_3, %c0_4] : memref<3x144x128xf32, #tpu.memory_space<vmem>>, vector<1x144x128xf32>
    %4 = vector.shape_cast %3 : vector<1x144x128xf32> to vector<144x128xf32>
    %cst = arith.constant dense<0.000000e+00> : vector<16x128xf32>
    %5 = tpu.matmul %2, %4, %cst {dimension_numbers = #tpu.dot_dimension_numbers<[1], [0], [0], [1], [0, 0, 1, 1], [], []>, precision = #tpu.contract_precision<fp32>} : vector<16x144xf32>, vector<144x128xf32>, vector<16x128xf32> -> vector<16x128xf32>
    %6 = vector.extract_strided_slice %1 {offsets = [1, 0], sizes = [16, 144], strides = [1, 1]} : vector<18x144xf32> to vector<16x144xf32>
    %c1 = arith.constant 1 : index
    %c0_5 = arith.constant 0 : index
    %c0_6 = arith.constant 0 : index
    %7 = vector.load %arg2[%c1, %c0_5, %c0_6] : memref<3x144x128xf32, #tpu.memory_space<vmem>>, vector<1x144x128xf32>
    %8 = vector.shape_cast %7 : vector<1x144x128xf32> to vector<144x128xf32>
    %cst_7 = arith.constant dense<0.000000e+00> : vector<16x128xf32>
    %9 = tpu.matmul %6, %8, %cst_7 {dimension_numbers = #tpu.dot_dimension_numbers<[1], [0], [0], [1], [0, 0, 1, 1], [], []>, precision = #tpu.contract_precision<fp32>} : vector<16x144xf32>, vector<144x128xf32>, vector<16x128xf32> -> vector<16x128xf32>
    %10 = arith.addf %5, %9 : vector<16x128xf32>
    %11 = vector.extract_strided_slice %1 {offsets = [2, 0], sizes = [16, 144], strides = [1, 1]} : vector<18x144xf32> to vector<16x144xf32>
    %c2 = arith.constant 2 : index
    %c0_8 = arith.constant 0 : index
    %c0_9 = arith.constant 0 : index
    %12 = vector.load %arg2[%c2, %c0_8, %c0_9] : memref<3x144x128xf32, #tpu.memory_space<vmem>>, vector<1x144x128xf32>
    %13 = vector.shape_cast %12 : vector<1x144x128xf32> to vector<144x128xf32>
    %cst_10 = arith.constant dense<0.000000e+00> : vector<16x128xf32>
    %14 = tpu.matmul %11, %13, %cst_10 {dimension_numbers = #tpu.dot_dimension_numbers<[1], [0], [0], [1], [0, 0, 1, 1], [], []>, precision = #tpu.contract_precision<fp32>} : vector<16x144xf32>, vector<144x128xf32>, vector<16x128xf32> -> vector<16x128xf32>
    %15 = arith.addf %10, %14 : vector<16x128xf32>
    %c0_11 = arith.constant 0 : index
    %c0_12 = arith.constant 0 : index
    %16 = vector.load %arg3[%c0_11, %c0_12] : memref<1x128xf32, #tpu.memory_space<vmem>>, vector<1x128xf32>
    %17 = vector.broadcast %16 : vector<1x128xf32> to vector<16x128xf32>
    %18 = arith.mulf %15, %17 : vector<16x128xf32>
    %c0_13 = arith.constant 0 : index
    %c0_14 = arith.constant 0 : index
    %19 = vector.load %arg4[%c0_13, %c0_14] : memref<1x128xf32, #tpu.memory_space<vmem>>, vector<1x128xf32>
    %20 = vector.broadcast %19 : vector<1x128xf32> to vector<16x128xf32>
    %21 = arith.addf %18, %20 : vector<16x128xf32>
    %cst_15 = arith.constant 0.000000e+00 : f32
    %22 = vector.broadcast %cst_15 : f32 to vector<16x128xf32>
    %23 = arith.cmpf ogt, %21, %22 : vector<16x128xf32>
    %c0_16 = arith.constant 0 : index
    %c0_17 = arith.constant 0 : index
    %24 = vector.load %arg5[%c0_16, %c0_17] : memref<1x1xf32, #tpu.memory_space<vmem>>, vector<1x1xf32>
    %25 = vector.broadcast %24 : vector<1x1xf32> to vector<16x128xf32>
    %26 = arith.mulf %25, %21 : vector<16x128xf32>
    %27 = arith.select %23, %21, %26 : vector<16x128xi1>, vector<16x128xf32>
    %c0_18 = arith.constant 0 : index
    %c0_19 = arith.constant 0 : index
    %c0_20 = arith.constant 0 : index
    %28 = vector.load %arg6[%c0_18, %c0_19, %c0_20] : memref<1x16x128xf32, #tpu.memory_space<vmem>>, vector<1x16x128xf32>
    %29 = vector.shape_cast %28 : vector<1x16x128xf32> to vector<16x128xf32>
    %30 = vector.shape_cast %27 : vector<16x128xf32> to vector<1x16x128xf32>
    tpu.vector_store %arg6[%c0_18, %c0_19, %c0_20], %30 {strides = array<i32>} : memref<1x16x128xf32, #tpu.memory_space<vmem>>, vector<1x16x128xf32>,
    return
  }
  func.func @transform_0(%arg0: i32) -> (i32, i32, i32) {
    %c0_i32 = arith.constant 0 : i32
    %c0_i32_0 = arith.constant 0 : i32
    %c0_i32_1 = arith.constant 0 : i32
    return %arg0, %c0_i32, %c0_i32_0 : i32, i32, i32
  }
  func.func @transform_1(%arg0: i32) -> (i32, i32, i32) {
    %c0_i32 = arith.constant 0 : i32
    %c0_i32_0 = arith.constant 0 : i32
    %c0_i32_1 = arith.constant 0 : i32
    %c0_i32_2 = arith.constant 0 : i32
    return %c0_i32, %c0_i32_0, %c0_i32_1 : i32, i32, i32
  }
  func.func @transform_2(%arg0: i32) -> (i32, i32) {
    %c0_i32 = arith.constant 0 : i32
    %c0_i32_0 = arith.constant 0 : i32
    %c0_i32_1 = arith.constant 0 : i32
    return %c0_i32, %c0_i32_0 : i32, i32
  }
  func.func @transform_3(%arg0: i32) -> (i32, i32) {
    %c0_i32 = arith.constant 0 : i32
    %c0_i32_0 = arith.constant 0 : i32
    %c0_i32_1 = arith.constant 0 : i32
    return %c0_i32, %c0_i32_0 : i32, i32
  }
  func.func @transform_4(%arg0: i32) -> (i32, i32) {
    %c0_i32 = arith.constant 0 : i32
    %c0_i32_0 = arith.constant 0 : i32
    %c0_i32_1 = arith.constant 0 : i32
    return %c0_i32, %c0_i32_0 : i32, i32
  }
  func.func @transform_5(%arg0: i32) -> (i32, i32, i32) {
    %c0_i32 = arith.constant 0 : i32
    %c0_i32_0 = arith.constant 0 : i32
    %c0_i32_1 = arith.constant 0 : i32
    return %arg0, %c0_i32, %c0_i32_0 : i32, i32, i32
  }
}

module attributes {stable_mosaic.version = 11 : i64} {
  func.func @_conv_bn_act_kernel(%arg0: i32, %arg1: memref<1x18x144xf32, #tpu.memory_space<vmem>>, %arg2: memref<3x144x128xf32, #tpu.memory_space<vmem>>, %arg3: memref<1x128xf32, #tpu.memory_space<vmem>>, %arg4: memref<1x128xf32, #tpu.memory_space<vmem>>, %arg5: memref<1x1xf32, #tpu.memory_space<vmem>>, %arg6: memref<1x16x128xf32, #tpu.memory_space<vmem>>, %arg7: memref<1x16x128xf32, #tpu.memory_space<vmem>>) attributes {dimension_semantics = [#tpu.dimension_semantics<parallel>], iteration_bounds = array<i64: 2>, scalar_prefetch = 0 : i64, scratch_operands = 0 : i64, tpu.core_type = #tpu.core_type<tc>, window_params = [{transform_indices = @transform_0, window_bounds = array<i64: 1, 18, 144>}, {pipeline_mode = #tpu.pipeline_mode<synchronous>, transform_indices = @transform_1, window_bounds = array<i64: 3, 144, 128>}, {pipeline_mode = #tpu.pipeline_mode<synchronous>, transform_indices = @transform_2, window_bounds = array<i64: 1, 128>}, {pipeline_mode = #tpu.pipeline_mode<synchronous>, transform_indices = @transform_3, window_bounds = array<i64: 1, 128>}, {pipeline_mode = #tpu.pipeline_mode<synchronous>, transform_indices = @transform_4, window_bounds = array<i64: 1, 1>}, {transform_indices = @transform_5, window_bounds = array<i64: 1, 16, 128>}, {transform_indices = @transform_6, window_bounds = array<i64: 1, 16, 128>}]} {
    %c0 = arith.constant 0 : index
    %c0_0 = arith.constant 0 : index
    %c0_1 = arith.constant 0 : index
    %0 = vector.load %arg1[%c0, %c0_0, %c0_1] : memref<1x18x144xf32, #tpu.memory_space<vmem>>, vector<1x18x144xf32>
    %1 = vector.shape_cast %0 : vector<1x18x144xf32> to vector<18x144xf32>
    %2 = vector.extract_strided_slice %1 {offsets = [0, 0], sizes = [16, 144], strides = [1, 1]} : vector<18x144xf32> to vector<16x144xf32>
    %c0_2 = arith.constant 0 : index
    %c0_3 = arith.constant 0 : index
    %c0_4 = arith.constant 0 : index
    %3 = vector.load %arg2[%c0_2, %c0_3, %c0_4] : memref<3x144x128xf32, #tpu.memory_space<vmem>>, vector<1x144x128xf32>
    %4 = vector.shape_cast %3 : vector<1x144x128xf32> to vector<144x128xf32>
    %cst = arith.constant dense<0.000000e+00> : vector<16x128xf32>
    %5 = tpu.matmul %2, %4, %cst {dimension_numbers = #tpu.dot_dimension_numbers<[1], [0], [0], [1], [0, 0, 1, 1], [], []>, precision = #tpu.contract_precision<fp32>} : vector<16x144xf32>, vector<144x128xf32>, vector<16x128xf32> -> vector<16x128xf32>
    %6 = vector.extract_strided_slice %1 {offsets = [1, 0], sizes = [16, 144], strides = [1, 1]} : vector<18x144xf32> to vector<16x144xf32>
    %c1 = arith.constant 1 : index
    %c0_5 = arith.constant 0 : index
    %c0_6 = arith.constant 0 : index
    %7 = vector.load %arg2[%c1, %c0_5, %c0_6] : memref<3x144x128xf32, #tpu.memory_space<vmem>>, vector<1x144x128xf32>
    %8 = vector.shape_cast %7 : vector<1x144x128xf32> to vector<144x128xf32>
    %cst_7 = arith.constant dense<0.000000e+00> : vector<16x128xf32>
    %9 = tpu.matmul %6, %8, %cst_7 {dimension_numbers = #tpu.dot_dimension_numbers<[1], [0], [0], [1], [0, 0, 1, 1], [], []>, precision = #tpu.contract_precision<fp32>} : vector<16x144xf32>, vector<144x128xf32>, vector<16x128xf32> -> vector<16x128xf32>
    %10 = arith.addf %5, %9 : vector<16x128xf32>
    %11 = vector.extract_strided_slice %1 {offsets = [2, 0], sizes = [16, 144], strides = [1, 1]} : vector<18x144xf32> to vector<16x144xf32>
    %c2 = arith.constant 2 : index
    %c0_8 = arith.constant 0 : index
    %c0_9 = arith.constant 0 : index
    %12 = vector.load %arg2[%c2, %c0_8, %c0_9] : memref<3x144x128xf32, #tpu.memory_space<vmem>>, vector<1x144x128xf32>
    %13 = vector.shape_cast %12 : vector<1x144x128xf32> to vector<144x128xf32>
    %cst_10 = arith.constant dense<0.000000e+00> : vector<16x128xf32>
    %14 = tpu.matmul %11, %13, %cst_10 {dimension_numbers = #tpu.dot_dimension_numbers<[1], [0], [0], [1], [0, 0, 1, 1], [], []>, precision = #tpu.contract_precision<fp32>} : vector<16x144xf32>, vector<144x128xf32>, vector<16x128xf32> -> vector<16x128xf32>
    %15 = arith.addf %10, %14 : vector<16x128xf32>
    %c0_11 = arith.constant 0 : index
    %c0_12 = arith.constant 0 : index
    %16 = vector.load %arg3[%c0_11, %c0_12] : memref<1x128xf32, #tpu.memory_space<vmem>>, vector<1x128xf32>
    %17 = vector.broadcast %16 : vector<1x128xf32> to vector<16x128xf32>
    %18 = arith.mulf %15, %17 : vector<16x128xf32>
    %c0_13 = arith.constant 0 : index
    %c0_14 = arith.constant 0 : index
    %19 = vector.load %arg4[%c0_13, %c0_14] : memref<1x128xf32, #tpu.memory_space<vmem>>, vector<1x128xf32>
    %20 = vector.broadcast %19 : vector<1x128xf32> to vector<16x128xf32>
    %21 = arith.addf %18, %20 : vector<16x128xf32>
    %cst_15 = arith.constant 0.000000e+00 : f32
    %22 = vector.broadcast %cst_15 : f32 to vector<16x128xf32>
    %23 = arith.cmpf ogt, %21, %22 : vector<16x128xf32>
    %c0_16 = arith.constant 0 : index
    %c0_17 = arith.constant 0 : index
    %24 = vector.load %arg5[%c0_16, %c0_17] : memref<1x1xf32, #tpu.memory_space<vmem>>, vector<1x1xf32>
    %25 = vector.broadcast %24 : vector<1x1xf32> to vector<16x128xf32>
    %26 = arith.mulf %25, %21 : vector<16x128xf32>
    %27 = arith.select %23, %21, %26 : vector<16x128xi1>, vector<16x128xf32>
    %c0_18 = arith.constant 0 : index
    %c0_19 = arith.constant 0 : index
    %c0_20 = arith.constant 0 : index
    %28 = vector.load %arg6[%c0_18, %c0_19, %c0_20] : memref<1x16x128xf32, #tpu.memory_space<vmem>>, vector<1x16x128xf32>
    %29 = vector.shape_cast %28 : vector<1x16x128xf32> to vector<16x128xf32>
    %30 = arith.addf %27, %29 : vector<16x128xf32>
    %c0_21 = arith.constant 0 : index
    %c0_22 = arith.constant 0 : index
    %c0_23 = arith.constant 0 : index
    %31 = vector.load %arg7[%c0_21, %c0_22, %c0_23] : memref<1x16x128xf32, #tpu.memory_space<vmem>>, vector<1x16x128xf32>
    %32 = vector.shape_cast %31 : vector<1x16x128xf32> to vector<16x128xf32>
    %33 = vector.shape_cast %30 : vector<16x128xf32> to vector<1x16x128xf32>
    tpu.vector_store %arg7[%c0_21, %c0_22, %c0_23], %33 {strides = array<i32>} : memref<1x16x128xf32, #tpu.memory_space<vmem>>, vector<1x16x128xf32>,
    return
  }
  func.func @transform_0(%arg0: i32) -> (i32, i32, i32) {
    %c0_i32 = arith.constant 0 : i32
    %c0_i32_0 = arith.constant 0 : i32
    %c0_i32_1 = arith.constant 0 : i32
    return %arg0, %c0_i32, %c0_i32_0 : i32, i32, i32
  }
  func.func @transform_1(%arg0: i32) -> (i32, i32, i32) {
    %c0_i32 = arith.constant 0 : i32
    %c0_i32_0 = arith.constant 0 : i32
    %c0_i32_1 = arith.constant 0 : i32
    %c0_i32_2 = arith.constant 0 : i32
    return %c0_i32, %c0_i32_0, %c0_i32_1 : i32, i32, i32
  }
  func.func @transform_2(%arg0: i32) -> (i32, i32) {
    %c0_i32 = arith.constant 0 : i32
    %c0_i32_0 = arith.constant 0 : i32
    %c0_i32_1 = arith.constant 0 : i32
    return %c0_i32, %c0_i32_0 : i32, i32
  }
  func.func @transform_3(%arg0: i32) -> (i32, i32) {
    %c0_i32 = arith.constant 0 : i32
    %c0_i32_0 = arith.constant 0 : i32
    %c0_i32_1 = arith.constant 0 : i32
    return %c0_i32, %c0_i32_0 : i32, i32
  }
  func.func @transform_4(%arg0: i32) -> (i32, i32) {
    %c0_i32 = arith.constant 0 : i32
    %c0_i32_0 = arith.constant 0 : i32
    %c0_i32_1 = arith.constant 0 : i32
    return %c0_i32, %c0_i32_0 : i32, i32
  }
  func.func @transform_5(%arg0: i32) -> (i32, i32, i32) {
    %c0_i32 = arith.constant 0 : i32
    %c0_i32_0 = arith.constant 0 : i32
    %c0_i32_1 = arith.constant 0 : i32
    return %arg0, %c0_i32, %c0_i32_0 : i32, i32, i32
  }
  func.func @transform_6(%arg0: i32) -> (i32, i32, i32) {
    %c0_i32 = arith.constant 0 : i32
    %c0_i32_0 = arith.constant 0 : i32
    %c0_i32_1 = arith.constant 0 : i32
    return %arg0, %c0_i32, %c0_i32_0 : i32, i32, i32
  }
}

module attributes {stable_mosaic.version = 11 : i64} {
  func.func @_conv_bn_act_kernel(%arg0: i32, %arg1: memref<1x18x144xf32, #tpu.memory_space<vmem>>, %arg2: memref<3x144x128xf32, #tpu.memory_space<vmem>>, %arg3: memref<1x128xf32, #tpu.memory_space<vmem>>, %arg4: memref<1x128xf32, #tpu.memory_space<vmem>>, %arg5: memref<1x16x128xf32, #tpu.memory_space<vmem>>) attributes {dimension_semantics = [#tpu.dimension_semantics<parallel>], iteration_bounds = array<i64: 2>, scalar_prefetch = 0 : i64, scratch_operands = 0 : i64, tpu.core_type = #tpu.core_type<tc>, window_params = [{transform_indices = @transform_0, window_bounds = array<i64: 1, 18, 144>}, {pipeline_mode = #tpu.pipeline_mode<synchronous>, transform_indices = @transform_1, window_bounds = array<i64: 3, 144, 128>}, {pipeline_mode = #tpu.pipeline_mode<synchronous>, transform_indices = @transform_2, window_bounds = array<i64: 1, 128>}, {pipeline_mode = #tpu.pipeline_mode<synchronous>, transform_indices = @transform_3, window_bounds = array<i64: 1, 128>}, {transform_indices = @transform_4, window_bounds = array<i64: 1, 16, 128>}]} {
    %c0 = arith.constant 0 : index
    %c0_0 = arith.constant 0 : index
    %c0_1 = arith.constant 0 : index
    %0 = vector.load %arg1[%c0, %c0_0, %c0_1] : memref<1x18x144xf32, #tpu.memory_space<vmem>>, vector<1x18x144xf32>
    %1 = vector.shape_cast %0 : vector<1x18x144xf32> to vector<18x144xf32>
    %2 = vector.extract_strided_slice %1 {offsets = [0, 0], sizes = [16, 144], strides = [1, 1]} : vector<18x144xf32> to vector<16x144xf32>
    %c0_2 = arith.constant 0 : index
    %c0_3 = arith.constant 0 : index
    %c0_4 = arith.constant 0 : index
    %3 = vector.load %arg2[%c0_2, %c0_3, %c0_4] : memref<3x144x128xf32, #tpu.memory_space<vmem>>, vector<1x144x128xf32>
    %4 = vector.shape_cast %3 : vector<1x144x128xf32> to vector<144x128xf32>
    %cst = arith.constant dense<0.000000e+00> : vector<16x128xf32>
    %5 = tpu.matmul %2, %4, %cst {dimension_numbers = #tpu.dot_dimension_numbers<[1], [0], [0], [1], [0, 0, 1, 1], [], []>, precision = #tpu.contract_precision<fp32>} : vector<16x144xf32>, vector<144x128xf32>, vector<16x128xf32> -> vector<16x128xf32>
    %6 = vector.extract_strided_slice %1 {offsets = [1, 0], sizes = [16, 144], strides = [1, 1]} : vector<18x144xf32> to vector<16x144xf32>
    %c1 = arith.constant 1 : index
    %c0_5 = arith.constant 0 : index
    %c0_6 = arith.constant 0 : index
    %7 = vector.load %arg2[%c1, %c0_5, %c0_6] : memref<3x144x128xf32, #tpu.memory_space<vmem>>, vector<1x144x128xf32>
    %8 = vector.shape_cast %7 : vector<1x144x128xf32> to vector<144x128xf32>
    %cst_7 = arith.constant dense<0.000000e+00> : vector<16x128xf32>
    %9 = tpu.matmul %6, %8, %cst_7 {dimension_numbers = #tpu.dot_dimension_numbers<[1], [0], [0], [1], [0, 0, 1, 1], [], []>, precision = #tpu.contract_precision<fp32>} : vector<16x144xf32>, vector<144x128xf32>, vector<16x128xf32> -> vector<16x128xf32>
    %10 = arith.addf %5, %9 : vector<16x128xf32>
    %11 = vector.extract_strided_slice %1 {offsets = [2, 0], sizes = [16, 144], strides = [1, 1]} : vector<18x144xf32> to vector<16x144xf32>
    %c2 = arith.constant 2 : index
    %c0_8 = arith.constant 0 : index
    %c0_9 = arith.constant 0 : index
    %12 = vector.load %arg2[%c2, %c0_8, %c0_9] : memref<3x144x128xf32, #tpu.memory_space<vmem>>, vector<1x144x128xf32>
    %13 = vector.shape_cast %12 : vector<1x144x128xf32> to vector<144x128xf32>
    %cst_10 = arith.constant dense<0.000000e+00> : vector<16x128xf32>
    %14 = tpu.matmul %11, %13, %cst_10 {dimension_numbers = #tpu.dot_dimension_numbers<[1], [0], [0], [1], [0, 0, 1, 1], [], []>, precision = #tpu.contract_precision<fp32>} : vector<16x144xf32>, vector<144x128xf32>, vector<16x128xf32> -> vector<16x128xf32>
    %15 = arith.addf %10, %14 : vector<16x128xf32>
    %c0_11 = arith.constant 0 : index
    %c0_12 = arith.constant 0 : index
    %16 = vector.load %arg3[%c0_11, %c0_12] : memref<1x128xf32, #tpu.memory_space<vmem>>, vector<1x128xf32>
    %17 = vector.broadcast %16 : vector<1x128xf32> to vector<16x128xf32>
    %18 = arith.mulf %15, %17 : vector<16x128xf32>
    %c0_13 = arith.constant 0 : index
    %c0_14 = arith.constant 0 : index
    %19 = vector.load %arg4[%c0_13, %c0_14] : memref<1x128xf32, #tpu.memory_space<vmem>>, vector<1x128xf32>
    %20 = vector.broadcast %19 : vector<1x128xf32> to vector<16x128xf32>
    %21 = arith.addf %18, %20 : vector<16x128xf32>
    %c0_15 = arith.constant 0 : index
    %c0_16 = arith.constant 0 : index
    %c0_17 = arith.constant 0 : index
    %22 = vector.load %arg5[%c0_15, %c0_16, %c0_17] : memref<1x16x128xf32, #tpu.memory_space<vmem>>, vector<1x16x128xf32>
    %23 = vector.shape_cast %22 : vector<1x16x128xf32> to vector<16x128xf32>
    %24 = vector.shape_cast %21 : vector<16x128xf32> to vector<1x16x128xf32>
    tpu.vector_store %arg5[%c0_15, %c0_16, %c0_17], %24 {strides = array<i32>} : memref<1x16x128xf32, #tpu.memory_space<vmem>>, vector<1x16x128xf32>,
    return
  }
  func.func @transform_0(%arg0: i32) -> (i32, i32, i32) {
    %c0_i32 = arith.constant 0 : i32
    %c0_i32_0 = arith.constant 0 : i32
    %c0_i32_1 = arith.constant 0 : i32
    return %arg0, %c0_i32, %c0_i32_0 : i32, i32, i32
  }
  func.func @transform_1(%arg0: i32) -> (i32, i32, i32) {
    %c0_i32 = arith.constant 0 : i32
    %c0_i32_0 = arith.constant 0 : i32
    %c0_i32_1 = arith.constant 0 : i32
    %c0_i32_2 = arith.constant 0 : i32
    return %c0_i32, %c0_i32_0, %c0_i32_1 : i32, i32, i32
  }
  func.func @transform_2(%arg0: i32) -> (i32, i32) {
    %c0_i32 = arith.constant 0 : i32
    %c0_i32_0 = arith.constant 0 : i32
    %c0_i32_1 = arith.constant 0 : i32
    return %c0_i32, %c0_i32_0 : i32, i32
  }
  func.func @transform_3(%arg0: i32) -> (i32, i32) {
    %c0_i32 = arith.constant 0 : i32
    %c0_i32_0 = arith.constant 0 : i32
    %c0_i32_1 = arith.constant 0 : i32
    return %c0_i32, %c0_i32_0 : i32, i32
  }
  func.func @transform_4(%arg0: i32) -> (i32, i32, i32) {
    %c0_i32 = arith.constant 0 : i32
    %c0_i32_0 = arith.constant 0 : i32
    %c0_i32_1 = arith.constant 0 : i32
    return %arg0, %c0_i32, %c0_i32_0 : i32, i32, i32
  }
}

</mosaic_0001>

<bundles_post_ra>
// kernel: tile.53
= control target key start
LH: loop header
LB: loop body
LE: loop exit
PB: predicated region body
PF: predicated region fallthrough
CT: control target
= control target key end

     0   :  { %s28_s0 = inlined_call_operand.vmem [shape: f32[8], index: 0, kind: input, shape index: {}]   ;;  %s29_s1 = inlined_call_operand.vmem [shape: f32[16,8], index: 1, kind: output, shape index: {}]  }
   0x1   :  { %v4_v0 = vld [vmem:[%s28_s0] ss:$0 sm:$0xff] }
   0x2   :  { %5 = vst [vmem:[%s29_s1] sm:$0xff] %v4_v0  ;;  %8 = vst [vmem:[%s29_s1 + $0x8] sm:$0xff] %v4_v0 }

// kernel: tile.54
= control target key start
LH: loop header
LB: loop body
LE: loop exit
PB: predicated region body
PF: predicated region fallthrough
CT: control target
= control target key end

     0   :  { %s133_s10 = smov 120   ;;  %s134_s11 = smov 104   ;;  %vm3_vm0 = vcmask 64512   ;;  %vm9_vm1 = vcmask 1048512   ;;  %vm15_vm2 = vcmask 982912   ;;  %vm21_vm3 = vcmask 917312   ;;  %s209_s0 = inlined_call_operand.vmem [shape: f32[16,8], index: 0, kind: input, shape index: {}]   ;;  %s210_s1 = inlined_call_operand.vmem [shape: f32[1,128], index: 1, kind: output, shape index: {}]  }
   0x1   :  { %v103_v0 = vld [vmem:[%s209_s0 + $0xf] sm:$0x1]   ;;  %v105_v1 = vld [vmem:[%s209_s0 + $0xd] sm:$0x1]   ;;  %v104_v2 = vld [vmem:[%s209_s0 + $0xe] sm:$0x1]  }
   0x2   :  { %7 = vrot.lane.b32.xlu0 %v103_v0, %s133_s10  ;;  %19 = vrot.lane.b32.xlu1 %v105_v1, %s134_s11  ;;  %v106_v3 = vld [vmem:[%s209_s0 + $0xc] sm:$0x1]   ;;  %s135_s16 = smov 112   ;;  %s136_s17 = smov 96   ;;  %v107_v4 = vld [vmem:[%s209_s0 + $0xb] sm:$0x1]  }
   0x3   :  { %v108_v5 = vld [vmem:[%s209_s0 + $0xa] sm:$0x1]   ;;  %v2_v6 = vld [vmem:[%s209_s0] sm:$0x1]   ;;  %s137_s24 = smov 88   ;;  %s138_s25 = smov 80  }
   0x4   :  { %4 = vst.msk [vmem:[#allocation0] sm:$0x1] %vm3_vm0, %v2_v6   ;;  %v109_v7 = vld [vmem:[%s209_s0 + $0x9] sm:$0x1]   ;;  %v110_v8 = vld [vmem:[%s209_s0 + $0x8] sm:$0x1]  }
   0x5   :  { %s139_s30 = smov 72   ;;  %s140_s2 = smov 64   ;;  %v111_v9 = vld [vmem:[%s209_s0 + $0x7] sm:$0x1]   ;;  %v112_v10 = vld [vmem:[%s209_s0 + $0x6] sm:$0x1]  }
   0x6   :  { %13 = vrot.lane.b32.xlu0 %v104_v2, %s135_s16  ;;  %25 = vrot.lane.b32.xlu1 %v106_v3, %s136_s17  ;;  %s141_s7 = smov 56   ;;  %s142_s8 = smov 48   ;;  %v113_v11 = vld [vmem:[%s209_s0 + $0x5] sm:$0x1]   ;;  %v114_v12 = vld [vmem:[%s209_s0 + $0x4] sm:$0x1]  }
   0x7   :  { %s143_s13 = smov 40   ;;  %s144_s14 = smov 32   ;;  %v115_v13 = vld [vmem:[%s209_s0 + $0x3] sm:$0x1]   ;;  %v116_v14 = vld [vmem:[%s209_s0 + $0x2] sm:$0x1]  }
   0x8   :  { %s145_s19 = smov 24   ;;  %s146_s20 = smov 16   ;;  %v117_v15 = vld [vmem:[%s209_s0 + $0x1] sm:$0x1]   ;;  %vm27_vm4 = vcmask 851712   ;;  %vm33_vm5 = vcmask 786112  }
   0x9   :  { %s147_s0 = smov 8   ;;  %vm39_vm6 = vcmask 720512   ;;  %vm45_vm7 = vcmask 654912   ;;  %vm51_vm8 = vcmask 589312   ;;  %vm57_vm9 = vcmask 523712  }
   0xa   :  { %31 = vrot.lane.b32.xlu0 %v107_v4, %s137_s24  ;;  %37 = vrot.lane.b32.xlu1 %v108_v5, %s138_s25  ;;  %vm63_vm10 = vcmask 458112   ;;  %vm69_vm11 = vcmask 392512   ;;  %vm75_vm12 = vcmask 326912   ;;  %vm81_vm13 = vcmask 261312  }
   0xb   :  { %vm87_vm14 = vcmask 195712   ;;  %vm93_vm15 = vcmask 130112  }
   0xe   :  { %43 = vrot.lane.b32.xlu0 %v109_v7, %s139_s30  ;;  %49 = vrot.lane.b32.xlu1 %v110_v8, %s140_s2 }
  0x12   :  { %55 = vrot.lane.b32.xlu0 %v111_v9, %s141_s7  ;;  %61 = vrot.lane.b32.xlu1 %v112_v10, %s142_s8 }
  0x16   :  { %67 = vrot.lane.b32.xlu0 %v113_v11, %s143_s13  ;;  %73 = vrot.lane.b32.xlu1 %v114_v12, %s144_s14 }
  0x1a   :  { %79 = vrot.lane.b32.xlu0 %v115_v13, %s145_s19  ;;  %85 = vrot.lane.b32.xlu1 %v116_v14, %s146_s20 }
  0x1e   :  { %91 = vrot.lane.b32.xlu0 %v117_v15, %s147_s0 }
  0x74   :  { %v8_v16 = vpop.permute.xlu0 %7   ;;  %v20_v17 = vpop.permute.xlu1 %19  }
  0x75   :  { %10 = vst.msk [vmem:[#allocation0] sm:$0x1] %vm9_vm1, %v8_v16  }
  0x78   :  { %v14_v18 = vpop.permute.xlu0 %13   ;;  %v26_v19 = vpop.permute.xlu1 %25  }
  0x79   :  { %16 = vst.msk [vmem:[#allocation0] sm:$0x1] %vm15_vm2, %v14_v18  }
  0x7a   :  { %22 = vst.msk [vmem:[#allocation0] sm:$0x1] %vm21_vm3, %v20_v17  }
  0x7b   :  { %28 = vst.msk [vmem:[#allocation0] sm:$0x1] %vm27_vm4, %v26_v19  }
  0x7c   :  { %v32_v20 = vpop.permute.xlu0 %31   ;;  %v38_v21 = vpop.permute.xlu1 %37  }
  0x7d   :  { %34 = vst.msk [vmem:[#allocation0] sm:$0x1] %vm33_vm5, %v32_v20  }
  0x7e   :  { %40 = vst.msk [vmem:[#allocation0] sm:$0x1] %vm39_vm6, %v38_v21  }
  0x80   :  { %v44_v22 = vpop.permute.xlu0 %43   ;;  %v50_v23 = vpop.permute.xlu1 %49  }
  0x81   :  { %46 = vst.msk [vmem:[#allocation0] sm:$0x1] %vm45_vm7, %v44_v22  }
  0x82   :  { %52 = vst.msk [vmem:[#allocation0] sm:$0x1] %vm51_vm8, %v50_v23  }
  0x84   :  { %v56_v24 = vpop.permute.xlu0 %55   ;;  %v62_v25 = vpop.permute.xlu1 %61  }
  0x85   :  { %58 = vst.msk [vmem:[#allocation0] sm:$0x1] %vm57_vm9, %v56_v24  }
  0x86   :  { %64 = vst.msk [vmem:[#allocation0] sm:$0x1] %vm63_vm10, %v62_v25  }
  0x88   :  { %v68_v26 = vpop.permute.xlu0 %67   ;;  %v74_v27 = vpop.permute.xlu1 %73  }
  0x89   :  { %70 = vst.msk [vmem:[#allocation0] sm:$0x1] %vm69_vm11, %v68_v26  }
  0x8a   :  { %76 = vst.msk [vmem:[#allocation0] sm:$0x1] %vm75_vm12, %v74_v27  }
  0x8c   :  { %v80_v28 = vpop.permute.xlu0 %79   ;;  %v86_v29 = vpop.permute.xlu1 %85  }
  0x8d   :  { %82 = vst.msk [vmem:[#allocation0] sm:$0x1] %vm81_vm13, %v80_v28  }
  0x8e   :  { %88 = vst.msk [vmem:[#allocation0] sm:$0x1] %vm87_vm14, %v86_v29  }
  0x90   :  { %v92_v30 = vpop.permute.xlu0 %91  }
  0x91   :  { %94 = vst.msk [vmem:[#allocation0] sm:$0x1] %vm93_vm15, %v92_v30  }
  0x98   :  { %v99_v31 = vld [vmem:[#allocation0] sm:$0x1] }
  0x99   :  { %102 = vst [vmem:[%s210_s1] sm:$0x1] %v99_v31 }

// kernel: meta_res_forward.5
= control target key start
LH: loop header
LB: loop body
LE: loop exit
PB: predicated region body
PF: predicated region fallthrough
CT: control target
= control target key end

     0   :  { %s2746_s20 = smov 0   ;;  %s4338_s0 = inlined_call_operand.vmem [shape: f32[2,18,144], index: 0, kind: input, shape index: {}]   ;;  %s4339_s1 = inlined_call_operand.vmem [shape: f32[3,144,128], index: 1, kind: input, shape index: {}]   ;;  %s4340_s2 = inlined_call_operand.vmem [shape: f32[1,128], index: 2, kind: input, shape index: {}]   ;;  %s4341_s3 = inlined_call_operand.vmem [shape: f32[1,128], index: 3, kind: input, shape index: {}]   ;;  %s4342_s4 = inlined_call_operand.<no memory space> [shape: f32[1,1], index: 4, kind: input, shape index: {}]   ;;  %s4343_s5 = inlined_call_operand.vmem [shape: f32[2,16,128], index: 5, kind: output, shape index: {}]  }
   0x1   :  { %v10_v0 = vstv %s4342_s4 }
   0x2   :  { %11 = vst [vmem:[#allocation2] sm:$0x1] %v10_v0 }
   0x3 LB: > { %s2635_s21 = sadd.s32 4294967295, %s2709_s20   ;;  %p2639_p0 = scmp.ge.s32.totalorder %s2709_s20, 1  ;;  %s2709_s20 = sphi %s2746_s20, %s17_s20  }
   0x4   : > { %p189_p1 = scmp.lt.s32.totalorder %s2709_s20, 3 }
   0x6   : > { %p190_p2 = pnand %p2639_p0, %p189_p1 }
   0x7   : > { %p2763_p3 = scmp.lt.s32.totalorder (!%p190_p2), %s2635_s21, 1 }
   0x8   : > { %193 = sbr.rel (%p190_p2) target bundleno = 589 (0x24d), region = 40 }
   0xd   : > { %v2658_v1 = vld [vmem:[%s4339_s1 + $0x108] sm:$0xff]  ;;  %v2657_v2 = vld [vmem:[%s4339_s1 + $0x100] sm:$0xff]  ;;  %v2656_v3 = vld [vmem:[%s4339_s1 + $0xf8] sm:$0xff]  ;;  %v2711_v4 = vmov 0.0   ;;  %s4432_s21 = smov (!%p2763_p3, %s2635_s21), 1  ;;  %vm276_vm0 = vcmask 1046528  }
   0xe   : > { %294 = vmatprep.subr.mxu0 %v2711_v4  ;;  %v2768_v5 = vand.u32 4294901760, %v2658_v1  ;;  %v2770_v6 = vand.u32 4294901760, %v2657_v2  ;;  %v2772_v7 = vand.u32 4294901760, %v2656_v3  ;;  %v2655_v8 = vld [vmem:[%s4339_s1 + $0xf0] sm:$0xff]  ;;  %407 = vmatprep.subr.mxu1 %v2711_v4  ;;  %v2654_v9 = vld [vmem:[%s4339_s1 + $0xe8] sm:$0xff]  ;;  %v2653_v10 = vld [vmem:[%s4339_s1 + $0xe0] sm:$0xff] }
   0xf   : > { %v2784_v11 = vand.u32 4294901760, %v2655_v8  ;;  %v2786_v12 = vand.u32 4294901760, %v2654_v9  ;;  %v2788_v13 = vand.u32 4294901760, %v2653_v10  ;;  %v2652_v14 = vld [vmem:[%s4339_s1 + $0xd8] sm:$0xff]  ;;  %v2651_v15 = vld [vmem:[%s4339_s1 + $0xd0] sm:$0xff]  ;;  %v2650_v20 = vld [vmem:[%s4339_s1 + $0xc8] sm:$0xff] }
  0x10   : > { %296 = vmatpush1.msra.mxu0 %v2768_v5  ;;  %v2798_v16 = vsub.f32 %v2658_v1, %v2768_v5  ;;  %v2801_v17 = vsub.f32 %v2657_v2, %v2770_v6  ;;  %v2803_v18 = vand.u32 4294901760, %v2652_v14  ;;  %v2806_v19 = vsub.f32 %v2656_v3, %v2772_v7  ;;  %v2649_v27 = vld [vmem:[%s4339_s1 + $0xc0] sm:$0xff]  ;;  %s2685_s17 = smul.u32 48, %s4432_s21  ;;  %v2648_v37 = vld [vmem:[%s4339_s1 + $0xb8] sm:$0xff]  ;;  %v2647_v43 = vld [vmem:[%s4339_s1 + $0xb0] sm:$0xff]  ;;  %s2684_s19 = sshll.u32 %s4432_s21, 4 }
  0x11   : > { %297 = vmatprep.subr.mxu0 %v2711_v4  ;;  %v2817_v21 = vsub.f32 %v2655_v8, %v2784_v11  ;;  %v2820_v22 = vsub.f32 %v2654_v9, %v2786_v12  ;;  %v2826_v26 = vand.u32 4294901760, %v2651_v15  ;;  %v2833_v29 = vand.u32 4294901760, %v2650_v20  ;;  %v2646_v50 = vld [vmem:[%s4339_s1 + $0xa8] sm:$0xff]  ;;  %v2645_v54 = vld [vmem:[%s4339_s1 + $0xa0] sm:$0xff]  ;;  %v2644_v8 = vld [vmem:[%s4339_s1 + $0x98] sm:$0xff]  ;;  %s226_s4 = scalar_lea.vmem %s4343_s5, %s2684_s19 }
  0x12   : > { %299 = vmatpush1.msra.mxu0 %v2770_v6  ;;  %v410_v23 = vand.u32 4294901760, %v2798_v16  ;;  %v417_v24 = vand.u32 4294901760, %v2801_v17  ;;  %v424_v25 = vand.u32 4294901760, %v2806_v19  ;;  %v2837_v31 = vsub.f32 %v2653_v10, %v2788_v13  ;;  %s2884_s25 = scalar_lea.vmem %s4338_s0, %s2685_s17 }
  0x13   : > { %300 = vmatprep.subr.mxu0 %v2711_v4  ;;  %v4354_v28 = vand.u32 4294901760, %v2817_v21  ;;  %v4351_v30 = vand.u32 4294901760, %v2820_v22  ;;  %v2850_v35 = vsub.f32 %v2652_v14, %v2803_v18  ;;  %v2854_v36 = vand.u32 4294901760, %v2649_v27  ;;  %v2911_v58 = vld [vmem:[%s2884_s25 + $0x8] sm:$0xff]  ;;  %v2920_v62 = vld [vmem:[%s2884_s25 + $0x18] sm:$0xff]  ;;  %v2930_v1 = vld [vmem:[%s2884_s25] sm:$0xff] }
  0x14   : > { %302 = vmatpush1.msra.mxu0 %v2772_v7  ;;  %v411_v32 = vsub.f32 %v2798_v16, %v410_v23  ;;  %v418_v33 = vsub.f32 %v2801_v17, %v417_v24  ;;  %v425_v34 = vsub.f32 %v2806_v19, %v424_v25  ;;  %v4350_v41 = vand.u32 4294901760, %v2837_v31  ;;  %v2942_v14 = vld [vmem:[%s2884_s25 + $0x10] sm:$0xff] }
  0x15   : > { %303 = vmatprep.subr.mxu0 %v2711_v4  ;;  %v432_v40 = vsub.f32 %v2817_v21, %v4354_v28  ;;  %v4348_v42 = vand.u32 4294901760, %v2850_v35  ;;  %v2870_v44 = vsub.f32 %v2651_v15, %v2826_v26  ;;  %v439_v46 = vsub.f32 %v2820_v22, %v4351_v30 }
  0x16   : > { %305 = vmatpush1.msra.mxu0 %v2784_v11  ;;  %v412_v38 = vand.u32 4294901760, %v411_v32  ;;  %v419_v39 = vand.u32 4294901760, %v418_v33  ;;  %v426_v45 = vand.u32 4294901760, %v425_v34  ;;  %v2876_v47 = vand.u32 4294901760, %v2648_v37  ;;  %v2643_v33 = vld [vmem:[%s4339_s1 + $0x90] sm:$0xff] }
  0x17   : > { %306 = vmatprep.subr.mxu0 %v2711_v4  ;;  %v2879_v48 = vsub.f32 %v2650_v20, %v2833_v29  ;;  %v4347_v49 = vand.u32 4294901760, %v2870_v44  ;;  %v433_v51 = vand.u32 4294901760, %v432_v40  ;;  %v446_v52 = vsub.f32 %v2837_v31, %v4350_v41 }
  0x18   : > { %308 = vmatpush1.msra.mxu0 %v2786_v12  ;;  %413 = vmatpush1.msra.mxu1 %v412_v38  ;;  %v2896_v53 = vand.u32 4294901760, %v2647_v43  ;;  %v2902_v55 = vsub.f32 %v2649_v27, %v2854_v36  ;;  %v453_v56 = vsub.f32 %v2850_v35, %v4348_v42  ;;  %v440_v59 = vand.u32 4294901760, %v439_v46 }
  0x19   : > { %309 = vmatprep.subr.mxu0 %v2711_v4  ;;  %414 = vmatprep.subr.mxu1 %v2711_v4  ;;  %v4346_v57 = vand.u32 4294901760, %v2879_v48  ;;  %v2914_v60 = vand.u32 4294901760, %v2646_v50  ;;  %v2917_v61 = vsub.f32 %v2648_v37, %v2876_v47  ;;  %v460_v63 = vsub.f32 %v2870_v44, %v4347_v49 }
  0x1a   : > { %311 = vmatpush1.msra.mxu0 %v2788_v13  ;;  %420 = vmatpush1.msra.mxu1 %v419_v39  ;;  %v2927_v0 = vand.u32 4294901760, %v2645_v54  ;;  %v447_v2 = vand.u32 4294901760, %v446_v52  ;;  %v4344_v3 = vand.u32 4294901760, %v2902_v55  ;;  %v2938_v9 = vsub.f32 %v2647_v43, %v2896_v53 }
  0x1b   : > { %312 = vmatprep.subr.mxu0 %v2711_v4  ;;  %421 = vmatprep.subr.mxu1 %v2711_v4  ;;  %v280_v10 = vrot.slane %v2911_v58, 1  ;;  %v454_v15 = vand.u32 4294901760, %v453_v56  ;;  %v467_v20 = vsub.f32 %v2879_v48, %v4346_v57  ;;  %v281_v27 = vrot.slane %v2920_v62, 1 }
  0x1c   : > { %314 = vmatpush1.msra.mxu0 %v2803_v18  ;;  %427 = vmatpush1.msra.mxu1 %v426_v45  ;;  %v4345_v32 = vand.u32 4294901760, %v2917_v61  ;;  %v2956_v34 = vsub.f32 %v2646_v50, %v2914_v60  ;;  %vm289_vm1 = vcmask 130048   ;;  %v277_v37 = vrot.slane %v2930_v1, 1  ;;  %v2660_v50 = vld [vmem:[%s4339_s1 + $0x118] sm:$0xff] }
  0x1d   : > { %315 = vmatprep.subr.mxu0 %v2711_v4  ;;  %428 = vmatprep.subr.mxu1 %v2711_v4  ;;  %v461_v38 = vand.u32 4294901760, %v460_v63  ;;  %v2961_v39 = vand.u32 4294901760, %v2644_v8  ;;  %v282_v40 = vsel %vm276_vm0, %v280_v10, %v281_v27  ;;  %v278_v43 = vrot.slane %v2942_v14, 1 }
  0x1e   : > { %317 = vmatpush1.msra.mxu0 %v2826_v26  ;;  %434 = vmatpush1.msra.mxu1 %v433_v51  ;;  %v474_v45 = vsub.f32 %v2902_v55, %v4344_v3  ;;  %v4349_v46 = vand.u32 4294901760, %v2938_v9  ;;  %v2976_v51 = vsub.f32 %v2645_v54, %v2927_v0  ;;  %v290_v52 = vsel %vm289_vm1, %v282_v40, 0  ;;  %v2659_v40 = vld [vmem:[%s4339_s1 + $0x110] sm:$0xff] }
  0x1f   : > { %318 = vmatprep.subr.mxu0 %v2711_v4  ;;  %435 = vmatprep.subr.mxu1 %v2711_v4  ;;  %v2981_v56 = vand.u32 4294901760, %v2643_v33  ;;  %v279_v63 = vsel %vm276_vm0, %v277_v37, %v278_v43  ;;  %v481_v54 = vsub.f32 %v2917_v61, %v4345_v32  ;;  %v4352_v10 = vand.u32 4294901760, %v2956_v34 }
  0x20   : > { %320 = vmatpush1.msra.mxu0 %v2833_v29  ;;  %441 = vmatpush1.msra.mxu1 %v440_v59  ;;  %v2983_v59 = vand.u32 4294901760, %v290_v52  ;;  %v2996_v3 = vand.u32 4294901760, %v279_v63  ;;  %v3000_v37 = vand.u32 4294901760, %v2660_v50  ;;  %v475_v32 = vand.u32 4294901760, %v474_v45 }
  0x21   : > { %321 = vmatprep.subr.mxu0 %v2711_v4  ;;  %442 = vmatprep.subr.mxu1 %v2711_v4  ;;  %v488_v57 = vsub.f32 %v2938_v9, %v4349_v46  ;;  %v4353_v49 = vand.u32 4294901760, %v2976_v51  ;;  %v482_v45 = vand.u32 4294901760, %v481_v54  ;;  %vm1789_vm2 = vcmask 1045504  }
  0x22   : > { %323 = vmatpush1.msra.mxu0 %v2854_v36  ;;  %448 = vmatpush1.msra.mxu1 %v447_v2  ;;  %v468_v2 = vand.u32 4294901760, %v467_v20  ;;  %v3006_v20 = vsub.f32 %v2644_v8, %v2961_v39  ;;  %v3014_v42 = vsub.f32 %v279_v63, %v2996_v3  ;;  %v495_v63 = vsub.f32 %v2956_v34, %v4352_v10 }
  0x23   : > { %324 = vmatprep.subr.mxu0 %v2711_v4  ;;  %449 = vmatprep.subr.mxu1 %v2711_v4  ;;  %v3033_v30 = vsub.f32 %v2660_v50, %v3000_v37 }
  0x24   : > { %326 = vmatpush1.msra.mxu0 %v2876_v47  ;;  %455 = vmatpush1.msra.mxu1 %v454_v15  ;;  %v3003_v15 = vsub.f32 %v290_v52, %v2983_v59  ;;  %v3018_v52 = vand.u32 4294901760, %v2659_v40  ;;  %v4355_v46 = vand.u32 4294901760, %v3014_v42  ;;  %v4356_v41 = vand.u32 4294901760, %v3006_v20 }
  0x25   : > { %327 = vmatprep.subr.mxu0 %v2711_v4  ;;  %456 = vmatprep.subr.mxu1 %v2711_v4  ;;  %v550_v28 = vand.u32 4294901760, %v3033_v30 }
  0x26   : > { %329 = vmatpush1.msra.mxu0 %v2896_v53  ;;  %462 = vmatpush1.msra.mxu1 %v461_v38  ;;  %v378_v8 = vand.u32 4294901760, %v3003_v15  ;;  %v3022_v38 = vsub.f32 %v2643_v33, %v2981_v56  ;;  %v489_v33 = vand.u32 4294901760, %v488_v57  ;;  %v3046_v50 = vsub.f32 %v2659_v40, %v3018_v52 }
  0x27   : > { %330 = vmatprep.subr.mxu0 %v2711_v4  ;;  %463 = vmatprep.subr.mxu1 %v2711_v4  ;;  %v496_v57 = vand.u32 4294901760, %v495_v63 }
  0x28   : > { %332 = vmatpush1.msra.mxu0 %v2914_v60  ;;  %469 = vmatpush1.msra.mxu1 %v468_v2  ;;  %v502_v2 = vsub.f32 %v2976_v51, %v4353_v49  ;;  %v379_v54 = vsub.f32 %v3003_v15, %v378_v8  ;;  %v515_v10 = vand.u32 4294901760, %v3022_v38  ;;  %v509_v49 = vsub.f32 %v3006_v20, %v4356_v41 }
  0x29   : > { %333 = vmatprep.subr.mxu0 %v2711_v4  ;;  %470 = vmatprep.subr.mxu1 %v2711_v4 }
  0x2a   : > { %335 = vmatpush1.msra.mxu0 %v2927_v0  ;;  %476 = vmatpush1.msra.mxu1 %v475_v32  ;;  %v385_v32 = vsub.f32 %v3014_v42, %v4355_v46  ;;  %v503_v40 = vand.u32 4294901760, %v502_v2  ;;  %v516_v63 = vsub.f32 %v3022_v38, %v515_v10  ;;  %v557_v46 = vand.u32 4294901760, %v3046_v50 }
  0x2b   : > { %336 = vmatprep.subr.mxu0 %v2711_v4  ;;  %477 = vmatprep.subr.mxu1 %v2711_v4  ;;  %v551_v2 = vsub.f32 %v3033_v30, %v550_v28 }
  0x2c   : > { %338 = vmatpush1.msra.mxu0 %v2961_v39  ;;  %483 = vmatpush1.msra.mxu1 %v482_v45  ;;  %v380_v45 = vand.u32 4294901760, %v379_v54  ;;  %v386_v41 = vand.u32 4294901760, %v385_v32  ;;  %v517_v54 = vand.u32 4294901760, %v516_v63  ;;  %v232_v32 = vld [vmem:[%s2884_s25 + $0x28] sm:$0x3] }
  0x2d   : > { %339 = vmatprep.subr.mxu0 %v2711_v4  ;;  %484 = vmatprep.subr.mxu1 %v2711_v4  ;;  %v231_v63 = vld [vmem:[%s2884_s25 + $0x20] sm:$0x3] }
  0x2e   : > { %341 = vmatpush1.msra.mxu0 %v2981_v56  ;;  %490 = vmatpush1.msra.mxu1 %v489_v33  ;;  %v510_v33 = vand.u32 4294901760, %v509_v49  ;;  %v552_v49 = vand.u32 4294901760, %v551_v2 }
  0x2f   : > { %370 = vmatprep.subr.mxu0 %v2711_v4  ;;  %491 = vmatprep.subr.mxu1 %v2711_v4 }
  0x30   : > { %372 = vmatpush2.msra.mxu0 %v3000_v37  ;;  %497 = vmatpush1.msra.mxu1 %v496_v57  ;;  %v558_v57 = vsub.f32 %v3046_v50, %v557_v46 }
  0x31   : > { %373 = vmatprep.subr.mxu0 %v2711_v4  ;;  %498 = vmatprep.subr.mxu1 %v2711_v4 }
  0x32   : > { %375 = vmatpush2.msra.mxu0 %v3018_v52  ;;  %504 = vmatpush1.msra.mxu1 %v503_v40  ;;  %v285_v40 = vrot.slane %v232_v32, 1 }
  0x33   : > { %381 = vmatprep.mubr.f32.mxu0 %v380_v45  ;;  %505 = vmatprep.subr.mxu1 %v2711_v4  ;;  %v559_v45 = vand.u32 4294901760, %v558_v57 }
  0x34   : > { %576 = vmatprep.subr.mxu0 %v2711_v4  ;;  %387 = vmatmul.mubr.f32.vlgmr.msra.gmra.mxu0 %v386_v41  ;;  %v286_v41 = vsel %vm276_vm0, %v281_v27, %v285_v40 }
  0x35   : > { %511 = vmatpush1.msra.mxu1 %v510_v33  ;;  %579 = vmatpush1.msra.mxu0 %v2798_v16  ;;  %v283_v33 = vrot.slane %v231_v63, 1  ;;  %v292_v2 = vsel %vm289_vm1, %v286_v41, 0  ;;  %v4388_v16 = vand.u32 4294901760, %v2817_v21 }
  0x36   : > { %512 = vmatprep.subr.mxu1 %v2711_v4  ;;  %580 = vmatprep.subr.mxu0 %v2711_v4 }
  0x37   : > { %518 = vmatpush1.msra.mxu1 %v517_v54  ;;  %583 = vmatpush1.msra.mxu0 %v2801_v17  ;;  %v284_v27 = vsel %vm276_vm0, %v278_v43, %v283_v33  ;;  %v3106_v54 = vand.u32 4294901760, %v292_v2  ;;  %v4389_v17 = vand.u32 4294901760, %v3014_v42 }
  0x38   : > { %547 = vmatprep.subr.mxu1 %v2711_v4  ;;  %584 = vmatprep.subr.mxu0 %v2711_v4  ;;  %v3110_v57 = vand.u32 4294901760, %v284_v27 }
  0x39   : > { %553 = vmatpush2.msra.mxu1 %v552_v49  ;;  %587 = vmatpush1.msra.mxu0 %v2806_v19  ;;  %v3119_v43 = vsub.f32 %v292_v2, %v3106_v54  ;;  %v4390_v19 = vand.u32 4294901760, %v2820_v22 }
  0x3a   : > { %554 = vmatprep.subr.mxu1 %v2711_v4  ;;  %588 = vmatprep.subr.mxu0 %v2711_v4  ;;  %v3124_v32 = vsub.f32 %v284_v27, %v3110_v57 }
  0x3b   : > { %560 = vmatpush2.msra.mxu1 %v559_v45  ;;  %562 = vmatprep.mubr.f32.mxu1 %v2983_v59  ;;  %v393_v49 = vand.u32 4294901760, %v3119_v43 }
  0x3c   : > { %591 = vmatpush1.msra.mxu0 %v2817_v21  ;;  %564 = vmatmul.mubr.f32.vlgmr.msra.gmra.mxu1 %v2996_v3  ;;  %v399_v40 = vand.u32 4294901760, %v3124_v32  ;;  %v4391_v21 = vand.u32 4294901760, %v2837_v31 }
  0x3d   : > { %592 = vmatprep.subr.mxu0 %v2711_v4  ;;  %695 = vmatprep.subr.mxu1 %v2711_v4  ;;  %v394_v45 = vsub.f32 %v3119_v43, %v393_v49 }
  0x3e   : > { %595 = vmatpush1.msra.mxu0 %v2820_v22  ;;  %697 = vmatpush1.msra.mxu1 %v2768_v5  ;;  %v400_v63 = vsub.f32 %v3124_v32, %v399_v40  ;;  %v4393_v22 = vand.u32 4294901760, %v2870_v44 }
  0x3f   : > { %596 = vmatprep.subr.mxu0 %v2711_v4  ;;  %698 = vmatprep.subr.mxu1 %v2711_v4  ;;  %v395_v41 = vand.u32 4294901760, %v394_v45 }
  0x40   : > { %599 = vmatpush1.msra.mxu0 %v2837_v31  ;;  %700 = vmatpush1.msra.mxu1 %v2770_v6  ;;  %v401_v33 = vand.u32 4294901760, %v400_v63  ;;  %v246_v31 = vld [vmem:[%s4339_s1 + $0x68] sm:$0xff]  ;;  %v237_v63 = vld [vmem:[%s4339_s1 + $0x20] sm:$0xff] }
  0x41   : > { %600 = vmatprep.subr.mxu0 %v2711_v4  ;;  %701 = vmatprep.subr.mxu1 %v2711_v4 }
  0x42   : > { %603 = vmatpush1.msra.mxu0 %v2850_v35  ;;  %703 = vmatpush1.msra.mxu1 %v2772_v7 }
  0x43   : > { %604 = vmatprep.subr.mxu0 %v2711_v4  ;;  %704 = vmatprep.subr.mxu1 %v2711_v4 }
  0x44   : > { %607 = vmatpush1.msra.mxu0 %v2870_v44  ;;  %706 = vmatpush1.msra.mxu1 %v2784_v11 }
  0x45   : > { %608 = vmatprep.subr.mxu0 %v2711_v4  ;;  %707 = vmatprep.subr.mxu1 %v2711_v4 }
  0x46   : > { %611 = vmatpush1.msra.mxu0 %v2879_v48  ;;  %709 = vmatpush1.msra.mxu1 %v2786_v12 }
  0x47   : > { %612 = vmatprep.subr.mxu0 %v2711_v4  ;;  %710 = vmatprep.subr.mxu1 %v2711_v4 }
  0x48   : > { %615 = vmatpush1.msra.mxu0 %v2902_v55  ;;  %712 = vmatpush1.msra.mxu1 %v2788_v13 }
  0x49   : > { %616 = vmatprep.subr.mxu0 %v2711_v4  ;;  %713 = vmatprep.subr.mxu1 %v2711_v4 }
  0x4a   : > { %619 = vmatpush1.msra.mxu0 %v2917_v61  ;;  %715 = vmatpush1.msra.mxu1 %v2803_v18 }
  0x4b   : > { %620 = vmatprep.subr.mxu0 %v2711_v4  ;;  %716 = vmatprep.subr.mxu1 %v2711_v4 }
  0x4c   : > { %623 = vmatpush1.msra.mxu0 %v2938_v9  ;;  %718 = vmatpush1.msra.mxu1 %v2826_v26 }
  0x4d   : > { %624 = vmatprep.subr.mxu0 %v2711_v4  ;;  %719 = vmatprep.subr.mxu1 %v2711_v4 }
  0x4e   : > { %627 = vmatpush1.msra.mxu0 %v2956_v34  ;;  %721 = vmatpush1.msra.mxu1 %v2833_v29 }
  0x4f   : > { %628 = vmatprep.subr.mxu0 %v2711_v4  ;;  %722 = vmatprep.subr.mxu1 %v2711_v4 }
  0x50   : > { %631 = vmatpush1.msra.mxu0 %v2976_v51  ;;  %724 = vmatpush1.msra.mxu1 %v2854_v36 }
  0x51   : > { %632 = vmatprep.subr.mxu0 %v2711_v4  ;;  %725 = vmatprep.subr.mxu1 %v2711_v4 }
  0x52   : > { %635 = vmatpush1.msra.mxu0 %v3006_v20  ;;  %727 = vmatpush1.msra.mxu1 %v2876_v47 }
  0x53   : > { %636 = vmatprep.subr.mxu0 %v2711_v4  ;;  %728 = vmatprep.subr.mxu1 %v2711_v4 }
  0x54   : > { %396 = vmatprep.mubr.f32.mxu0 %v395_v41  ;;  %639 = vmatpush1.msra.mxu0 %v3022_v38 }
  0x55   : > { %730 = vmatpush1.msra.mxu1 %v2896_v53  ;;  %402 = vmatmul.mubr.f32.gmra.mxu0 %v401_v33 }
  0x56   : > { %668 = vmatprep.subr.mxu0 %v2711_v4  ;;  %731 = vmatprep.subr.mxu1 %v2711_v4 }
  0x57   : > { %671 = vmatpush2.msra.mxu0 %v3033_v30  ;;  %733 = vmatpush1.msra.mxu1 %v2914_v60 }
  0x58   : > { %672 = vmatprep.subr.mxu0 %v2711_v4  ;;  %734 = vmatprep.subr.mxu1 %v2711_v4 }
  0x59   : > { %675 = vmatpush2.msra.mxu0 %v3046_v50  ;;  %678 = vmatprep.mubr.f32.mxu0 %v3003_v15  ;;  %v240_v15 = vld [vmem:[%s4339_s1 + $0x38] sm:$0xff] }
  0x5a   : > { %736 = vmatpush1.msra.mxu1 %v2927_v0  ;;  %681 = vmatmul.mubr.f32.vlgmr.msra.gmra.mxu0 %v3014_v42  ;;  %v3290_v42 = vand.u32 4294901760, %v246_v31 }
  0x5b   : > { %737 = vmatprep.subr.mxu1 %v2711_v4  ;;  %800 = vmatprep.subr.mxu0 %v2711_v4 }
  0x5c   : > { %739 = vmatpush1.msra.mxu1 %v2961_v39  ;;  %804 = vmatpush1.msra.mxu0 %v410_v23  ;;  %v4399_v23 = vand.u32 4294901760, %v2976_v51 }
  0x5d   : > { %569 = vmatprep.mubr.f32.mxu1 %v3106_v54  ;;  %740 = vmatprep.subr.mxu1 %v2711_v4 }
  0x5e   : > { %805 = vmatprep.subr.mxu0 %v2711_v4  ;;  %571 = vmatmul.mubr.f32.gmra.mxu1 %v3110_v57 }
  0x5f   : > { %742 = vmatpush1.msra.mxu1 %v2981_v56  ;;  %809 = vmatpush1.msra.mxu0 %v417_v24  ;;  %v247_v24 = vld [vmem:[%s4339_s1 + $0x70] sm:$0xff] }
  0x60   : > { %687 = vmatprep.mubr.f32.mxu0 %v3119_v43  ;;  %771 = vmatprep.subr.mxu1 %v2711_v4  ;;  %v3376_v43 = vand.u32 4294901760, %v240_v15 }
  0x61   : > { %810 = vmatprep.subr.mxu0 %v2711_v4  ;;  %690 = vmatmul.mubr.f32.gmra.mxu0 %v3124_v32 }
  0x62   : > { %773 = vmatpush2.msra.mxu1 %v3000_v37  ;;  %814 = vmatpush1.msra.mxu0 %v424_v25 }
  0x63   : > { %774 = vmatprep.subr.mxu1 %v2711_v4  ;;  %815 = vmatprep.subr.mxu0 %v2711_v4 }
  0x64   : > { %776 = vmatpush2.msra.mxu1 %v3018_v52  ;;  %780 = vmatprep.mubr.f32.mxu1 %v378_v8 }
  0x65   : > { %819 = vmatpush1.msra.mxu0 %v4388_v16  ;;  %784 = vmatmul.mubr.f32.vlgmr.msra.gmra.mxu1 %v4389_v17  ;;  %v3403_v16 = vsub.f32 %v240_v15, %v3376_v43 }
  0x66   : > { %820 = vmatprep.subr.mxu0 %v2711_v4  ;;  %933 = vmatprep.subr.mxu1 %v2711_v4 }
  0x67   : > { %824 = vmatpush1.msra.mxu0 %v4390_v19  ;;  %935 = vmatpush1.msra.mxu1 %v2768_v5  ;;  %v4392_v5 = vand.u32 4294901760, %v2850_v35 }
  0x68   : > { %825 = vmatprep.subr.mxu0 %v2711_v4  ;;  %936 = vmatprep.subr.mxu1 %v2711_v4 }
  0x69   : > { %791 = vmatprep.mubr.f32.mxu1 %v393_v49  ;;  %829 = vmatpush1.msra.mxu0 %v4391_v21  ;;  %v3412_v21 = vand.u32 4294901760, %v237_v63 }
  0x6a   : > { %938 = vmatpush1.msra.mxu1 %v2770_v6  ;;  %830 = vmatprep.subr.mxu0 %v2711_v4  ;;  %v4394_v6 = vand.u32 4294901760, %v2879_v48  ;;  %v243_v48 = vld [vmem:[%s4339_s1 + $0x50] sm:$0xff] }
  0x6b   : > { %795 = vmatmul.mubr.f32.gmra.mxu1 %v399_v40  ;;  %939 = vmatprep.subr.mxu1 %v2711_v4  ;;  %v238_v40 = vld [vmem:[%s4339_s1 + $0x28] sm:$0xff] }
  0x6c   : > { %834 = vmatpush1.msra.mxu0 %v4392_v5  ;;  %941 = vmatpush1.msra.mxu1 %v2772_v7  ;;  %v4395_v7 = vand.u32 4294901760, %v2902_v55  ;;  %v3408_v19 = vand.u32 4294901760, %v238_v40  ;;  %v236_v5 = vld [vmem:[%s4339_s1 + $0x18] sm:$0xff] }
  0x6d   : > { %835 = vmatprep.subr.mxu0 %v2711_v4  ;;  %942 = vmatprep.subr.mxu1 %v2711_v4 }
  0x6e   : > { %839 = vmatpush1.msra.mxu0 %v4393_v22  ;;  %944 = vmatpush1.msra.mxu1 %v2784_v11  ;;  %v4396_v11 = vand.u32 4294901760, %v2917_v61 }
  0x6f   : > { %840 = vmatprep.subr.mxu0 %v2711_v4  ;;  %945 = vmatprep.subr.mxu1 %v2711_v4 }
  0x70   : > { %844 = vmatpush1.msra.mxu0 %v4394_v6  ;;  %947 = vmatpush1.msra.mxu1 %v2786_v12  ;;  %v4397_v12 = vand.u32 4294901760, %v2938_v9  ;;  %v3329_v9 = vand.u32 4294901760, %v243_v48 }
  0x71   : > { %845 = vmatprep.subr.mxu0 %v2711_v4  ;;  %948 = vmatprep.subr.mxu1 %v2711_v4 }
  0x72   : > { %849 = vmatpush1.msra.mxu0 %v4395_v7  ;;  %950 = vmatpush1.msra.mxu1 %v2788_v13  ;;  %v4398_v13 = vand.u32 4294901760, %v2956_v34 }
  0x73   : > { %850 = vmatprep.subr.mxu0 %v2711_v4  ;;  %951 = vmatprep.subr.mxu1 %v2711_v4 }
  0x74   : > { %854 = vmatpush1.msra.mxu0 %v4396_v11  ;;  %953 = vmatpush1.msra.mxu1 %v2803_v18  ;;  %v248_v18 = vld [vmem:[%s4339_s1 + $0x78] sm:$0xff] }
  0x75   : > { %855 = vmatprep.subr.mxu0 %v2711_v4  ;;  %954 = vmatprep.subr.mxu1 %v2711_v4  ;;  %v3264_v25 = vand.u32 4294901760, %v248_v18 }
  0x76   : > { %859 = vmatpush1.msra.mxu0 %v4397_v12  ;;  %956 = vmatpush1.msra.mxu1 %v2826_v26  ;;  %v4400_v26 = vand.u32 4294901760, %v3006_v20  ;;  %v3358_v20 = vsub.f32 %v243_v48, %v3329_v9  ;;  %v1030_v12 = vsel %vm289_vm1, %v2911_v58, 0  ;;  %v3445_v58 = vsub.f32 %v237_v63, %v3412_v21 }
  0x77   : > { %860 = vmatprep.subr.mxu0 %v2711_v4  ;;  %957 = vmatprep.subr.mxu1 %v2711_v4  ;;  %v3282_v35 = vsub.f32 %v248_v18, %v3264_v25  ;;  %v3434_v18 = vsub.f32 %v238_v40, %v3408_v19  ;;  %v3455_v48 = vand.u32 4294901760, %v1030_v12 }
  0x78   : > { %864 = vmatpush1.msra.mxu0 %v4398_v13  ;;  %959 = vmatpush1.msra.mxu1 %v2833_v29  ;;  %v3271_v29 = vand.u32 4294901760, %v247_v24  ;;  %v4359_v63 = vand.u32 4294901760, %v3445_v58 }
  0x79   : > { %865 = vmatprep.subr.mxu0 %v2711_v4  ;;  %960 = vmatprep.subr.mxu1 %v2711_v4  ;;  %v1150_v30 = vand.u32 4294901760, %v3282_v35 }
  0x7a   : > { %869 = vmatpush1.msra.mxu0 %v4399_v23  ;;  %962 = vmatpush1.msra.mxu1 %v2854_v36  ;;  %v245_v36 = vld [vmem:[%s4339_s1 + $0x60] sm:$0xff]  ;;  %v3295_v44 = vsub.f32 %v247_v24, %v3271_v29  ;;  %v3436_v23 = vand.u32 4294901760, %v236_v5  ;;  %v235_v24 = vld [vmem:[%s4339_s1 + $0x10] sm:$0xff] }
  0x7b   : > { %870 = vmatprep.subr.mxu0 %v2711_v4  ;;  %963 = vmatprep.subr.mxu1 %v2711_v4  ;;  %v1151_v34 = vsub.f32 %v3282_v35, %v1150_v30 }
  0x7c   : > { %874 = vmatpush1.msra.mxu0 %v4400_v26  ;;  %965 = vmatpush1.msra.mxu1 %v2876_v47  ;;  %v244_v47 = vld [vmem:[%s4339_s1 + $0x58] sm:$0xff]  ;;  %v1157_v61 = vand.u32 4294901760, %v3295_v44 }
  0x7d   : > { %875 = vmatprep.subr.mxu0 %v2711_v4  ;;  %966 = vmatprep.subr.mxu1 %v2711_v4  ;;  %v3316_v55 = vand.u32 4294901760, %v244_v47  ;;  %v1152_v50 = vand.u32 4294901760, %v1151_v34 }
  0x7e   : > { %879 = vmatpush1.msra.mxu0 %v515_v10  ;;  %968 = vmatpush1.msra.mxu1 %v2896_v53  ;;  %v3314_v53 = vsub.f32 %v246_v31, %v3290_v42 }
  0x7f   : > { %908 = vmatprep.subr.mxu0 %v2711_v4  ;;  %969 = vmatprep.subr.mxu1 %v2711_v4  ;;  %v3344_v51 = vsub.f32 %v244_v47, %v3316_v55  ;;  %v234_v47 = vld [vmem:[%s4339_s1 + $0x8] sm:$0xff] }
  0x80   : > { %912 = vmatpush2.msra.mxu0 %v550_v28  ;;  %971 = vmatpush1.msra.mxu1 %v2914_v60  ;;  %v3303_v28 = vand.u32 4294901760, %v245_v36  ;;  %v242_v60 = vld [vmem:[%s4339_s1 + $0x48] sm:$0xff]  ;;  %v1164_v10 = vand.u32 4294901760, %v3314_v53 }
  0x81   : > { %913 = vmatprep.subr.mxu0 %v2711_v4  ;;  %972 = vmatprep.subr.mxu1 %v2711_v4  ;;  %v4366_v32 = vand.u32 4294901760, %v3344_v51 }
  0x82   : > { %917 = vmatpush2.msra.mxu0 %v557_v46  ;;  %919 = vmatprep.mubr.f32.mxu0 %v2983_v59  ;;  %v241_v46 = vld [vmem:[%s4339_s1 + $0x40] sm:$0xff]  ;;  %v1165_v27 = vsub.f32 %v3314_v53, %v1164_v10 }
  0x83   : > { %974 = vmatpush1.msra.mxu1 %v2927_v0  ;;  %921 = vmatmul.mubr.f32.vlgmr.msra.gmra.mxu0 %v2996_v3  ;;  %v3327_v0 = vsub.f32 %v245_v36, %v3303_v28  ;;  %v3360_v8 = vand.u32 4294901760, %v241_v46  ;;  %v1179_v17 = vsub.f32 %v3344_v51, %v4366_v32 }
  0x84   : > { %975 = vmatprep.subr.mxu1 %v2711_v4  ;;  %1034 = vmatprep.subr.mxu0 %v2711_v4  ;;  %v1166_v33 = vand.u32 4294901760, %v1165_v27  ;;  %v1032_v27 = vsel %vm289_vm1, %v2920_v62, 0 }
  0x85   : > { %977 = vmatpush1.msra.mxu1 %v2961_v39  ;;  %1036 = vmatpush1.msra.mxu0 %v3264_v25  ;;  %v3336_v39 = vand.u32 4294901760, %v242_v60  ;;  %v4368_v38 = vand.u32 4294901760, %v3327_v0  ;;  %v1180_v13 = vand.u32 4294901760, %v1179_v17 }
  0x86   : > { %978 = vmatprep.subr.mxu1 %v2711_v4  ;;  %1037 = vmatprep.subr.mxu0 %v2711_v4 }
  0x87   : > { %926 = vmatprep.mubr.f32.mxu0 %v3106_v54  ;;  %980 = vmatpush1.msra.mxu1 %v2981_v56  ;;  %v1158_v56 = vsub.f32 %v3295_v44, %v1157_v61  ;;  %v3366_v2 = vsub.f32 %v242_v60, %v3336_v39  ;;  %v3458_v60 = vand.u32 4294901760, %v2930_v1 }
  0x88   : > { %1039 = vmatpush1.msra.mxu0 %v3271_v29  ;;  %1009 = vmatprep.subr.mxu1 %v2711_v4 }
  0x89   : > { %928 = vmatmul.mubr.f32.gmra.mxu0 %v3110_v57  ;;  %1040 = vmatprep.subr.mxu0 %v2711_v4  ;;  %v1159_v49 = vand.u32 4294901760, %v1158_v56  ;;  %v4363_v41 = vand.u32 4294901760, %v3366_v2  ;;  %v3466_v56 = vsub.f32 %v236_v5, %v3436_v23  ;;  %v250_v5 = vld [vmem:[%s4339_s1 + $0x88] sm:$0xff] }
  0x8a   : > { %1011 = vmatpush2.msra.mxu1 %v3000_v37  ;;  %1042 = vmatpush1.msra.mxu0 %v3290_v42  ;;  %v239_v37 = vld [vmem:[%s4339_s1 + $0x30] sm:$0xff] }
  0x8b   : > { %1012 = vmatprep.subr.mxu1 %v2711_v4  ;;  %1043 = vmatprep.subr.mxu0 %v2711_v4  ;;  %v3392_v45 = vand.u32 4294901760, %v239_v37  ;;  %v1193_v11 = vsub.f32 %v3366_v2, %v4363_v41 }
  0x8c   : > { %1014 = vmatpush2.msra.mxu1 %v3018_v52  ;;  %1016 = vmatprep.mubr.f32.mxu1 %v2983_v59  ;;  %v3387_v59 = vsub.f32 %v241_v46, %v3360_v8  ;;  %v1172_v52 = vsub.f32 %v3327_v0, %v4368_v38  ;;  %v3462_v46 = vand.u32 4294901760, %v235_v24 }
  0x8d   : > { %1045 = vmatpush1.msra.mxu0 %v3303_v28  ;;  %1018 = vmatmul.mubr.f32.vlgmr.msra.gmra.mxu1 %v2996_v3  ;;  %v4364_v3 = vand.u32 4294901760, %v3358_v20  ;;  %v3419_v6 = vsub.f32 %v239_v37, %v3392_v45  ;;  %v1194_v34 = vand.u32 4294901760, %v1193_v11  ;;  %v233_v37 = vld [vmem:[%s4339_s1] sm:$0xff] }
  0x8e   : > { %1046 = vmatprep.subr.mxu0 %v2711_v4  ;;  %1147 = vmatprep.subr.mxu1 %v2711_v4  ;;  %v1173_v22 = vand.u32 4294901760, %v1172_v52  ;;  %v3492_v62 = vsub.f32 %v235_v24, %v3462_v46  ;;  %v3494_v17 = vand.u32 4294901760, %v233_v37 }
  0x8f   : > { %1048 = vmatpush1.msra.mxu0 %v3316_v55  ;;  %1153 = vmatpush1.msra.mxu1 %v1152_v50  ;;  %v1186_v7 = vsub.f32 %v3358_v20, %v4364_v3  ;;  %v4358_v36 = vand.u32 4294901760, %v3419_v6  ;;  %v4357_v50 = vand.u32 4294901760, %v3434_v18 }
  0x90   : > { %1049 = vmatprep.subr.mxu0 %v2711_v4  ;;  %1154 = vmatprep.subr.mxu1 %v2711_v4 }
  0x91   : > { %1023 = vmatprep.mubr.f32.mxu1 %v3106_v54  ;;  %1051 = vmatpush1.msra.mxu0 %v3329_v9  ;;  %v4361_v54 = vand.u32 4294901760, %v3387_v59  ;;  %v1187_v26 = vand.u32 4294901760, %v1186_v7  ;;  %v1214_v52 = vsub.f32 %v3419_v6, %v4358_v36  ;;  %v3503_v7 = vand.u32 4294901760, %v1032_v27 }
  0x92   : > { %1160 = vmatpush1.msra.mxu1 %v1159_v49  ;;  %1052 = vmatprep.subr.mxu0 %v2711_v4  ;;  %v3479_v49 = vand.u32 4294901760, %v234_v47  ;;  %v4365_v36 = vand.u32 4294901760, %v3492_v62 }
  0x93   : > { %1025 = vmatmul.mubr.f32.gmra.mxu1 %v3110_v57  ;;  %1161 = vmatprep.subr.mxu1 %v2711_v4  ;;  %v4360_v57 = vand.u32 4294901760, %v3403_v16  ;;  %v1200_v31 = vsub.f32 %v3387_v59, %v4361_v54 }
  0x94   : > { %1054 = vmatpush1.msra.mxu0 %v3336_v39  ;;  %1167 = vmatpush1.msra.mxu1 %v1166_v33  ;;  %v3487_v33 = vsub.f32 %v1030_v12, %v3455_v48  ;;  %v1221_v12 = vsub.f32 %v3434_v18, %v4357_v50  ;;  %v3513_v24 = vsub.f32 %v234_v47, %v3479_v49 }
  0x95   : > { %1055 = vmatprep.subr.mxu0 %v2711_v4  ;;  %1168 = vmatprep.subr.mxu1 %v2711_v4  ;;  %v1207_v15 = vsub.f32 %v3403_v16, %v4360_v57  ;;  %v1201_v40 = vand.u32 4294901760, %v1200_v31  ;;  %v1215_v31 = vand.u32 4294901760, %v1214_v52  ;;  %v3531_v50 = vsub.f32 %v233_v37, %v3494_v17 }
  0x96   : > { %1057 = vmatpush1.msra.mxu0 %v3360_v8  ;;  %1174 = vmatpush1.msra.mxu1 %v1173_v22  ;;  %v3501_v22 = vsub.f32 %v2930_v1, %v3458_v60  ;;  %v249_v1 = vld [vmem:[%s4339_s1 + $0x80] sm:$0xff]  ;;  %v1118_v47 = vand.u32 4294901760, %v3487_v33  ;;  %v3536_v52 = vsub.f32 %v1032_v27, %v3503_v7  ;;  %v4369_v37 = vand.u32 4294901760, %v3513_v24 }
  0x97   : > { %1058 = vmatprep.subr.mxu0 %v2711_v4  ;;  %1175 = vmatprep.subr.mxu1 %v2711_v4  ;;  %v1208_v11 = vand.u32 4294901760, %v1207_v15  ;;  %v3525_v15 = vand.u32 4294901760, %v250_v5  ;;  %v3542_v54 = vand.u32 4294901760, %v249_v1 }
  0x98   : > { %1060 = vmatpush1.msra.mxu0 %v3376_v43  ;;  %1181 = vmatpush1.msra.mxu1 %v1180_v13  ;;  %v4362_v13 = vand.u32 4294901760, %v3466_v56 }
  0x99   : > { %1061 = vmatprep.subr.mxu0 %v2711_v4  ;;  %1182 = vmatprep.subr.mxu1 %v2711_v4  ;;  %v3570_v3 = vsub.f32 %v249_v1, %v3542_v54 }
  0x9a   : > { %1063 = vmatpush1.msra.mxu0 %v3392_v45  ;;  %1188 = vmatpush1.msra.mxu1 %v1187_v26  ;;  %v3519_v26 = vand.u32 4294901760, %v2942_v14  ;;  %v1235_v57 = vsub.f32 %v3466_v56, %v4362_v13  ;;  %v1119_v13 = vsub.f32 %v3487_v33, %v1118_v47 }
  0x9b   : > { %1064 = vmatprep.subr.mxu0 %v2711_v4  ;;  %1189 = vmatprep.subr.mxu1 %v2711_v4 }
  0x9c   : > { %1066 = vmatpush1.msra.mxu0 %v3408_v19  ;;  %1195 = vmatpush1.msra.mxu1 %v1194_v34  ;;  %v1228_v34 = vsub.f32 %v3445_v58, %v4359_v63  ;;  %v1222_v63 = vand.u32 4294901760, %v1221_v12  ;;  %v3549_v27 = vsub.f32 %v2942_v14, %v3519_v26  ;;  %v3553_v12 = vsub.f32 %v250_v5, %v3525_v15 }
  0x9d   : > { %1067 = vmatprep.subr.mxu0 %v2711_v4  ;;  %1196 = vmatprep.subr.mxu1 %v2711_v4  ;;  %v1242_v14 = vsub.f32 %v3492_v62, %v4365_v36  ;;  %v4370_v5 = vand.u32 4294901760, %v3531_v50  ;;  %v1236_v41 = vand.u32 4294901760, %v1235_v57  ;;  %v1249_v36 = vsub.f32 %v3513_v24, %v4369_v37 }
  0x9e   : > { %1069 = vmatpush1.msra.mxu0 %v3412_v21  ;;  %1202 = vmatpush1.msra.mxu1 %v1201_v40  ;;  %v4367_v40 = vand.u32 4294901760, %v3501_v22  ;;  %v1139_v32 = vand.u32 4294901760, %v3549_v27 }
  0x9f   : > { %1070 = vmatprep.subr.mxu0 %v2711_v4  ;;  %1203 = vmatprep.subr.mxu1 %v2711_v4  ;;  %v1243_v57 = vand.u32 4294901760, %v1242_v14  ;;  %v1256_v37 = vsub.f32 %v3531_v50, %v4370_v5 }
  0xa0   : > { %1072 = vmatpush1.msra.mxu0 %v3436_v23  ;;  %1209 = vmatpush1.msra.mxu1 %v1208_v11  ;;  %v1229_v11 = vand.u32 4294901760, %v1228_v34  ;;  %v1133_v34 = vand.u32 4294901760, %v3536_v52  ;;  %v1140_v14 = vsub.f32 %v3549_v27, %v1139_v32 }
  0xa1   : > { %1073 = vmatprep.subr.mxu0 %v2711_v4  ;;  %1210 = vmatprep.subr.mxu1 %v2711_v4  ;;  %v1257_v5 = vand.u32 4294901760, %v1256_v37 }
  0xa2   : > { %1075 = vmatpush1.msra.mxu0 %v3462_v46  ;;  %1216 = vmatpush1.msra.mxu1 %v1215_v31  ;;  %v1125_v31 = vsub.f32 %v3501_v22, %v4367_v40  ;;  %v1120_v40 = vand.u32 4294901760, %v1119_v13  ;;  %v1134_v38 = vsub.f32 %v3536_v52, %v1133_v34  ;;  %v1297_v13 = vand.u32 4294901760, %v3570_v3 }
  0xa3   : > { %1076 = vmatprep.subr.mxu0 %v2711_v4  ;;  %1217 = vmatprep.subr.mxu1 %v2711_v4 }
  0xa4   : > { %1078 = vmatpush1.msra.mxu0 %v3479_v49  ;;  %1223 = vmatpush1.msra.mxu1 %v1222_v63  ;;  %v1290_v63 = vand.u32 4294901760, %v3553_v12  ;;  %v1126_v1 = vand.u32 4294901760, %v1125_v31 }
  0xa5   : > { %1079 = vmatprep.subr.mxu0 %v2711_v4  ;;  %1224 = vmatprep.subr.mxu1 %v2711_v4 }
  0xa6   : > { %1081 = vmatpush1.msra.mxu0 %v3494_v17  ;;  %1230 = vmatpush1.msra.mxu1 %v1229_v11  ;;  %v1250_v11 = vand.u32 4294901760, %v1249_v36  ;;  %v1291_v31 = vsub.f32 %v3553_v12, %v1290_v63  ;;  %v1298_v36 = vsub.f32 %v3570_v3, %v1297_v13 }
  0xa7   : > { %1110 = vmatprep.subr.mxu0 %v2711_v4  ;;  %1231 = vmatprep.subr.mxu1 %v2711_v4 }
  0xa8   : > { %1112 = vmatpush2.msra.mxu0 %v3525_v15  ;;  %1237 = vmatpush1.msra.mxu1 %v1236_v41  ;;  %v1135_v41 = vand.u32 4294901760, %v1134_v38  ;;  %v1299_v38 = vand.u32 4294901760, %v1298_v36 }
  0xa9   : > { %1113 = vmatprep.subr.mxu0 %v2711_v4  ;;  %1238 = vmatprep.subr.mxu1 %v2711_v4 }
  0xaa   : > { %1115 = vmatpush2.msra.mxu0 %v3542_v54  ;;  %1121 = vmatprep.mubr.f32.mxu0 %v1120_v40  ;;  %v1141_v40 = vand.u32 4294901760, %v1140_v14 }
  0xab   : > { %1244 = vmatpush1.msra.mxu1 %v1243_v57  ;;  %1127 = vmatmul.mubr.f32.vlgmr.msra.gmra.mxu0 %v1126_v1  ;;  %v1292_v57 = vand.u32 4294901760, %v1291_v31 }
  0xac   : > { %1245 = vmatprep.subr.mxu1 %v2711_v4  ;;  %1316 = vmatprep.subr.mxu0 %v2711_v4 }
  0xad   : > { %1251 = vmatpush1.msra.mxu1 %v1250_v11  ;;  %1319 = vmatpush1.msra.mxu0 %v3282_v35  ;;  %v4401_v35 = vand.u32 4294901760, %v3327_v0 }
  0xae   : > { %1252 = vmatprep.subr.mxu1 %v2711_v4  ;;  %1320 = vmatprep.subr.mxu0 %v2711_v4 }
  0xaf   : > { %1136 = vmatprep.mubr.f32.mxu0 %v1135_v41  ;;  %1258 = vmatpush1.msra.mxu1 %v1257_v5  ;;  %v2668_v5 = vld [vmem:[%s4339_s1 + $0x158] sm:$0xff] }
  0xb0   : > { %1323 = vmatpush1.msra.mxu0 %v3295_v44  ;;  %1287 = vmatprep.subr.mxu1 %v2711_v4  ;;  %v4402_v44 = vand.u32 4294901760, %v3501_v22  ;;  %v3879_v41 = vand.u32 4294901760, %v2668_v5 }
  0xb1   : > { %1142 = vmatmul.mubr.f32.gmra.mxu0 %v1141_v40  ;;  %1324 = vmatprep.subr.mxu0 %v2711_v4 }
  0xb2   : > { %1293 = vmatpush2.msra.mxu1 %v1292_v57  ;;  %1327 = vmatpush1.msra.mxu0 %v3314_v53  ;;  %v4404_v53 = vand.u32 4294901760, %v3358_v20  ;;  %v2666_v57 = vld [vmem:[%s4339_s1 + $0x148] sm:$0xff] }
  0xb3   : > { %1294 = vmatprep.subr.mxu1 %v2711_v4  ;;  %1328 = vmatprep.subr.mxu0 %v2711_v4 }
  0xb4   : > { %1300 = vmatpush2.msra.mxu1 %v1299_v38  ;;  %1302 = vmatprep.mubr.f32.mxu1 %v3455_v48 }
  0xb5   : > { %1331 = vmatpush1.msra.mxu0 %v3327_v0  ;;  %1304 = vmatmul.mubr.f32.vlgmr.msra.gmra.mxu1 %v3458_v60  ;;  %v4411_v0 = vand.u32 4294901760, %v3466_v56 }
  0xb6   : > { %1332 = vmatprep.subr.mxu0 %v2711_v4  ;;  %1435 = vmatprep.subr.mxu1 %v2711_v4 }
  0xb7   : > { %1335 = vmatpush1.msra.mxu0 %v3344_v51  ;;  %1437 = vmatpush1.msra.mxu1 %v3264_v25 }
  0xb8   : > { %1336 = vmatprep.subr.mxu0 %v2711_v4  ;;  %1438 = vmatprep.subr.mxu1 %v2711_v4 }
  0xb9   : > { %1309 = vmatprep.mubr.f32.mxu1 %v3503_v7  ;;  %1339 = vmatpush1.msra.mxu0 %v3358_v20  ;;  %v4413_v20 = vand.u32 4294901760, %v3513_v24 }
  0xba   : > { %1440 = vmatpush1.msra.mxu1 %v3271_v29  ;;  %1340 = vmatprep.subr.mxu0 %v2711_v4 }
  0xbb   : > { %1311 = vmatmul.mubr.f32.gmra.mxu1 %v3519_v26  ;;  %1441 = vmatprep.subr.mxu1 %v2711_v4 }
  0xbc   : > { %1343 = vmatpush1.msra.mxu0 %v3366_v2  ;;  %1443 = vmatpush1.msra.mxu1 %v3290_v42 }
  0xbd   : > { %1344 = vmatprep.subr.mxu0 %v2711_v4  ;;  %1444 = vmatprep.subr.mxu1 %v2711_v4 }
  0xbe   : > { %1347 = vmatpush1.msra.mxu0 %v3387_v59  ;;  %1446 = vmatpush1.msra.mxu1 %v3303_v28 }
  0xbf   : > { %1348 = vmatprep.subr.mxu0 %v2711_v4  ;;  %1447 = vmatprep.subr.mxu1 %v2711_v4 }
  0xc0   : > { %1351 = vmatpush1.msra.mxu0 %v3403_v16  ;;  %1449 = vmatpush1.msra.mxu1 %v3316_v55 }
  0xc1   : > { %1352 = vmatprep.subr.mxu0 %v2711_v4  ;;  %1450 = vmatprep.subr.mxu1 %v2711_v4 }
  0xc2   : > { %1355 = vmatpush1.msra.mxu0 %v3419_v6  ;;  %1452 = vmatpush1.msra.mxu1 %v3329_v9 }
  0xc3   : > { %1356 = vmatprep.subr.mxu0 %v2711_v4  ;;  %1453 = vmatprep.subr.mxu1 %v2711_v4 }
  0xc4   : > { %1359 = vmatpush1.msra.mxu0 %v3434_v18  ;;  %1455 = vmatpush1.msra.mxu1 %v3336_v39 }
  0xc5   : > { %1360 = vmatprep.subr.mxu0 %v2711_v4  ;;  %1456 = vmatprep.subr.mxu1 %v2711_v4 }
  0xc6   : > { %1363 = vmatpush1.msra.mxu0 %v3445_v58  ;;  %1458 = vmatpush1.msra.mxu1 %v3360_v8 }
  0xc7   : > { %1364 = vmatprep.subr.mxu0 %v2711_v4  ;;  %1459 = vmatprep.subr.mxu1 %v2711_v4 }
  0xc8   : > { %1367 = vmatpush1.msra.mxu0 %v3466_v56  ;;  %1461 = vmatpush1.msra.mxu1 %v3376_v43 }
  0xc9   : > { %1368 = vmatprep.subr.mxu0 %v2711_v4  ;;  %1462 = vmatprep.subr.mxu1 %v2711_v4 }
  0xca   : > { %1371 = vmatpush1.msra.mxu0 %v3492_v62  ;;  %1464 = vmatpush1.msra.mxu1 %v3392_v45 }
  0xcb   : > { %1372 = vmatprep.subr.mxu0 %v2711_v4  ;;  %1465 = vmatprep.subr.mxu1 %v2711_v4 }
  0xcc   : > { %1375 = vmatpush1.msra.mxu0 %v3513_v24  ;;  %1467 = vmatpush1.msra.mxu1 %v3408_v19 }
  0xcd   : > { %1376 = vmatprep.subr.mxu0 %v2711_v4  ;;  %1468 = vmatprep.subr.mxu1 %v2711_v4 }
  0xce   : > { %1379 = vmatpush1.msra.mxu0 %v3531_v50  ;;  %1470 = vmatpush1.msra.mxu1 %v3412_v21 }
  0xcf   : > { %1408 = vmatprep.subr.mxu0 %v2711_v4  ;;  %1471 = vmatprep.subr.mxu1 %v2711_v4 }
  0xd0   : > { %1411 = vmatpush2.msra.mxu0 %v3553_v12  ;;  %1473 = vmatpush1.msra.mxu1 %v3436_v23 }
  0xd1   : > { %1412 = vmatprep.subr.mxu0 %v2711_v4  ;;  %1474 = vmatprep.subr.mxu1 %v2711_v4 }
  0xd2   : > { %1415 = vmatpush2.msra.mxu0 %v3570_v3  ;;  %1418 = vmatprep.mubr.f32.mxu0 %v3487_v33 }
  0xd3   : > { %1476 = vmatpush1.msra.mxu1 %v3462_v46  ;;  %1421 = vmatmul.mubr.f32.vlgmr.msra.gmra.mxu0 %v3501_v22 }
  0xd4   : > { %1477 = vmatprep.subr.mxu1 %v2711_v4  ;;  %1540 = vmatprep.subr.mxu0 %v2711_v4 }
  0xd5   : > { %1479 = vmatpush1.msra.mxu1 %v3479_v49  ;;  %1544 = vmatpush1.msra.mxu0 %v1150_v30  ;;  %v4403_v30 = vand.u32 4294901760, %v3344_v51  ;;  %v2675_v51 = vld [vmem:[%s4339_s1 + $0x190] sm:$0xff] }
  0xd6   : > { %1480 = vmatprep.subr.mxu1 %v2711_v4  ;;  %1545 = vmatprep.subr.mxu0 %v2711_v4 }
  0xd7   : > { %1427 = vmatprep.mubr.f32.mxu0 %v3536_v52  ;;  %1482 = vmatpush1.msra.mxu1 %v3494_v17 }
  0xd8   : > { %1549 = vmatpush1.msra.mxu0 %v1157_v61  ;;  %1511 = vmatprep.subr.mxu1 %v2711_v4  ;;  %v4406_v61 = vand.u32 4294901760, %v3387_v59 }
  0xd9   : > { %1430 = vmatmul.mubr.f32.gmra.mxu0 %v3549_v27  ;;  %1550 = vmatprep.subr.mxu0 %v2711_v4  ;;  %v2669_v27 = vld [vmem:[%s4339_s1 + $0x160] sm:$0xff] }
  0xda   : > { %1513 = vmatpush2.msra.mxu1 %v3525_v15  ;;  %1554 = vmatpush1.msra.mxu0 %v1164_v10 }
  0xdb   : > { %1514 = vmatprep.subr.mxu1 %v2711_v4  ;;  %1555 = vmatprep.subr.mxu0 %v2711_v4 }
  0xdc   : > { %1516 = vmatpush2.msra.mxu1 %v3542_v54  ;;  %1520 = vmatprep.mubr.f32.mxu1 %v1118_v47 }
  0xdd   : > { %1559 = vmatpush1.msra.mxu0 %v4401_v35  ;;  %1524 = vmatmul.mubr.f32.vlgmr.msra.gmra.mxu1 %v4402_v44 }
  0xde   : > { %1560 = vmatprep.subr.mxu0 %v2711_v4  ;;  %1673 = vmatprep.subr.mxu1 %v2711_v4 }
  0xdf   : > { %1564 = vmatpush1.msra.mxu0 %v4403_v30  ;;  %1675 = vmatpush1.msra.mxu1 %v3264_v25  ;;  %v4405_v25 = vand.u32 4294901760, %v3366_v2  ;;  %v3771_v2 = vand.u32 4294901760, %v2675_v51 }
  0xe0   : > { %1565 = vmatprep.subr.mxu0 %v2711_v4  ;;  %1676 = vmatprep.subr.mxu1 %v2711_v4 }
  0xe1   : > { %1531 = vmatprep.mubr.f32.mxu1 %v1133_v34  ;;  %1569 = vmatpush1.msra.mxu0 %v4404_v53 }
  0xe2   : > { %1678 = vmatpush1.msra.mxu1 %v3271_v29  ;;  %1570 = vmatprep.subr.mxu0 %v2711_v4  ;;  %v4407_v29 = vand.u32 4294901760, %v3403_v16  ;;  %v2673_v16 = vld [vmem:[%s4339_s1 + $0x180] sm:$0xff] }
  0xe3   : > { %1535 = vmatmul.mubr.f32.gmra.mxu1 %v1139_v32  ;;  %1679 = vmatprep.subr.mxu1 %v2711_v4  ;;  %v4414_v32 = vand.u32 4294901760, %v3531_v50  ;;  %v2670_v50 = vld [vmem:[%s4339_s1 + $0x168] sm:$0xff] }
  0xe4   : > { %1574 = vmatpush1.msra.mxu0 %v4405_v25  ;;  %1681 = vmatpush1.msra.mxu1 %v3290_v42  ;;  %v4408_v42 = vand.u32 4294901760, %v3419_v6  ;;  %v3798_v6 = vsub.f32 %v2675_v51, %v3771_v2  ;;  %v3841_v37 = vand.u32 4294901760, %v2670_v50 }
  0xe5   : > { %1575 = vmatprep.subr.mxu0 %v2711_v4  ;;  %1682 = vmatprep.subr.mxu1 %v2711_v4 }
  0xe6   : > { %1579 = vmatpush1.msra.mxu0 %v4406_v61  ;;  %1684 = vmatpush1.msra.mxu1 %v3303_v28  ;;  %v4409_v28 = vand.u32 4294901760, %v3434_v18  ;;  %v3803_v18 = vand.u32 4294901760, %v2673_v16  ;;  %v3868_v11 = vsub.f32 %v2670_v50, %v3841_v37  ;;  %v2665_v61 = vld [vmem:[%s4339_s1 + $0x140] sm:$0xff] }
  0xe7   : > { %1580 = vmatprep.subr.mxu0 %v2711_v4  ;;  %1685 = vmatprep.subr.mxu1 %v2711_v4 }
  0xe8   : > { %1584 = vmatpush1.msra.mxu0 %v4407_v29  ;;  %1687 = vmatpush1.msra.mxu1 %v3316_v55  ;;  %v4410_v55 = vand.u32 4294901760, %v3445_v58  ;;  %v3831_v24 = vsub.f32 %v2673_v16, %v3803_v18  ;;  %v4375_v25 = vand.u32 4294901760, %v3868_v11 }
  0xe9   : > { %1585 = vmatprep.subr.mxu0 %v2711_v4  ;;  %1688 = vmatprep.subr.mxu1 %v2711_v4 }
  0xea   : > { %1589 = vmatpush1.msra.mxu0 %v4408_v42  ;;  %1690 = vmatpush1.msra.mxu1 %v3329_v9  ;;  %v2676_v9 = vld [vmem:[%s4339_s1 + $0x198] sm:$0xff]  ;;  %v4380_v1 = vand.u32 4294901760, %v3831_v24  ;;  %v3913_v42 = vsub.f32 %v2668_v5, %v3879_v41 }
  0xeb   : > { %1590 = vmatprep.subr.mxu0 %v2711_v4  ;;  %1691 = vmatprep.subr.mxu1 %v2711_v4  ;;  %v3764_v10 = vand.u32 4294901760, %v2676_v9 }
  0xec   : > { %1594 = vmatpush1.msra.mxu0 %v4409_v28  ;;  %1693 = vmatpush1.msra.mxu1 %v3336_v39  ;;  %v4412_v39 = vand.u32 4294901760, %v3492_v62  ;;  %v4386_v62 = vand.u32 4294901760, %v3798_v6  ;;  %v3915_v28 = vand.u32 4294901760, %v2666_v57 }
  0xed   : > { %1595 = vmatprep.subr.mxu0 %v2711_v4  ;;  %1694 = vmatprep.subr.mxu1 %v2711_v4 }
  0xee   : > { %1599 = vmatpush1.msra.mxu0 %v4410_v55  ;;  %1696 = vmatpush1.msra.mxu1 %v3360_v8  ;;  %v1930_v34 = vsub.f32 %v3798_v6, %v4386_v62  ;;  %v3950_v50 = vsub.f32 %v2666_v57, %v3915_v28 }
  0xef   : > { %1600 = vmatprep.subr.mxu0 %v2711_v4  ;;  %1697 = vmatprep.subr.mxu1 %v2711_v4 }
  0xf0   : > { %1604 = vmatpush1.msra.mxu0 %v4411_v0  ;;  %1699 = vmatpush1.msra.mxu1 %v3376_v43  ;;  %v2674_v43 = vld [vmem:[%s4339_s1 + $0x188] sm:$0xff]  ;;  %v1931_v36 = vand.u32 4294901760, %v1930_v34  ;;  %v2664_v0 = vld [vmem:[%s4339_s1 + $0x138] sm:$0xff] }
  0xf1   : > { %1605 = vmatprep.subr.mxu0 %v2711_v4  ;;  %1700 = vmatprep.subr.mxu1 %v2711_v4 }
  0xf2   : > { %1609 = vmatpush1.msra.mxu0 %v4412_v39  ;;  %1702 = vmatpush1.msra.mxu1 %v3392_v45  ;;  %v3782_v45 = vsub.f32 %v2676_v9, %v3764_v10  ;;  %v2699_v39 = vld [vmem:[%s2884_s25] sm:$0xff] }
  0xf3   : > { %1610 = vmatprep.subr.mxu0 %v2711_v4  ;;  %1703 = vmatprep.subr.mxu1 %v2711_v4  ;;  %v1790_v51 = vrot.slane %v2699_v39, 2 }
  0xf4   : > { %1614 = vmatpush1.msra.mxu0 %v4413_v20  ;;  %1705 = vmatpush1.msra.mxu1 %v3408_v19  ;;  %v388_v8 = vpop.f32.mrf.mxu0  ;;  %v3790_v19 = vand.u32 4294901760, %v2674_v43  ;;  %v1922_v56 = vand.u32 4294901760, %v3782_v45  ;;  %v3930_v20 = vld [vmem:[%s2884_s25 + $0x10] sm:$0xff] }
  0xf5   : > { %1615 = vmatprep.subr.mxu0 %v2711_v4  ;;  %1706 = vmatprep.subr.mxu1 %v2711_v4 }
  0xf6   : > { %1619 = vmatpush1.msra.mxu0 %v4414_v32  ;;  %1708 = vmatpush1.msra.mxu1 %v3412_v21  ;;  %v390_v59 = vpop.f32.mrf.mxu0  ;;  %v2672_v21 = vld [vmem:[%s4339_s1 + $0x178] sm:$0xff]  ;;  %v3816_v3 = vsub.f32 %v2674_v43, %v3790_v19  ;;  %v1923_v52 = vsub.f32 %v3782_v45, %v1922_v56  ;;  %v3937_v32 = vand.u32 4294901760, %v2665_v61 }
  0xf7   : > { %1648 = vmatprep.subr.mxu0 %v2711_v4  ;;  %1709 = vmatprep.subr.mxu1 %v2711_v4  ;;  %v3810_v58 = vand.u32 4294901760, %v2672_v21 }
  0xf8   : > { %1652 = vmatpush2.msra.mxu0 %v1290_v63  ;;  %1711 = vmatpush1.msra.mxu1 %v3436_v23  ;;  %v2671_v23 = vld [vmem:[%s4339_s1 + $0x170] sm:$0xff]  ;;  %v4382_v12 = vand.u32 4294901760, %v3816_v3  ;;  %v3862_v63 = vand.u32 4294901760, %v2669_v27  ;;  %v3963_v34 = vsub.f32 %v2665_v61, %v3937_v32 }
  0xf9   : > { %1653 = vmatprep.subr.mxu0 %v2711_v4  ;;  %1712 = vmatprep.subr.mxu1 %v2711_v4 }
  0xfa   : > { %1657 = vmatpush2.msra.mxu0 %v1297_v13  ;;  %1659 = vmatprep.mubr.f32.mxu0 %v3455_v48  ;;  %v1924_v13 = vand.u32 4294901760, %v1923_v52  ;;  %v1937_v31 = vsub.f32 %v3816_v3, %v4382_v12  ;;  %v3895_v44 = vsub.f32 %v2669_v27, %v3862_v63  ;;  %v4377_v39 = vand.u32 4294901760, %v3963_v34 }
  0xfb   : > { %1714 = vmatpush1.msra.mxu1 %v3462_v46  ;;  %1661 = vmatmul.mubr.f32.vlgmr.msra.gmra.mxu0 %v3458_v60  ;;  %v3823_v46 = vand.u32 4294901760, %v2671_v23 }
  0xfc   : > { %1715 = vmatprep.subr.mxu1 %v2711_v4  ;;  %1806 = vmatprep.subr.mxu0 %v2711_v4  ;;  %v565_v33 = vpop.f32.mrf.mxu1  ;;  %v1938_v29 = vand.u32 4294901760, %v1937_v31  ;;  %v4374_v59 = vand.u32 4294901760, %v3895_v44  ;;  %v2662_v31 = vld [vmem:[%s4339_s1 + $0x128] sm:$0xff] }
  0xfd   : > { %1717 = vmatpush1.msra.mxu1 %v3479_v49  ;;  %1808 = vmatpush1.msra.mxu0 %v3764_v10  ;;  %v3826_v22 = vadd.f32 %v565_v33, %v388_v8  ;;  %v3836_v49 = vsub.f32 %v2672_v21, %v3810_v58  ;;  %v1965_v21 = vsub.f32 %v3868_v11, %v4375_v25  ;;  %v3952_v33 = vand.u32 4294901760, %v2664_v0 }
  0xfe   : > { %1718 = vmatprep.subr.mxu1 %v2711_v4  ;;  %1809 = vmatprep.subr.mxu0 %v2711_v4  ;;  %v567_v47 = vpop.f32.mrf.mxu1  ;;  %v1972_v5 = vsub.f32 %v3895_v44, %v4374_v59 }
  0xff   : > { %1666 = vmatprep.mubr.f32.mxu0 %v3503_v7  ;;  %1720 = vmatpush1.msra.mxu1 %v3494_v17  ;;  %v3852_v17 = vsub.f32 %v2671_v23, %v3823_v46  ;;  %v4378_v14 = vand.u32 4294901760, %v3836_v49  ;;  %v2663_v23 = vld [vmem:[%s4339_s1 + $0x130] sm:$0xff] }
 0x100   : > { %1811 = vmatpush1.msra.mxu0 %v3771_v2  ;;  %1749 = vmatprep.subr.mxu1 %v2711_v4 }
 0x101   : > { %1668 = vmatmul.mubr.f32.gmra.mxu0 %v3519_v26  ;;  %1812 = vmatprep.subr.mxu0 %v2711_v4  ;;  %v4376_v40 = vand.u32 4294901760, %v3852_v17  ;;  %v1951_v53 = vsub.f32 %v3836_v49, %v4378_v14 }
 0x102   : > { %1751 = vmatpush2.msra.mxu1 %v3525_v15  ;;  %1814 = vmatpush1.msra.mxu0 %v3790_v19  ;;  %v2667_v15 = vld [vmem:[%s4339_s1 + $0x150] sm:$0xff] }
 0x103   : > { %1752 = vmatprep.subr.mxu1 %v2711_v4  ;;  %1815 = vmatprep.subr.mxu0 %v2711_v4  ;;  %v3900_v30 = vand.u32 4294901760, %v2667_v15  ;;  %v1958_v55 = vsub.f32 %v3852_v17, %v4376_v40  ;;  %v1952_v16 = vand.u32 4294901760, %v1951_v53  ;;  %v2661_v53 = vld [vmem:[%s4339_s1 + $0x120] sm:$0xff] }
 0x104   : > { %1754 = vmatpush2.msra.mxu1 %v3542_v54  ;;  %1756 = vmatprep.mubr.f32.mxu1 %v3455_v48  ;;  %v2697_v54 = vld [vmem:[%s2884_s25 + $0x8] sm:$0xff]  ;;  %v3889_v48 = vld [vmem:[%s2884_s25 + $0x18] sm:$0xff] }
 0x105   : > { %1817 = vmatpush1.msra.mxu0 %v3803_v18  ;;  %1758 = vmatmul.mubr.f32.vlgmr.msra.gmra.mxu1 %v3458_v60  ;;  %v1793_v38 = vrot.slane %v2697_v54, 2  ;;  %v1794_v35 = vrot.slane %v3889_v48, 2  ;;  %v1944_v60 = vsub.f32 %v3831_v24, %v4380_v1  ;;  %v3935_v43 = vsub.f32 %v2667_v15, %v3900_v30 }
 0x106   : > { %1818 = vmatprep.subr.mxu0 %v2711_v4  ;;  %1919 = vmatprep.subr.mxu1 %v2711_v4  ;;  %v1959_v52 = vand.u32 4294901760, %v1958_v55  ;;  %v3980_v54 = vsub.f32 %v2664_v0, %v3952_v33  ;;  %v1973_v55 = vand.u32 4294901760, %v1972_v5  ;;  %v2677_v5 = vld [vmem:[%s4339_s1 + $0x1a0] sm:$0xff] }
 0x107   : > { %1820 = vmatpush1.msra.mxu0 %v3810_v58  ;;  %1925 = vmatpush1.msra.mxu1 %v1924_v13  ;;  %v1795_v9 = vsel %vm1789_vm2, %v1793_v38, %v1794_v35  ;;  %v1945_v8 = vand.u32 4294901760, %v1944_v60  ;;  %v3968_v13 = vand.u32 4294901760, %v2663_v23  ;;  %v4371_v15 = vand.u32 4294901760, %v3935_v43 }
 0x108   : > { %1821 = vmatprep.subr.mxu0 %v2711_v4  ;;  %1926 = vmatprep.subr.mxu1 %v2711_v4  ;;  %v1802_v47 = vsel %vm289_vm1, %v1795_v9, 0  ;;  %v4372_v60 = vand.u32 4294901760, %v3950_v50  ;;  %v4041_v59 = vand.u32 4294901760, %v2677_v5 }
 0x109   : > { %1763 = vmatprep.mubr.f32.mxu1 %v3503_v7  ;;  %1823 = vmatpush1.msra.mxu0 %v3823_v46  ;;  %v1791_v7 = vrot.slane %v3930_v20, 2  ;;  %v3976_v57 = vand.u32 4294901760, %v1802_v47  ;;  %v3997_v0 = vsub.f32 %v2663_v23, %v3968_v13  ;;  %v1986_v9 = vsub.f32 %v3935_v43, %v4371_v15 }
 0x10a   : > { %1932 = vmatpush1.msra.mxu1 %v1931_v36  ;;  %1824 = vmatprep.subr.mxu0 %v2711_v4  ;;  %v1966_v36 = vand.u32 4294901760, %v1965_v21  ;;  %v1993_v23 = vsub.f32 %v3950_v50, %v4372_v60 }
 0x10b   : > { %1765 = vmatmul.mubr.f32.gmra.mxu1 %v3519_v26  ;;  %1933 = vmatprep.subr.mxu1 %v2711_v4  ;;  %v4373_v26 = vand.u32 4294901760, %v3913_v42  ;;  %v1792_v27 = vsel %vm1789_vm2, %v1790_v51, %v1791_v7  ;;  %v2678_v51 = vld [vmem:[%s4339_s1 + $0x1a8] sm:$0xff]  ;;  %v1987_v60 = vand.u32 4294901760, %v1986_v9 }
 0x10c   : > { %1826 = vmatpush1.msra.mxu0 %v3841_v37  ;;  %1939 = vmatpush1.msra.mxu1 %v1938_v29  ;;  %v3989_v61 = vand.u32 4294901760, %v1792_v27  ;;  %v3993_v29 = vand.u32 4294901760, %v2662_v31 }
 0x10d   : > { %1827 = vmatprep.subr.mxu0 %v2711_v4  ;;  %1940 = vmatprep.subr.mxu1 %v2711_v4  ;;  %v1979_v38 = vsub.f32 %v3913_v42, %v4373_v26  ;;  %v2000_v26 = vsub.f32 %v3963_v34, %v4377_v39 }
 0x10e   : > { %1829 = vmatpush1.msra.mxu0 %v3862_v63  ;;  %1946 = vmatpush1.msra.mxu1 %v1945_v8  ;;  %v4008_v8 = vand.u32 4294901760, %v2661_v53  ;;  %v4022_v15 = vsub.f32 %v1792_v27, %v3989_v61  ;;  %v4381_v27 = vand.u32 4294901760, %v3997_v0 }
 0x10f   : > { %1830 = vmatprep.subr.mxu0 %v2711_v4  ;;  %1947 = vmatprep.subr.mxu1 %v2711_v4  ;;  %v1980_v21 = vand.u32 4294901760, %v1979_v38 }
 0x110   : > { %1832 = vmatpush1.msra.mxu0 %v3879_v41  ;;  %1953 = vmatpush1.msra.mxu1 %v1952_v16  ;;  %v4011_v16 = vsub.f32 %v1802_v47, %v3976_v57  ;;  %v4027_v47 = vsub.f32 %v2662_v31, %v3993_v29  ;;  %v4039_v31 = vsub.f32 %v2661_v53, %v4008_v8  ;;  %v4384_v39 = vand.u32 4294901760, %v4022_v15 }
 0x111   : > { %1833 = vmatprep.subr.mxu0 %v2711_v4  ;;  %1954 = vmatprep.subr.mxu1 %v2711_v4 }
 0x112   : > { %1835 = vmatpush1.msra.mxu0 %v3900_v30  ;;  %1960 = vmatpush1.msra.mxu1 %v1959_v52  ;;  %v4379_v52 = vand.u32 4294901760, %v3980_v54  ;;  %v4383_v25 = vand.u32 4294901760, %v4011_v16  ;;  %v4385_v14 = vand.u32 4294901760, %v4027_v47  ;;  %v2027_v1 = vand.u32 4294901760, %v4039_v31 }
 0x113   : > { %1836 = vmatprep.subr.mxu0 %v2711_v4  ;;  %1961 = vmatprep.subr.mxu1 %v2711_v4 }
 0x114   : > { %1838 = vmatpush1.msra.mxu0 %v3915_v28  ;;  %1967 = vmatpush1.msra.mxu1 %v1966_v36  ;;  %v4029_v36 = vand.u32 4294901760, %v2678_v51  ;;  %v2007_v9 = vsub.f32 %v3980_v54, %v4379_v52  ;;  %v4062_v52 = vsub.f32 %v2677_v5, %v4041_v59  ;;  %v2021_v5 = vsub.f32 %v4027_v47, %v4385_v14 }
 0x115   : > { %1839 = vmatprep.subr.mxu0 %v2711_v4  ;;  %1968 = vmatprep.subr.mxu1 %v2711_v4  ;;  %v403_v38 = vpop.f32.mrf.mxu0 }
 0x116   : > { %1841 = vmatpush1.msra.mxu0 %v3937_v32  ;;  %1974 = vmatpush1.msra.mxu1 %v1973_v55  ;;  %v1994_v55 = vand.u32 4294901760, %v1993_v23  ;;  %v4052_v53 = vsub.f32 %v2678_v51, %v4029_v36  ;;  %v1891_v51 = vsub.f32 %v4011_v16, %v4383_v25 }
 0x117   : > { %1842 = vmatprep.subr.mxu0 %v2711_v4  ;;  %1975 = vmatprep.subr.mxu1 %v2711_v4  ;;  %v405_v40 = vpop.f32.mrf.mxu0 }
 0x118   : > { %1844 = vmatpush1.msra.mxu0 %v3952_v33  ;;  %1981 = vmatpush1.msra.mxu1 %v1980_v21  ;;  %v2001_v40 = vand.u32 4294901760, %v2000_v26  ;;  %v2014_v21 = vsub.f32 %v3997_v0, %v4381_v27  ;;  %v1897_v27 = vsub.f32 %v4022_v15, %v4384_v39  ;;  %v2062_v25 = vand.u32 4294901760, %v4052_v53 }
 0x119   : > { %1845 = vmatprep.subr.mxu0 %v2711_v4  ;;  %1982 = vmatprep.subr.mxu1 %v2711_v4 }
 0x11a   : > { %1847 = vmatpush1.msra.mxu0 %v3968_v13  ;;  %1988 = vmatpush1.msra.mxu1 %v1987_v60  ;;  %v682_v23 = vpop.f32.mrf.mxu0  ;;  %v2008_v60 = vand.u32 4294901760, %v2007_v9  ;;  %v2028_v9 = vsub.f32 %v4039_v31, %v2027_v1  ;;  %v1898_v14 = vand.u32 4294901760, %v1897_v27 }
 0x11b   : > { %1848 = vmatprep.subr.mxu0 %v2711_v4  ;;  %1989 = vmatprep.subr.mxu1 %v2711_v4  ;;  %v683_v26 = vadd.f32 %v682_v23, %v3826_v22  ;;  %v2015_v22 = vand.u32 4294901760, %v2014_v21  ;;  %v2069_v23 = vand.u32 4294901760, %v4062_v52  ;;  %v2063_v21 = vsub.f32 %v4052_v53, %v2062_v25 }
 0x11c   : > { %1850 = vmatpush1.msra.mxu0 %v3993_v29  ;;  %1995 = vmatpush1.msra.mxu1 %v1994_v55  ;;  %v684_v12 = vpop.f32.mrf.mxu0  ;;  %v2029_v27 = vand.u32 4294901760, %v2028_v9 }
 0x11d   : > { %1851 = vmatprep.subr.mxu0 %v2711_v4  ;;  %1996 = vmatprep.subr.mxu1 %v2711_v4  ;;  %v1892_v12 = vand.u32 4294901760, %v1891_v51 }
 0x11e   : > { %1853 = vmatpush1.msra.mxu0 %v4008_v8  ;;  %2002 = vmatpush1.msra.mxu1 %v2001_v40  ;;  %v572_v55 = vpop.f32.mrf.mxu1  ;;  %v2022_v40 = vand.u32 4294901760, %v2021_v5  ;;  %v2064_v5 = vand.u32 4294901760, %v2063_v21 }
 0x11f   : > { %1882 = vmatprep.subr.mxu0 %v2711_v4  ;;  %2003 = vmatprep.subr.mxu1 %v2711_v4  ;;  %v573_v39 = vadd.f32 %v572_v55, %v403_v38 }
 0x120   : > { %1884 = vmatpush2.msra.mxu0 %v4029_v36  ;;  %2009 = vmatpush1.msra.mxu1 %v2008_v60  ;;  %v574_v62 = vpop.f32.mrf.mxu1 }
 0x121   : > { %1885 = vmatprep.subr.mxu0 %v2711_v4  ;;  %2010 = vmatprep.subr.mxu1 %v2711_v4  ;;  %v691_v51 = vpop.f32.mrf.mxu0  ;;  %v2070_v62 = vsub.f32 %v4062_v52, %v2069_v23 }
 0x122   : > { %1887 = vmatpush2.msra.mxu0 %v4041_v59  ;;  %2016 = vmatpush1.msra.mxu1 %v2015_v22  ;;  %v692_v38 = vadd.f32 %v691_v51, %v573_v39  ;;  %v2701_v22 = vld [vmem:[%s2884_s25 + $0x28] sm:$0x3] }
 0x123   : > { %1893 = vmatprep.mubr.f32.mxu0 %v1892_v12  ;;  %2017 = vmatprep.subr.mxu1 %v2711_v4  ;;  %v693_v60 = vpop.f32.mrf.mxu0  ;;  %v1798_v12 = vrot.slane %v2701_v22, 2  ;;  %v2071_v9 = vand.u32 4294901760, %v2070_v62 }
 0x124   : > { %2088 = vmatprep.subr.mxu0 %v2711_v4  ;;  %1899 = vmatmul.mubr.f32.vlgmr.msra.gmra.mxu0 %v1898_v14 }
 0x125   : > { %2023 = vmatpush1.msra.mxu1 %v2022_v40  ;;  %2091 = vmatpush1.msra.mxu0 %v3782_v45  ;;  %v785_v55 = vpop.f32.mrf.mxu1  ;;  %v1799_v14 = vsel %vm1789_vm2, %v1794_v35, %v1798_v12  ;;  %v4416_v45 = vand.u32 4294901760, %v3816_v3 }
 0x126   : > { %2024 = vmatprep.subr.mxu1 %v2711_v4  ;;  %2092 = vmatprep.subr.mxu0 %v2711_v4  ;;  %v4101_v39 = vadd.f32 %v785_v55, %v683_v26  ;;  %v2702_v26 = vld [vmem:[%s2884_s25 + $0x20] sm:$0x3]  ;;  %v1804_v48 = vsel %vm289_vm1, %v1799_v14, 0 }
 0x127   : > { %2030 = vmatpush1.msra.mxu1 %v2029_v27  ;;  %2095 = vmatpush1.msra.mxu0 %v3798_v6  ;;  %v787_v51 = vpop.f32.mrf.mxu1  ;;  %v1796_v40 = vrot.slane %v2702_v26, 2 }
 0x128   : > { %2059 = vmatprep.subr.mxu1 %v2711_v4  ;;  %2096 = vmatprep.subr.mxu0 %v2711_v4 }
 0x129   : > { %2065 = vmatpush2.msra.mxu1 %v2064_v5  ;;  %2099 = vmatpush1.msra.mxu0 %v3816_v3  ;;  %v1797_v35 = vsel %vm1789_vm2, %v1791_v7, %v1796_v40 }
 0x12a   : > { %2066 = vmatprep.subr.mxu1 %v2711_v4  ;;  %2100 = vmatprep.subr.mxu0 %v2711_v4  ;;  %v4135_v60 = vand.u32 4294901760, %v1797_v35 }
 0x12b   : > { %2072 = vmatpush2.msra.mxu1 %v2071_v9  ;;  %2074 = vmatprep.mubr.f32.mxu1 %v3976_v57  ;;  %v796_v21 = vpop.f32.mrf.mxu1 }
 0x12c   : > { %2103 = vmatpush1.msra.mxu0 %v3831_v24  ;;  %2076 = vmatmul.mubr.f32.vlgmr.msra.gmra.mxu1 %v3989_v61  ;;  %v4117_v27 = vadd.f32 %v796_v21, %v692_v38  ;;  %v4131_v38 = vand.u32 4294901760, %v1804_v48  ;;  %v4149_v7 = vsub.f32 %v1797_v35, %v4135_v60  ;;  %v4415_v35 = vand.u32 4294901760, %v3798_v6 }
 0x12d   : > { %2104 = vmatprep.subr.mxu0 %v2711_v4  ;;  %2207 = vmatprep.subr.mxu1 %v2711_v4  ;;  %v798_v62 = vpop.f32.mrf.mxu1 }
 0x12e   : > { %2107 = vmatpush1.msra.mxu0 %v3836_v49  ;;  %2209 = vmatpush1.msra.mxu1 %v3764_v10  ;;  %v4144_v20 = vsub.f32 %v1804_v48, %v4131_v38  ;;  %v1911_v55 = vand.u32 4294901760, %v4149_v7 }
 0x12f   : > { %2108 = vmatprep.subr.mxu0 %v2711_v4  ;;  %2210 = vmatprep.subr.mxu1 %v2711_v4 }
 0x130   : > { %2111 = vmatpush1.msra.mxu0 %v3852_v17  ;;  %2212 = vmatpush1.msra.mxu1 %v3771_v2  ;;  %v1905_v5 = vand.u32 4294901760, %v4144_v20  ;;  %v1912_v12 = vsub.f32 %v4149_v7, %v1911_v55 }
 0x131   : > { %2112 = vmatprep.subr.mxu0 %v2711_v4  ;;  %2213 = vmatprep.subr.mxu1 %v2711_v4 }
 0x132   : > { %2115 = vmatpush1.msra.mxu0 %v3868_v11  ;;  %2215 = vmatpush1.msra.mxu1 %v3790_v19  ;;  %v1906_v22 = vsub.f32 %v4144_v20, %v1905_v5  ;;  %v1913_v51 = vand.u32 4294901760, %v1912_v12 }
 0x133   : > { %2116 = vmatprep.subr.mxu0 %v2711_v4  ;;  %2216 = vmatprep.subr.mxu1 %v2711_v4 }
 0x134   : > { %2119 = vmatpush1.msra.mxu0 %v3895_v44  ;;  %2218 = vmatpush1.msra.mxu1 %v3803_v18  ;;  %v1907_v9 = vand.u32 4294901760, %v1906_v22 }
 0x135   : > { %2120 = vmatprep.subr.mxu0 %v2711_v4  ;;  %2219 = vmatprep.subr.mxu1 %v2711_v4 }
 0x136   : > { %2123 = vmatpush1.msra.mxu0 %v3913_v42  ;;  %2221 = vmatpush1.msra.mxu1 %v3810_v58 }
 0x137   : > { %2124 = vmatprep.subr.mxu0 %v2711_v4  ;;  %2222 = vmatprep.subr.mxu1 %v2711_v4 }
 0x138   : > { %2127 = vmatpush1.msra.mxu0 %v3935_v43  ;;  %2224 = vmatpush1.msra.mxu1 %v3823_v46 }
 0x139   : > { %2128 = vmatprep.subr.mxu0 %v2711_v4  ;;  %2225 = vmatprep.subr.mxu1 %v2711_v4 }
 0x13a   : > { %2131 = vmatpush1.msra.mxu0 %v3950_v50  ;;  %2227 = vmatpush1.msra.mxu1 %v3841_v37 }
 0x13b   : > { %2132 = vmatprep.subr.mxu0 %v2711_v4  ;;  %2228 = vmatprep.subr.mxu1 %v2711_v4 }
 0x13c   : > { %2135 = vmatpush1.msra.mxu0 %v3963_v34  ;;  %2230 = vmatpush1.msra.mxu1 %v3862_v63 }
 0x13d   : > { %2136 = vmatprep.subr.mxu0 %v2711_v4  ;;  %2231 = vmatprep.subr.mxu1 %v2711_v4 }
 0x13e   : > { %2139 = vmatpush1.msra.mxu0 %v3980_v54  ;;  %2233 = vmatpush1.msra.mxu1 %v3879_v41 }
 0x13f   : > { %2140 = vmatprep.subr.mxu0 %v2711_v4  ;;  %2234 = vmatprep.subr.mxu1 %v2711_v4 }
 0x140   : > { %2143 = vmatpush1.msra.mxu0 %v3997_v0  ;;  %2236 = vmatpush1.msra.mxu1 %v3900_v30 }
 0x141   : > { %2144 = vmatprep.subr.mxu0 %v2711_v4  ;;  %2237 = vmatprep.subr.mxu1 %v2711_v4 }
 0x142   : > { %2147 = vmatpush1.msra.mxu0 %v4027_v47  ;;  %2239 = vmatpush1.msra.mxu1 %v3915_v28 }
 0x143   : > { %2148 = vmatprep.subr.mxu0 %v2711_v4  ;;  %2240 = vmatprep.subr.mxu1 %v2711_v4  ;;  %v922_v14 = vpop.f32.mrf.mxu0 }
 0x144   : > { %1908 = vmatprep.mubr.f32.mxu0 %v1907_v9  ;;  %2151 = vmatpush1.msra.mxu0 %v4039_v31  ;;  %v923_v26 = vadd.f32 %v922_v14, %v4101_v39  ;;  %v4418_v9 = vand.u32 4294901760, %v3831_v24  ;;  %v4420_v14 = vand.u32 4294901760, %v3836_v49  ;;  %v4421_v24 = vand.u32 4294901760, %v3852_v17 }
 0x145   : > { %2242 = vmatpush1.msra.mxu1 %v3937_v32  ;;  %1914 = vmatmul.mubr.f32.gmra.mxu0 %v1913_v51  ;;  %v924_v40 = vpop.f32.mrf.mxu0  ;;  %v4419_v51 = vand.u32 4294901760, %v4022_v15  ;;  %v4423_v49 = vand.u32 4294901760, %v3895_v44 }
 0x146   : > { %2180 = vmatprep.subr.mxu0 %v2711_v4  ;;  %2243 = vmatprep.subr.mxu1 %v2711_v4 }
 0x147   : > { %2183 = vmatpush2.msra.mxu0 %v4052_v53  ;;  %2245 = vmatpush1.msra.mxu1 %v3952_v33 }
 0x148   : > { %2184 = vmatprep.subr.mxu0 %v2711_v4  ;;  %2246 = vmatprep.subr.mxu1 %v2711_v4 }
 0x149   : > { %2187 = vmatpush2.msra.mxu0 %v4062_v52  ;;  %2190 = vmatprep.mubr.f32.mxu0 %v4011_v16  ;;  %v929_v39 = vpop.f32.mrf.mxu0 }
 0x14a   : > { %2248 = vmatpush1.msra.mxu1 %v3968_v13  ;;  %2193 = vmatmul.mubr.f32.vlgmr.msra.gmra.mxu0 %v4022_v15  ;;  %v930_v21 = vadd.f32 %v929_v39, %v4117_v27 }
 0x14b   : > { %2249 = vmatprep.subr.mxu1 %v2711_v4  ;;  %2312 = vmatprep.subr.mxu0 %v2711_v4  ;;  %v931_v48 = vpop.f32.mrf.mxu0 }
 0x14c   : > { %2251 = vmatpush1.msra.mxu1 %v3993_v29  ;;  %2316 = vmatpush1.msra.mxu0 %v1922_v56  ;;  %v4417_v56 = vand.u32 4294901760, %v4011_v16 }
 0x14d   : > { %2081 = vmatprep.mubr.f32.mxu1 %v4131_v38  ;;  %2252 = vmatprep.subr.mxu1 %v2711_v4  ;;  %v1019_v62 = vpop.f32.mrf.mxu1 }
 0x14e   : > { %2317 = vmatprep.subr.mxu0 %v2711_v4  ;;  %2083 = vmatmul.mubr.f32.gmra.mxu1 %v4135_v60  ;;  %v4210_v27 = vadd.f32 %v1019_v62, %v923_v26 }
 0x14f   : > { %2254 = vmatpush1.msra.mxu1 %v4008_v8  ;;  %2321 = vmatpush1.msra.mxu0 %v4415_v35  ;;  %v1021_v22 = vpop.f32.mrf.mxu1 }
 0x150   : > { %2199 = vmatprep.mubr.f32.mxu0 %v4144_v20  ;;  %2283 = vmatprep.subr.mxu1 %v2711_v4 }
 0x151   : > { %2322 = vmatprep.subr.mxu0 %v2711_v4  ;;  %2202 = vmatmul.mubr.f32.gmra.mxu0 %v4149_v7 }
 0x152   : > { %2285 = vmatpush2.msra.mxu1 %v4029_v36  ;;  %2326 = vmatpush1.msra.mxu0 %v4416_v45 }
 0x153   : > { %2286 = vmatprep.subr.mxu1 %v2711_v4  ;;  %2327 = vmatprep.subr.mxu0 %v2711_v4  ;;  %v1026_v6 = vpop.f32.mrf.mxu1 }
 0x154   : > { %2288 = vmatpush2.msra.mxu1 %v4041_v59  ;;  %2292 = vmatprep.mubr.f32.mxu1 %v4417_v56  ;;  %v4227_v12 = vadd.f32 %v1026_v6, %v930_v21 }
 0x155   : > { %2331 = vmatpush1.msra.mxu0 %v4418_v9  ;;  %2296 = vmatmul.mubr.f32.vlgmr.msra.gmra.mxu1 %v4419_v51  ;;  %v1028_v3 = vpop.f32.mrf.mxu1 }
 0x156   : > { %2332 = vmatprep.subr.mxu0 %v2711_v4  ;;  %2445 = vmatprep.subr.mxu1 %v2711_v4 }
 0x157   : > { %2336 = vmatpush1.msra.mxu0 %v4420_v14  ;;  %2447 = vmatpush1.msra.mxu1 %v3764_v10  ;;  %v4422_v10 = vand.u32 4294901760, %v3868_v11 }
 0x158   : > { %2337 = vmatprep.subr.mxu0 %v2711_v4  ;;  %2448 = vmatprep.subr.mxu1 %v2711_v4 }
 0x159   : > { %2303 = vmatprep.mubr.f32.mxu1 %v1905_v5  ;;  %2341 = vmatpush1.msra.mxu0 %v4421_v24 }
 0x15a   : > { %2450 = vmatpush1.msra.mxu1 %v3771_v2  ;;  %2342 = vmatprep.subr.mxu0 %v2711_v4  ;;  %v4424_v2 = vand.u32 4294901760, %v3913_v42  ;;  %v2681_v42 = vld [vmem:[#allocation2] ss:$0 sm:$0xff] }
 0x15b   : > { %2307 = vmatmul.mubr.f32.gmra.mxu1 %v1911_v55  ;;  %2451 = vmatprep.subr.mxu1 %v2711_v4 }
 0x15c   : > { %2346 = vmatpush1.msra.mxu0 %v4422_v10  ;;  %2453 = vmatpush1.msra.mxu1 %v3790_v19  ;;  %v4425_v19 = vand.u32 4294901760, %v3935_v43  ;;  %v2712_v43 = vmov 0  }
 0x15d   : > { %2347 = vmatprep.subr.mxu0 %v2711_v4  ;;  %2454 = vmatprep.subr.mxu1 %v2711_v4 }
 0x15e   : > { %2351 = vmatpush1.msra.mxu0 %v4423_v49  ;;  %2456 = vmatpush1.msra.mxu1 %v3803_v18  ;;  %v4426_v18 = vand.u32 4294901760, %v3950_v50 }
 0x15f   : > { %2352 = vmatprep.subr.mxu0 %v2711_v4  ;;  %2457 = vmatprep.subr.mxu1 %v2711_v4 }
 0x160   : > { %2356 = vmatpush1.msra.mxu0 %v4424_v2  ;;  %2459 = vmatpush1.msra.mxu1 %v3810_v58  ;;  %v4427_v58 = vand.u32 4294901760, %v3963_v34 }
 0x161   : > { %2357 = vmatprep.subr.mxu0 %v2711_v4  ;;  %2460 = vmatprep.subr.mxu1 %v2711_v4 }
 0x162   : > { %2361 = vmatpush1.msra.mxu0 %v4425_v19  ;;  %2462 = vmatpush1.msra.mxu1 %v3823_v46  ;;  %v4428_v46 = vand.u32 4294901760, %v3980_v54 }
 0x163   : > { %2362 = vmatprep.subr.mxu0 %v2711_v4  ;;  %2463 = vmatprep.subr.mxu1 %v2711_v4 }
 0x164   : > { %2366 = vmatpush1.msra.mxu0 %v4426_v18  ;;  %2465 = vmatpush1.msra.mxu1 %v3841_v37  ;;  %v4429_v37 = vand.u32 4294901760, %v3997_v0 }
 0x165   : > { %2367 = vmatprep.subr.mxu0 %v2711_v4  ;;  %2466 = vmatprep.subr.mxu1 %v2711_v4 }
 0x166   : > { %2371 = vmatpush1.msra.mxu0 %v4427_v58  ;;  %2468 = vmatpush1.msra.mxu1 %v3862_v63  ;;  %v4430_v63 = vand.u32 4294901760, %v4027_v47 }
 0x167   : > { %2372 = vmatprep.subr.mxu0 %v2711_v4  ;;  %2469 = vmatprep.subr.mxu1 %v2711_v4 }
 0x168   : > { %2376 = vmatpush1.msra.mxu0 %v4428_v46  ;;  %2471 = vmatpush1.msra.mxu1 %v3879_v41 }
 0x169   : > { %2377 = vmatprep.subr.mxu0 %v2711_v4  ;;  %2472 = vmatprep.subr.mxu1 %v2711_v4 }
 0x16a   : > { %2381 = vmatpush1.msra.mxu0 %v4429_v37  ;;  %2474 = vmatpush1.msra.mxu1 %v3900_v30 }
 0x16b   : > { %2382 = vmatprep.subr.mxu0 %v2711_v4  ;;  %2475 = vmatprep.subr.mxu1 %v2711_v4  ;;  %v1128_v17 = vpop.f32.mrf.mxu0 }
 0x16c   : > { %2386 = vmatpush1.msra.mxu0 %v4430_v63  ;;  %2477 = vmatpush1.msra.mxu1 %v3915_v28  ;;  %v1129_v11 = vadd.f32 %v1128_v17, %v4210_v27 }
 0x16d   : > { %2387 = vmatprep.subr.mxu0 %v2711_v4  ;;  %2478 = vmatprep.subr.mxu1 %v2711_v4  ;;  %v1130_v41 = vpop.f32.mrf.mxu0 }
 0x16e   : > { %2391 = vmatpush1.msra.mxu0 %v2027_v1  ;;  %2480 = vmatpush1.msra.mxu1 %v3937_v32 }
 0x16f   : > { %2420 = vmatprep.subr.mxu0 %v2711_v4  ;;  %2481 = vmatprep.subr.mxu1 %v2711_v4 }
 0x170   : > { %2424 = vmatpush2.msra.mxu0 %v2062_v25  ;;  %2483 = vmatpush1.msra.mxu1 %v3952_v33 }
 0x171   : > { %2425 = vmatprep.subr.mxu0 %v2711_v4  ;;  %2484 = vmatprep.subr.mxu1 %v2711_v4  ;;  %v1143_v44 = vpop.f32.mrf.mxu0 }
 0x172   : > { %2429 = vmatpush2.msra.mxu0 %v2069_v23  ;;  %2431 = vmatprep.mubr.f32.mxu0 %v3976_v57  ;;  %v1144_v1 = vadd.f32 %v1143_v44, %v4227_v12  ;;  %v2679_v44 = vld [vmem:[%s4340_s2] ss:$0 sm:$0xff] }
 0x173   : > { %2486 = vmatpush1.msra.mxu1 %v3968_v13  ;;  %2433 = vmatmul.mubr.f32.vlgmr.msra.gmra.mxu0 %v3989_v61  ;;  %v1145_v30 = vpop.f32.mrf.mxu0 }
 0x174   : > { %2487 = vmatprep.subr.mxu1 %v2711_v4  ;;  %2438 = vmatprep.mubr.f32.mxu0 %v4131_v38 }
 0x175   : > { %2489 = vmatpush1.msra.mxu1 %v3993_v29  ;;  %2528 = vmatprep.mubr.f32.mxu1 %v3976_v57  ;;  %v1305_v25 = vpop.f32.mrf.mxu1 }
 0x176   : > { %2490 = vmatprep.subr.mxu1 %v2711_v4  ;;  %v1306_v28 = vadd.f32 %v1305_v25, %v1129_v11  ;;  %2696 = vset.pattern.permute.xlu0 %v2712_v43 }
 0x177   : > { %2492 = vmatpush1.msra.mxu1 %v4008_v8  ;;  %2440 = vmatmul.mubr.f32.gmra.mxu0 %v4135_v60  ;;  %v1307_v32 = vpop.f32.mrf.mxu1 }
 0x178   : > { %2521 = vmatprep.subr.mxu1 %v2711_v4  ;;  %2571 = vperm.xlu0 %2696, %v2681_v42  }
 0x179   : > { %2523 = vmatpush2.msra.mxu1 %v4029_v36 }
 0x17a   : > { %2524 = vmatprep.subr.mxu1 %v2711_v4 }
 0x17b   : > { %2526 = vmatpush2.msra.mxu1 %v4041_v59  ;;  %v1312_v50 = vpop.f32.mrf.mxu1 }
 0x17c   : > { %2530 = vmatmul.mubr.f32.vlgmr.msra.gmra.mxu1 %v3989_v61  ;;  %v1313_v33 = vadd.f32 %v1312_v50, %v1144_v1 }
 0x17d   : > { %2535 = vmatprep.mubr.f32.mxu1 %v4131_v38  ;;  %v1314_v34 = vpop.f32.mrf.mxu1 }
 0x180   : > { %2537 = vmatmul.mubr.f32.gmra.mxu1 %v4135_v60 }
 0x193   : > { %v1422_v13 = vpop.f32.mrf.mxu0 }
 0x194   : > { %v1423_v15 = vadd.f32 %v1422_v13, %v1306_v28  ;;  %v2680_v28 = vld [vmem:[%s4341_s3] ss:$0 sm:$0xff] }
 0x195   : > { %v1424_v57 = vpop.f32.mrf.mxu0 }
 0x199   : > { %v1431_v54 = vpop.f32.mrf.mxu0 }
 0x19a   : > { %v1432_v29 = vadd.f32 %v1431_v54, %v1313_v33 }
 0x19b   : > { %v1433_v0 = vpop.f32.mrf.mxu0 }
 0x19d   : > { %v1525_v8 = vpop.f32.mrf.mxu1 }
 0x19e   : > { %v1526_v16 = vadd.f32 %v1525_v8, %v1423_v15 }
 0x19f   : > { %v1527_v4 = vpop.f32.mrf.mxu1 }
 0x1a3   : > { %v1536_v52 = vpop.f32.mrf.mxu1 }
 0x1a4   : > { %v1537_v59 = vadd.f32 %v1536_v52, %v1432_v29 }
 0x1a5   : > { %v1538_v47 = vpop.f32.mrf.mxu1 }
 0x1bb   : > { %v1662_v36 = vpop.f32.mrf.mxu0 }
 0x1bc   : > { %v1663_v61 = vadd.f32 %v1662_v36, %v1526_v16 }
 0x1bd   : > { %v1664_v31 = vpop.f32.mrf.mxu0 }
 0x1c1   : > { %v1669_v53 = vpop.f32.mrf.mxu0 }
 0x1c2   : > { %v1670_v23 = vadd.f32 %v1669_v53, %v1537_v59 }
 0x1c3   : > { %v1671_v38 = vpop.f32.mrf.mxu0 }
 0x1c5   : > { %v1759_v20 = vpop.f32.mrf.mxu1 }
 0x1c6   : > { %v1760_v60 = vadd.f32 %v1759_v20, %v1663_v61 }
 0x1c7   : > { %v1761_v7 = vpop.f32.mrf.mxu1 }
 0x1cb   : > { %v1766_v5 = vpop.f32.mrf.mxu1 }
 0x1cc   : > { %v1767_v55 = vadd.f32 %v1766_v5, %v1670_v23 }
 0x1cd   : > { %v1768_v26 = vpop.f32.mrf.mxu1 }
 0x1e4   : > { %v1900_v40 = vpop.f32.mrf.mxu0 }
 0x1e6   : > { %v1902_v39 = vpop.f32.mrf.mxu0 }
 0x1ec   : > { %v2077_v21 = vpop.f32.mrf.mxu1 }
 0x1ed   : > { %v2078_v48 = vadd.f32 %v2077_v21, %v1900_v40 }
 0x1ee   : > { %v2079_v62 = vpop.f32.mrf.mxu1 }
 0x1f3   : > { %v2572_v33 = vpop.permute.xlu0 %2571 }
 0x205   : > { %v1915_v27 = vpop.f32.mrf.mxu0 }
 0x207   : > { %v1917_v35 = vpop.f32.mrf.mxu0 }
 0x20a   : > { %v2194_v22 = vpop.f32.mrf.mxu0 }
 0x20b   : > { %v2195_v2 = vadd.f32 %v2194_v22, %v2078_v48 }
 0x20c   : > { %v2196_v45 = vpop.f32.mrf.mxu0 }
 0x20e   : > { %v2084_v6 = vpop.f32.mrf.mxu1 }
 0x20f   : > { %v2085_v19 = vadd.f32 %v2084_v6, %v1915_v27 }
 0x210   : > { %v2086_v56 = vpop.f32.mrf.mxu1 }
 0x211   : > { %v2203_v12 = vpop.f32.mrf.mxu0 }
 0x212   : > { %v2204_v37 = vadd.f32 %v2203_v12, %v2085_v19 }
 0x213   : > { %v2205_v9 = vpop.f32.mrf.mxu0 }
 0x215   : > { %v2297_v51 = vpop.f32.mrf.mxu1 }
 0x216   : > { %v2298_v58 = vadd.f32 %v2297_v51, %v2195_v2 }
 0x217   : > { %v2299_v3 = vpop.f32.mrf.mxu1 }
 0x21b   : > { %v2308_v14 = vpop.f32.mrf.mxu1 }
 0x21c   : > { %v2309_v11 = vadd.f32 %v2308_v14, %v2204_v37 }
 0x21d   : > { %v2310_v24 = vpop.f32.mrf.mxu1 }
 0x233   : > { %v2434_v10 = vpop.f32.mrf.mxu0 }
 0x234   : > { %v2435_v17 = vadd.f32 %v2434_v10, %v2298_v58 }
 0x235   : > { %v2436_v49 = vpop.f32.mrf.mxu0 }
 0x237   : > { %v2441_v18 = vpop.f32.mrf.mxu0 }
 0x238   : > { %v2442_v30 = vadd.f32 %v2441_v18, %v2309_v11 }
 0x239   : > { %v2443_v46 = vpop.f32.mrf.mxu0 }
 0x23c   : > { %v2531_v63 = vpop.f32.mrf.mxu1 }
 0x23d   : > { %v2532_v41 = vadd.f32 %v2531_v63, %v2435_v17 }
 0x23e   : > { %v2533_v1 = vpop.f32.mrf.mxu1 }
 0x23f   : > { %v2542_v25 = vadd.f32 %v2532_v41, %v1760_v60 }
 0x240   : > { %v2538_v42 = vpop.f32.mrf.mxu1 }
 0x241   : > { %v2551_v43 = vmul.f32 %v2679_v44, %v2542_v25  ;;  %v2539_v32 = vadd.f32 %v2538_v42, %v2442_v30 }
 0x242   : > { %v2540_v50 = vpop.f32.mrf.mxu1 }
 0x243   : > { %v2543_v34 = vadd.f32 %v2539_v32, %v1767_v55  ;;  %v2560_v13 = vadd.f32 %v2680_v28, %v2551_v43 }
 0x245   : > { %v2552_v15 = vmul.f32 %v2679_v44, %v2543_v34  ;;  %vm2562_vm3 = vcmp.gt.f32.partialorder %v2560_v13, 0.0  ;;  %v2574_v57 = vmul.f32 %v2572_v33, %v2560_v13 }
 0x247   : > { %v2561_v54 = vadd.f32 %v2680_v28, %v2552_v15  ;;  %v2576_v29 = vsel %vm2562_vm3, %v2560_v13, %v2574_v57 }
 0x248   : > { %2578 = vst [vmem:[%s226_s4] sm:$0xff] %v2576_v29 }
 0x249   : > { %vm2563_vm4 = vcmp.gt.f32.partialorder %v2561_v54, 0.0  ;;  %v2575_v0 = vmul.f32 %v2572_v33, %v2561_v54 }
 0x24b   : > { %v2577_v8 = vsel %vm2563_vm4, %v2561_v54, %v2575_v0 }
 0x24c   : > { %2579 = vst [vmem:[%s226_s4 + $0x8] sm:$0xff] %v2577_v8 }
 0x24d PF: > { %s17_s20 = sadd.s32 1, %s2709_s20  }
 0x24e   : > { %p14_p4 = scmp.ge.s32.totalorder %s17_s20, 4  }
 0x250   :  { %16 = sbr.rel (!%p14_p4) target bundleno = 3 (0x3), region = 72 }

// kernel: meta_res_forward.6
= control target key start
LH: loop header
LB: loop body
LE: loop exit
PB: predicated region body
PF: predicated region fallthrough
CT: control target
= control target key end

     0   :  { %s2817_s23 = smov 0   ;;  %s4412_s0 = inlined_call_operand.vmem [shape: f32[2,18,144], index: 0, kind: input, shape index: {}]   ;;  %s4413_s1 = inlined_call_operand.vmem [shape: f32[3,144,128], index: 1, kind: input, shape index: {}]   ;;  %s4414_s2 = inlined_call_operand.vmem [shape: f32[1,128], index: 2, kind: input, shape index: {}]   ;;  %s4415_s3 = inlined_call_operand.vmem [shape: f32[1,128], index: 3, kind: input, shape index: {}]   ;;  %s4416_s4 = inlined_call_operand.<no memory space> [shape: f32[1,1], index: 4, kind: input, shape index: {}]   ;;  %s4417_s5 = inlined_call_operand.vmem [shape: f32[2,16,128], index: 5, kind: input, shape index: {}]   ;;  %s4418_s6 = inlined_call_operand.vmem [shape: f32[2,16,128], index: 6, kind: output, shape index: {}]  }
   0x1   :  { %v11_v0 = vstv %s4416_s4 }
   0x2   :  { %12 = vst [vmem:[#allocation2] sm:$0x1] %v11_v0 }
   0x3 LB: > { %s2698_s24 = sadd.s32 4294967295, %s2775_s23   ;;  %p2702_p0 = scmp.ge.s32.totalorder %s2775_s23, 1  ;;  %s2775_s23 = sphi %s2817_s23, %s18_s23  }
   0x4   : > { %p224_p1 = scmp.lt.s32.totalorder %s2775_s23, 3 }
   0x6   : > { %p225_p2 = pnand %p2702_p0, %p224_p1 }
   0x7   : > { %p2834_p3 = scmp.lt.s32.totalorder (!%p225_p2), %s2698_s24, 1 }
   0x8   : > { %228 = sbr.rel (%p225_p2) target bundleno = 591 (0x24f), region = 44 }
   0xd   : > { %v2723_v1 = vld [vmem:[%s4413_s1 + $0x108] sm:$0xff]  ;;  %v2722_v2 = vld [vmem:[%s4413_s1 + $0x100] sm:$0xff]  ;;  %v2721_v3 = vld [vmem:[%s4413_s1 + $0xf8] sm:$0xff]  ;;  %v2777_v4 = vmov 0.0   ;;  %s4507_s24 = smov (!%p2834_p3, %s2698_s24), 1  ;;  %vm323_vm0 = vcmask 1046528  }
   0xe   : > { %341 = vmatprep.subr.mxu0 %v2777_v4  ;;  %v2839_v5 = vand.u32 4294901760, %v2723_v1  ;;  %v2841_v6 = vand.u32 4294901760, %v2722_v2  ;;  %v2843_v7 = vand.u32 4294901760, %v2721_v3  ;;  %v2720_v8 = vld [vmem:[%s4413_s1 + $0xf0] sm:$0xff]  ;;  %454 = vmatprep.subr.mxu1 %v2777_v4  ;;  %v2719_v9 = vld [vmem:[%s4413_s1 + $0xe8] sm:$0xff]  ;;  %v2718_v10 = vld [vmem:[%s4413_s1 + $0xe0] sm:$0xff] }
   0xf   : > { %v2855_v11 = vand.u32 4294901760, %v2720_v8  ;;  %v2857_v12 = vand.u32 4294901760, %v2719_v9  ;;  %v2859_v13 = vand.u32 4294901760, %v2718_v10  ;;  %v2717_v14 = vld [vmem:[%s4413_s1 + $0xd8] sm:$0xff]  ;;  %v2716_v15 = vld [vmem:[%s4413_s1 + $0xd0] sm:$0xff]  ;;  %v2715_v20 = vld [vmem:[%s4413_s1 + $0xc8] sm:$0xff] }
  0x10   : > { %343 = vmatpush1.msra.mxu0 %v2839_v5  ;;  %v2869_v16 = vsub.f32 %v2723_v1, %v2839_v5  ;;  %v2872_v17 = vsub.f32 %v2722_v2, %v2841_v6  ;;  %v2874_v18 = vand.u32 4294901760, %v2717_v14  ;;  %v2877_v19 = vsub.f32 %v2721_v3, %v2843_v7  ;;  %v2714_v27 = vld [vmem:[%s4413_s1 + $0xc0] sm:$0xff]  ;;  %s2751_s21 = smul.u32 48, %s4507_s24  ;;  %v2713_v37 = vld [vmem:[%s4413_s1 + $0xb8] sm:$0xff]  ;;  %v2712_v43 = vld [vmem:[%s4413_s1 + $0xb0] sm:$0xff]  ;;  %s2749_s4 = sshll.u32 %s4507_s24, 4 }
  0x11   : > { %344 = vmatprep.subr.mxu0 %v2777_v4  ;;  %v2888_v21 = vsub.f32 %v2720_v8, %v2855_v11  ;;  %v2891_v22 = vsub.f32 %v2719_v9, %v2857_v12  ;;  %v2897_v26 = vand.u32 4294901760, %v2716_v15  ;;  %v2904_v29 = vand.u32 4294901760, %v2715_v20  ;;  %v2711_v50 = vld [vmem:[%s4413_s1 + $0xa8] sm:$0xff]  ;;  %v2710_v54 = vld [vmem:[%s4413_s1 + $0xa0] sm:$0xff]  ;;  %v2709_v8 = vld [vmem:[%s4413_s1 + $0x98] sm:$0xff]  ;;  %s268_s8 = scalar_lea.vmem %s4417_s5, %s2749_s4  ;;  %s273_s10 = scalar_lea.vmem %s4418_s6, %s2749_s4 }
  0x12   : > { %346 = vmatpush1.msra.mxu0 %v2841_v6  ;;  %v457_v23 = vand.u32 4294901760, %v2869_v16  ;;  %v464_v24 = vand.u32 4294901760, %v2872_v17  ;;  %v471_v25 = vand.u32 4294901760, %v2877_v19  ;;  %v2908_v31 = vsub.f32 %v2718_v10, %v2859_v13  ;;  %s2955_s29 = scalar_lea.vmem %s4412_s0, %s2751_s21 }
  0x13   : > { %347 = vmatprep.subr.mxu0 %v2777_v4  ;;  %v4429_v28 = vand.u32 4294901760, %v2888_v21  ;;  %v4426_v30 = vand.u32 4294901760, %v2891_v22  ;;  %v2921_v35 = vsub.f32 %v2717_v14, %v2874_v18  ;;  %v2925_v36 = vand.u32 4294901760, %v2714_v27  ;;  %v2982_v58 = vld [vmem:[%s2955_s29 + $0x8] sm:$0xff]  ;;  %v2991_v62 = vld [vmem:[%s2955_s29 + $0x18] sm:$0xff]  ;;  %v3001_v1 = vld [vmem:[%s2955_s29] sm:$0xff] }
  0x14   : > { %349 = vmatpush1.msra.mxu0 %v2843_v7  ;;  %v458_v32 = vsub.f32 %v2869_v16, %v457_v23  ;;  %v465_v33 = vsub.f32 %v2872_v17, %v464_v24  ;;  %v472_v34 = vsub.f32 %v2877_v19, %v471_v25  ;;  %v4425_v41 = vand.u32 4294901760, %v2908_v31  ;;  %v3013_v14 = vld [vmem:[%s2955_s29 + $0x10] sm:$0xff] }
  0x15   : > { %350 = vmatprep.subr.mxu0 %v2777_v4  ;;  %v479_v40 = vsub.f32 %v2888_v21, %v4429_v28  ;;  %v4423_v42 = vand.u32 4294901760, %v2921_v35  ;;  %v2941_v44 = vsub.f32 %v2716_v15, %v2897_v26  ;;  %v486_v46 = vsub.f32 %v2891_v22, %v4426_v30 }
  0x16   : > { %352 = vmatpush1.msra.mxu0 %v2855_v11  ;;  %v459_v38 = vand.u32 4294901760, %v458_v32  ;;  %v466_v39 = vand.u32 4294901760, %v465_v33  ;;  %v473_v45 = vand.u32 4294901760, %v472_v34  ;;  %v2947_v47 = vand.u32 4294901760, %v2713_v37  ;;  %v2708_v33 = vld [vmem:[%s4413_s1 + $0x90] sm:$0xff] }
  0x17   : > { %353 = vmatprep.subr.mxu0 %v2777_v4  ;;  %v2950_v48 = vsub.f32 %v2715_v20, %v2904_v29  ;;  %v4422_v49 = vand.u32 4294901760, %v2941_v44  ;;  %v480_v51 = vand.u32 4294901760, %v479_v40  ;;  %v493_v52 = vsub.f32 %v2908_v31, %v4425_v41 }
  0x18   : > { %355 = vmatpush1.msra.mxu0 %v2857_v12  ;;  %460 = vmatpush1.msra.mxu1 %v459_v38  ;;  %v2967_v53 = vand.u32 4294901760, %v2712_v43  ;;  %v2973_v55 = vsub.f32 %v2714_v27, %v2925_v36  ;;  %v500_v56 = vsub.f32 %v2921_v35, %v4423_v42  ;;  %v487_v59 = vand.u32 4294901760, %v486_v46 }
  0x19   : > { %356 = vmatprep.subr.mxu0 %v2777_v4  ;;  %461 = vmatprep.subr.mxu1 %v2777_v4  ;;  %v4421_v57 = vand.u32 4294901760, %v2950_v48  ;;  %v2985_v60 = vand.u32 4294901760, %v2711_v50  ;;  %v2988_v61 = vsub.f32 %v2713_v37, %v2947_v47  ;;  %v507_v63 = vsub.f32 %v2941_v44, %v4422_v49 }
  0x1a   : > { %358 = vmatpush1.msra.mxu0 %v2859_v13  ;;  %467 = vmatpush1.msra.mxu1 %v466_v39  ;;  %v2998_v0 = vand.u32 4294901760, %v2710_v54  ;;  %v494_v2 = vand.u32 4294901760, %v493_v52  ;;  %v4419_v3 = vand.u32 4294901760, %v2973_v55  ;;  %v3009_v9 = vsub.f32 %v2712_v43, %v2967_v53 }
  0x1b   : > { %359 = vmatprep.subr.mxu0 %v2777_v4  ;;  %468 = vmatprep.subr.mxu1 %v2777_v4  ;;  %v327_v10 = vrot.slane %v2982_v58, 1  ;;  %v501_v15 = vand.u32 4294901760, %v500_v56  ;;  %v514_v20 = vsub.f32 %v2950_v48, %v4421_v57  ;;  %v328_v27 = vrot.slane %v2991_v62, 1 }
  0x1c   : > { %361 = vmatpush1.msra.mxu0 %v2874_v18  ;;  %474 = vmatpush1.msra.mxu1 %v473_v45  ;;  %v4420_v32 = vand.u32 4294901760, %v2988_v61  ;;  %v3027_v34 = vsub.f32 %v2711_v50, %v2985_v60  ;;  %vm336_vm1 = vcmask 130048   ;;  %v324_v37 = vrot.slane %v3001_v1, 1  ;;  %v2725_v50 = vld [vmem:[%s4413_s1 + $0x118] sm:$0xff] }
  0x1d   : > { %362 = vmatprep.subr.mxu0 %v2777_v4  ;;  %475 = vmatprep.subr.mxu1 %v2777_v4  ;;  %v508_v38 = vand.u32 4294901760, %v507_v63  ;;  %v3032_v39 = vand.u32 4294901760, %v2709_v8  ;;  %v329_v40 = vsel %vm323_vm0, %v327_v10, %v328_v27  ;;  %v325_v43 = vrot.slane %v3013_v14, 1 }
  0x1e   : > { %364 = vmatpush1.msra.mxu0 %v2897_v26  ;;  %481 = vmatpush1.msra.mxu1 %v480_v51  ;;  %v521_v45 = vsub.f32 %v2973_v55, %v4419_v3  ;;  %v4424_v46 = vand.u32 4294901760, %v3009_v9  ;;  %v3047_v51 = vsub.f32 %v2710_v54, %v2998_v0  ;;  %v337_v52 = vsel %vm336_vm1, %v329_v40, 0  ;;  %v2724_v40 = vld [vmem:[%s4413_s1 + $0x110] sm:$0xff] }
  0x1f   : > { %365 = vmatprep.subr.mxu0 %v2777_v4  ;;  %482 = vmatprep.subr.mxu1 %v2777_v4  ;;  %v3052_v56 = vand.u32 4294901760, %v2708_v33  ;;  %v326_v63 = vsel %vm323_vm0, %v324_v37, %v325_v43  ;;  %v528_v54 = vsub.f32 %v2988_v61, %v4420_v32  ;;  %v4427_v10 = vand.u32 4294901760, %v3027_v34 }
  0x20   : > { %367 = vmatpush1.msra.mxu0 %v2904_v29  ;;  %488 = vmatpush1.msra.mxu1 %v487_v59  ;;  %v3054_v59 = vand.u32 4294901760, %v337_v52  ;;  %v3067_v3 = vand.u32 4294901760, %v326_v63  ;;  %v3071_v37 = vand.u32 4294901760, %v2725_v50  ;;  %v522_v32 = vand.u32 4294901760, %v521_v45 }
  0x21   : > { %368 = vmatprep.subr.mxu0 %v2777_v4  ;;  %489 = vmatprep.subr.mxu1 %v2777_v4  ;;  %v535_v57 = vsub.f32 %v3009_v9, %v4424_v46  ;;  %v4428_v49 = vand.u32 4294901760, %v3047_v51  ;;  %v529_v45 = vand.u32 4294901760, %v528_v54  ;;  %vm1836_vm2 = vcmask 1045504  }
  0x22   : > { %370 = vmatpush1.msra.mxu0 %v2925_v36  ;;  %495 = vmatpush1.msra.mxu1 %v494_v2  ;;  %v515_v2 = vand.u32 4294901760, %v514_v20  ;;  %v3077_v20 = vsub.f32 %v2709_v8, %v3032_v39  ;;  %v3085_v42 = vsub.f32 %v326_v63, %v3067_v3  ;;  %v542_v63 = vsub.f32 %v3027_v34, %v4427_v10 }
  0x23   : > { %371 = vmatprep.subr.mxu0 %v2777_v4  ;;  %496 = vmatprep.subr.mxu1 %v2777_v4  ;;  %v3104_v30 = vsub.f32 %v2725_v50, %v3071_v37 }
  0x24   : > { %373 = vmatpush1.msra.mxu0 %v2947_v47  ;;  %502 = vmatpush1.msra.mxu1 %v501_v15  ;;  %v3074_v15 = vsub.f32 %v337_v52, %v3054_v59  ;;  %v3089_v52 = vand.u32 4294901760, %v2724_v40  ;;  %v4430_v46 = vand.u32 4294901760, %v3085_v42  ;;  %v4431_v41 = vand.u32 4294901760, %v3077_v20 }
  0x25   : > { %374 = vmatprep.subr.mxu0 %v2777_v4  ;;  %503 = vmatprep.subr.mxu1 %v2777_v4  ;;  %v597_v28 = vand.u32 4294901760, %v3104_v30 }
  0x26   : > { %376 = vmatpush1.msra.mxu0 %v2967_v53  ;;  %509 = vmatpush1.msra.mxu1 %v508_v38  ;;  %v425_v8 = vand.u32 4294901760, %v3074_v15  ;;  %v3093_v38 = vsub.f32 %v2708_v33, %v3052_v56  ;;  %v536_v33 = vand.u32 4294901760, %v535_v57  ;;  %v3117_v50 = vsub.f32 %v2724_v40, %v3089_v52 }
  0x27   : > { %377 = vmatprep.subr.mxu0 %v2777_v4  ;;  %510 = vmatprep.subr.mxu1 %v2777_v4  ;;  %v543_v57 = vand.u32 4294901760, %v542_v63 }
  0x28   : > { %379 = vmatpush1.msra.mxu0 %v2985_v60  ;;  %516 = vmatpush1.msra.mxu1 %v515_v2  ;;  %v549_v2 = vsub.f32 %v3047_v51, %v4428_v49  ;;  %v426_v54 = vsub.f32 %v3074_v15, %v425_v8  ;;  %v562_v10 = vand.u32 4294901760, %v3093_v38  ;;  %v556_v49 = vsub.f32 %v3077_v20, %v4431_v41 }
  0x29   : > { %380 = vmatprep.subr.mxu0 %v2777_v4  ;;  %517 = vmatprep.subr.mxu1 %v2777_v4 }
  0x2a   : > { %382 = vmatpush1.msra.mxu0 %v2998_v0  ;;  %523 = vmatpush1.msra.mxu1 %v522_v32  ;;  %v432_v32 = vsub.f32 %v3085_v42, %v4430_v46  ;;  %v550_v40 = vand.u32 4294901760, %v549_v2  ;;  %v563_v63 = vsub.f32 %v3093_v38, %v562_v10  ;;  %v604_v46 = vand.u32 4294901760, %v3117_v50 }
  0x2b   : > { %383 = vmatprep.subr.mxu0 %v2777_v4  ;;  %524 = vmatprep.subr.mxu1 %v2777_v4  ;;  %v598_v2 = vsub.f32 %v3104_v30, %v597_v28 }
  0x2c   : > { %385 = vmatpush1.msra.mxu0 %v3032_v39  ;;  %530 = vmatpush1.msra.mxu1 %v529_v45  ;;  %v427_v45 = vand.u32 4294901760, %v426_v54  ;;  %v433_v41 = vand.u32 4294901760, %v432_v32  ;;  %v564_v54 = vand.u32 4294901760, %v563_v63  ;;  %v279_v32 = vld [vmem:[%s2955_s29 + $0x28] sm:$0x3] }
  0x2d   : > { %386 = vmatprep.subr.mxu0 %v2777_v4  ;;  %531 = vmatprep.subr.mxu1 %v2777_v4  ;;  %v278_v63 = vld [vmem:[%s2955_s29 + $0x20] sm:$0x3] }
  0x2e   : > { %388 = vmatpush1.msra.mxu0 %v3052_v56  ;;  %537 = vmatpush1.msra.mxu1 %v536_v33  ;;  %v557_v33 = vand.u32 4294901760, %v556_v49  ;;  %v599_v49 = vand.u32 4294901760, %v598_v2 }
  0x2f   : > { %417 = vmatprep.subr.mxu0 %v2777_v4  ;;  %538 = vmatprep.subr.mxu1 %v2777_v4 }
  0x30   : > { %419 = vmatpush2.msra.mxu0 %v3071_v37  ;;  %544 = vmatpush1.msra.mxu1 %v543_v57  ;;  %v605_v57 = vsub.f32 %v3117_v50, %v604_v46 }
  0x31   : > { %420 = vmatprep.subr.mxu0 %v2777_v4  ;;  %545 = vmatprep.subr.mxu1 %v2777_v4 }
  0x32   : > { %422 = vmatpush2.msra.mxu0 %v3089_v52  ;;  %551 = vmatpush1.msra.mxu1 %v550_v40  ;;  %v332_v40 = vrot.slane %v279_v32, 1 }
  0x33   : > { %428 = vmatprep.mubr.f32.mxu0 %v427_v45  ;;  %552 = vmatprep.subr.mxu1 %v2777_v4  ;;  %v606_v45 = vand.u32 4294901760, %v605_v57 }
  0x34   : > { %623 = vmatprep.subr.mxu0 %v2777_v4  ;;  %434 = vmatmul.mubr.f32.vlgmr.msra.gmra.mxu0 %v433_v41  ;;  %v333_v41 = vsel %vm323_vm0, %v328_v27, %v332_v40 }
  0x35   : > { %558 = vmatpush1.msra.mxu1 %v557_v33  ;;  %626 = vmatpush1.msra.mxu0 %v2869_v16  ;;  %v330_v33 = vrot.slane %v278_v63, 1  ;;  %v339_v2 = vsel %vm336_vm1, %v333_v41, 0  ;;  %v4463_v16 = vand.u32 4294901760, %v2888_v21 }
  0x36   : > { %559 = vmatprep.subr.mxu1 %v2777_v4  ;;  %627 = vmatprep.subr.mxu0 %v2777_v4 }
  0x37   : > { %565 = vmatpush1.msra.mxu1 %v564_v54  ;;  %630 = vmatpush1.msra.mxu0 %v2872_v17  ;;  %v331_v27 = vsel %vm323_vm0, %v325_v43, %v330_v33  ;;  %v3177_v54 = vand.u32 4294901760, %v339_v2  ;;  %v4464_v17 = vand.u32 4294901760, %v3085_v42 }
  0x38   : > { %594 = vmatprep.subr.mxu1 %v2777_v4  ;;  %631 = vmatprep.subr.mxu0 %v2777_v4  ;;  %v3181_v57 = vand.u32 4294901760, %v331_v27 }
  0x39   : > { %600 = vmatpush2.msra.mxu1 %v599_v49  ;;  %634 = vmatpush1.msra.mxu0 %v2877_v19  ;;  %v3190_v43 = vsub.f32 %v339_v2, %v3177_v54  ;;  %v4465_v19 = vand.u32 4294901760, %v2891_v22 }
  0x3a   : > { %601 = vmatprep.subr.mxu1 %v2777_v4  ;;  %635 = vmatprep.subr.mxu0 %v2777_v4  ;;  %v3195_v32 = vsub.f32 %v331_v27, %v3181_v57 }
  0x3b   : > { %607 = vmatpush2.msra.mxu1 %v606_v45  ;;  %609 = vmatprep.mubr.f32.mxu1 %v3054_v59  ;;  %v440_v49 = vand.u32 4294901760, %v3190_v43 }
  0x3c   : > { %638 = vmatpush1.msra.mxu0 %v2888_v21  ;;  %611 = vmatmul.mubr.f32.vlgmr.msra.gmra.mxu1 %v3067_v3  ;;  %v446_v40 = vand.u32 4294901760, %v3195_v32  ;;  %v4466_v21 = vand.u32 4294901760, %v2908_v31 }
  0x3d   : > { %639 = vmatprep.subr.mxu0 %v2777_v4  ;;  %742 = vmatprep.subr.mxu1 %v2777_v4  ;;  %v441_v45 = vsub.f32 %v3190_v43, %v440_v49 }
  0x3e   : > { %642 = vmatpush1.msra.mxu0 %v2891_v22  ;;  %744 = vmatpush1.msra.mxu1 %v2839_v5  ;;  %v447_v63 = vsub.f32 %v3195_v32, %v446_v40  ;;  %v4468_v22 = vand.u32 4294901760, %v2941_v44 }
  0x3f   : > { %643 = vmatprep.subr.mxu0 %v2777_v4  ;;  %745 = vmatprep.subr.mxu1 %v2777_v4  ;;  %v442_v41 = vand.u32 4294901760, %v441_v45 }
  0x40   : > { %646 = vmatpush1.msra.mxu0 %v2908_v31  ;;  %747 = vmatpush1.msra.mxu1 %v2841_v6  ;;  %v448_v33 = vand.u32 4294901760, %v447_v63  ;;  %v293_v31 = vld [vmem:[%s4413_s1 + $0x68] sm:$0xff]  ;;  %v284_v63 = vld [vmem:[%s4413_s1 + $0x20] sm:$0xff] }
  0x41   : > { %647 = vmatprep.subr.mxu0 %v2777_v4  ;;  %748 = vmatprep.subr.mxu1 %v2777_v4 }
  0x42   : > { %650 = vmatpush1.msra.mxu0 %v2921_v35  ;;  %750 = vmatpush1.msra.mxu1 %v2843_v7 }
  0x43   : > { %651 = vmatprep.subr.mxu0 %v2777_v4  ;;  %751 = vmatprep.subr.mxu1 %v2777_v4 }
  0x44   : > { %654 = vmatpush1.msra.mxu0 %v2941_v44  ;;  %753 = vmatpush1.msra.mxu1 %v2855_v11 }
  0x45   : > { %655 = vmatprep.subr.mxu0 %v2777_v4  ;;  %754 = vmatprep.subr.mxu1 %v2777_v4 }
  0x46   : > { %658 = vmatpush1.msra.mxu0 %v2950_v48  ;;  %756 = vmatpush1.msra.mxu1 %v2857_v12 }
  0x47   : > { %659 = vmatprep.subr.mxu0 %v2777_v4  ;;  %757 = vmatprep.subr.mxu1 %v2777_v4 }
  0x48   : > { %662 = vmatpush1.msra.mxu0 %v2973_v55  ;;  %759 = vmatpush1.msra.mxu1 %v2859_v13 }
  0x49   : > { %663 = vmatprep.subr.mxu0 %v2777_v4  ;;  %760 = vmatprep.subr.mxu1 %v2777_v4 }
  0x4a   : > { %666 = vmatpush1.msra.mxu0 %v2988_v61  ;;  %762 = vmatpush1.msra.mxu1 %v2874_v18 }
  0x4b   : > { %667 = vmatprep.subr.mxu0 %v2777_v4  ;;  %763 = vmatprep.subr.mxu1 %v2777_v4 }
  0x4c   : > { %670 = vmatpush1.msra.mxu0 %v3009_v9  ;;  %765 = vmatpush1.msra.mxu1 %v2897_v26 }
  0x4d   : > { %671 = vmatprep.subr.mxu0 %v2777_v4  ;;  %766 = vmatprep.subr.mxu1 %v2777_v4 }
  0x4e   : > { %674 = vmatpush1.msra.mxu0 %v3027_v34  ;;  %768 = vmatpush1.msra.mxu1 %v2904_v29 }
  0x4f   : > { %675 = vmatprep.subr.mxu0 %v2777_v4  ;;  %769 = vmatprep.subr.mxu1 %v2777_v4 }
  0x50   : > { %678 = vmatpush1.msra.mxu0 %v3047_v51  ;;  %771 = vmatpush1.msra.mxu1 %v2925_v36 }
  0x51   : > { %679 = vmatprep.subr.mxu0 %v2777_v4  ;;  %772 = vmatprep.subr.mxu1 %v2777_v4 }
  0x52   : > { %682 = vmatpush1.msra.mxu0 %v3077_v20  ;;  %774 = vmatpush1.msra.mxu1 %v2947_v47 }
  0x53   : > { %683 = vmatprep.subr.mxu0 %v2777_v4  ;;  %775 = vmatprep.subr.mxu1 %v2777_v4 }
  0x54   : > { %443 = vmatprep.mubr.f32.mxu0 %v442_v41  ;;  %686 = vmatpush1.msra.mxu0 %v3093_v38 }
  0x55   : > { %777 = vmatpush1.msra.mxu1 %v2967_v53  ;;  %449 = vmatmul.mubr.f32.gmra.mxu0 %v448_v33 }
  0x56   : > { %715 = vmatprep.subr.mxu0 %v2777_v4  ;;  %778 = vmatprep.subr.mxu1 %v2777_v4 }
  0x57   : > { %718 = vmatpush2.msra.mxu0 %v3104_v30  ;;  %780 = vmatpush1.msra.mxu1 %v2985_v60 }
  0x58   : > { %719 = vmatprep.subr.mxu0 %v2777_v4  ;;  %781 = vmatprep.subr.mxu1 %v2777_v4 }
  0x59   : > { %722 = vmatpush2.msra.mxu0 %v3117_v50  ;;  %725 = vmatprep.mubr.f32.mxu0 %v3074_v15  ;;  %v287_v15 = vld [vmem:[%s4413_s1 + $0x38] sm:$0xff] }
  0x5a   : > { %783 = vmatpush1.msra.mxu1 %v2998_v0  ;;  %728 = vmatmul.mubr.f32.vlgmr.msra.gmra.mxu0 %v3085_v42  ;;  %v3361_v42 = vand.u32 4294901760, %v293_v31 }
  0x5b   : > { %784 = vmatprep.subr.mxu1 %v2777_v4  ;;  %847 = vmatprep.subr.mxu0 %v2777_v4 }
  0x5c   : > { %786 = vmatpush1.msra.mxu1 %v3032_v39  ;;  %851 = vmatpush1.msra.mxu0 %v457_v23  ;;  %v4474_v23 = vand.u32 4294901760, %v3047_v51 }
  0x5d   : > { %616 = vmatprep.mubr.f32.mxu1 %v3177_v54  ;;  %787 = vmatprep.subr.mxu1 %v2777_v4 }
  0x5e   : > { %852 = vmatprep.subr.mxu0 %v2777_v4  ;;  %618 = vmatmul.mubr.f32.gmra.mxu1 %v3181_v57 }
  0x5f   : > { %789 = vmatpush1.msra.mxu1 %v3052_v56  ;;  %856 = vmatpush1.msra.mxu0 %v464_v24  ;;  %v294_v24 = vld [vmem:[%s4413_s1 + $0x70] sm:$0xff] }
  0x60   : > { %734 = vmatprep.mubr.f32.mxu0 %v3190_v43  ;;  %818 = vmatprep.subr.mxu1 %v2777_v4  ;;  %v3447_v43 = vand.u32 4294901760, %v287_v15 }
  0x61   : > { %857 = vmatprep.subr.mxu0 %v2777_v4  ;;  %737 = vmatmul.mubr.f32.gmra.mxu0 %v3195_v32 }
  0x62   : > { %820 = vmatpush2.msra.mxu1 %v3071_v37  ;;  %861 = vmatpush1.msra.mxu0 %v471_v25 }
  0x63   : > { %821 = vmatprep.subr.mxu1 %v2777_v4  ;;  %862 = vmatprep.subr.mxu0 %v2777_v4 }
  0x64   : > { %823 = vmatpush2.msra.mxu1 %v3089_v52  ;;  %827 = vmatprep.mubr.f32.mxu1 %v425_v8 }
  0x65   : > { %866 = vmatpush1.msra.mxu0 %v4463_v16  ;;  %831 = vmatmul.mubr.f32.vlgmr.msra.gmra.mxu1 %v4464_v17  ;;  %v3474_v16 = vsub.f32 %v287_v15, %v3447_v43 }
  0x66   : > { %867 = vmatprep.subr.mxu0 %v2777_v4  ;;  %980 = vmatprep.subr.mxu1 %v2777_v4 }
  0x67   : > { %871 = vmatpush1.msra.mxu0 %v4465_v19  ;;  %982 = vmatpush1.msra.mxu1 %v2839_v5  ;;  %v4467_v5 = vand.u32 4294901760, %v2921_v35 }
  0x68   : > { %872 = vmatprep.subr.mxu0 %v2777_v4  ;;  %983 = vmatprep.subr.mxu1 %v2777_v4 }
  0x69   : > { %838 = vmatprep.mubr.f32.mxu1 %v440_v49  ;;  %876 = vmatpush1.msra.mxu0 %v4466_v21  ;;  %v3483_v21 = vand.u32 4294901760, %v284_v63 }
  0x6a   : > { %985 = vmatpush1.msra.mxu1 %v2841_v6  ;;  %877 = vmatprep.subr.mxu0 %v2777_v4  ;;  %v4469_v6 = vand.u32 4294901760, %v2950_v48  ;;  %v290_v48 = vld [vmem:[%s4413_s1 + $0x50] sm:$0xff] }
  0x6b   : > { %842 = vmatmul.mubr.f32.gmra.mxu1 %v446_v40  ;;  %986 = vmatprep.subr.mxu1 %v2777_v4  ;;  %v285_v40 = vld [vmem:[%s4413_s1 + $0x28] sm:$0xff] }
  0x6c   : > { %881 = vmatpush1.msra.mxu0 %v4467_v5  ;;  %988 = vmatpush1.msra.mxu1 %v2843_v7  ;;  %v4470_v7 = vand.u32 4294901760, %v2973_v55  ;;  %v3479_v19 = vand.u32 4294901760, %v285_v40  ;;  %v283_v5 = vld [vmem:[%s4413_s1 + $0x18] sm:$0xff] }
  0x6d   : > { %882 = vmatprep.subr.mxu0 %v2777_v4  ;;  %989 = vmatprep.subr.mxu1 %v2777_v4 }
  0x6e   : > { %886 = vmatpush1.msra.mxu0 %v4468_v22  ;;  %991 = vmatpush1.msra.mxu1 %v2855_v11  ;;  %v4471_v11 = vand.u32 4294901760, %v2988_v61 }
  0x6f   : > { %887 = vmatprep.subr.mxu0 %v2777_v4  ;;  %992 = vmatprep.subr.mxu1 %v2777_v4 }
  0x70   : > { %891 = vmatpush1.msra.mxu0 %v4469_v6  ;;  %994 = vmatpush1.msra.mxu1 %v2857_v12  ;;  %v4472_v12 = vand.u32 4294901760, %v3009_v9  ;;  %v3400_v9 = vand.u32 4294901760, %v290_v48 }
  0x71   : > { %892 = vmatprep.subr.mxu0 %v2777_v4  ;;  %995 = vmatprep.subr.mxu1 %v2777_v4 }
  0x72   : > { %896 = vmatpush1.msra.mxu0 %v4470_v7  ;;  %997 = vmatpush1.msra.mxu1 %v2859_v13  ;;  %v4473_v13 = vand.u32 4294901760, %v3027_v34 }
  0x73   : > { %897 = vmatprep.subr.mxu0 %v2777_v4  ;;  %998 = vmatprep.subr.mxu1 %v2777_v4 }
  0x74   : > { %901 = vmatpush1.msra.mxu0 %v4471_v11  ;;  %1000 = vmatpush1.msra.mxu1 %v2874_v18  ;;  %v295_v18 = vld [vmem:[%s4413_s1 + $0x78] sm:$0xff] }
  0x75   : > { %902 = vmatprep.subr.mxu0 %v2777_v4  ;;  %1001 = vmatprep.subr.mxu1 %v2777_v4  ;;  %v3335_v25 = vand.u32 4294901760, %v295_v18 }
  0x76   : > { %906 = vmatpush1.msra.mxu0 %v4472_v12  ;;  %1003 = vmatpush1.msra.mxu1 %v2897_v26  ;;  %v4475_v26 = vand.u32 4294901760, %v3077_v20  ;;  %v3429_v20 = vsub.f32 %v290_v48, %v3400_v9  ;;  %v1077_v12 = vsel %vm336_vm1, %v2982_v58, 0  ;;  %v3516_v58 = vsub.f32 %v284_v63, %v3483_v21 }
  0x77   : > { %907 = vmatprep.subr.mxu0 %v2777_v4  ;;  %1004 = vmatprep.subr.mxu1 %v2777_v4  ;;  %v3353_v35 = vsub.f32 %v295_v18, %v3335_v25  ;;  %v3505_v18 = vsub.f32 %v285_v40, %v3479_v19  ;;  %v3526_v48 = vand.u32 4294901760, %v1077_v12 }
  0x78   : > { %911 = vmatpush1.msra.mxu0 %v4473_v13  ;;  %1006 = vmatpush1.msra.mxu1 %v2904_v29  ;;  %v3342_v29 = vand.u32 4294901760, %v294_v24  ;;  %v4434_v63 = vand.u32 4294901760, %v3516_v58 }
  0x79   : > { %912 = vmatprep.subr.mxu0 %v2777_v4  ;;  %1007 = vmatprep.subr.mxu1 %v2777_v4  ;;  %v1197_v30 = vand.u32 4294901760, %v3353_v35 }
  0x7a   : > { %916 = vmatpush1.msra.mxu0 %v4474_v23  ;;  %1009 = vmatpush1.msra.mxu1 %v2925_v36  ;;  %v292_v36 = vld [vmem:[%s4413_s1 + $0x60] sm:$0xff]  ;;  %v3366_v44 = vsub.f32 %v294_v24, %v3342_v29  ;;  %v3507_v23 = vand.u32 4294901760, %v283_v5  ;;  %v282_v24 = vld [vmem:[%s4413_s1 + $0x10] sm:$0xff] }
  0x7b   : > { %917 = vmatprep.subr.mxu0 %v2777_v4  ;;  %1010 = vmatprep.subr.mxu1 %v2777_v4  ;;  %v1198_v34 = vsub.f32 %v3353_v35, %v1197_v30 }
  0x7c   : > { %921 = vmatpush1.msra.mxu0 %v4475_v26  ;;  %1012 = vmatpush1.msra.mxu1 %v2947_v47  ;;  %v291_v47 = vld [vmem:[%s4413_s1 + $0x58] sm:$0xff]  ;;  %v1204_v61 = vand.u32 4294901760, %v3366_v44 }
  0x7d   : > { %922 = vmatprep.subr.mxu0 %v2777_v4  ;;  %1013 = vmatprep.subr.mxu1 %v2777_v4  ;;  %v3387_v55 = vand.u32 4294901760, %v291_v47  ;;  %v1199_v50 = vand.u32 4294901760, %v1198_v34 }
  0x7e   : > { %926 = vmatpush1.msra.mxu0 %v562_v10  ;;  %1015 = vmatpush1.msra.mxu1 %v2967_v53  ;;  %v3385_v53 = vsub.f32 %v293_v31, %v3361_v42 }
  0x7f   : > { %955 = vmatprep.subr.mxu0 %v2777_v4  ;;  %1016 = vmatprep.subr.mxu1 %v2777_v4  ;;  %v3415_v51 = vsub.f32 %v291_v47, %v3387_v55  ;;  %v281_v47 = vld [vmem:[%s4413_s1 + $0x8] sm:$0xff] }
  0x80   : > { %959 = vmatpush2.msra.mxu0 %v597_v28  ;;  %1018 = vmatpush1.msra.mxu1 %v2985_v60  ;;  %v3374_v28 = vand.u32 4294901760, %v292_v36  ;;  %v289_v60 = vld [vmem:[%s4413_s1 + $0x48] sm:$0xff]  ;;  %v1211_v10 = vand.u32 4294901760, %v3385_v53 }
  0x81   : > { %960 = vmatprep.subr.mxu0 %v2777_v4  ;;  %1019 = vmatprep.subr.mxu1 %v2777_v4  ;;  %v4441_v32 = vand.u32 4294901760, %v3415_v51 }
  0x82   : > { %964 = vmatpush2.msra.mxu0 %v604_v46  ;;  %966 = vmatprep.mubr.f32.mxu0 %v3054_v59  ;;  %v288_v46 = vld [vmem:[%s4413_s1 + $0x40] sm:$0xff]  ;;  %v1212_v27 = vsub.f32 %v3385_v53, %v1211_v10 }
  0x83   : > { %1021 = vmatpush1.msra.mxu1 %v2998_v0  ;;  %968 = vmatmul.mubr.f32.vlgmr.msra.gmra.mxu0 %v3067_v3  ;;  %v3398_v0 = vsub.f32 %v292_v36, %v3374_v28  ;;  %v3431_v8 = vand.u32 4294901760, %v288_v46  ;;  %v1226_v17 = vsub.f32 %v3415_v51, %v4441_v32 }
  0x84   : > { %1022 = vmatprep.subr.mxu1 %v2777_v4  ;;  %1081 = vmatprep.subr.mxu0 %v2777_v4  ;;  %v1213_v33 = vand.u32 4294901760, %v1212_v27  ;;  %v1079_v27 = vsel %vm336_vm1, %v2991_v62, 0 }
  0x85   : > { %1024 = vmatpush1.msra.mxu1 %v3032_v39  ;;  %1083 = vmatpush1.msra.mxu0 %v3335_v25  ;;  %v3407_v39 = vand.u32 4294901760, %v289_v60  ;;  %v4443_v38 = vand.u32 4294901760, %v3398_v0  ;;  %v1227_v13 = vand.u32 4294901760, %v1226_v17 }
  0x86   : > { %1025 = vmatprep.subr.mxu1 %v2777_v4  ;;  %1084 = vmatprep.subr.mxu0 %v2777_v4 }
  0x87   : > { %973 = vmatprep.mubr.f32.mxu0 %v3177_v54  ;;  %1027 = vmatpush1.msra.mxu1 %v3052_v56  ;;  %v1205_v56 = vsub.f32 %v3366_v44, %v1204_v61  ;;  %v3437_v2 = vsub.f32 %v289_v60, %v3407_v39  ;;  %v3529_v60 = vand.u32 4294901760, %v3001_v1 }
  0x88   : > { %1086 = vmatpush1.msra.mxu0 %v3342_v29  ;;  %1056 = vmatprep.subr.mxu1 %v2777_v4 }
  0x89   : > { %975 = vmatmul.mubr.f32.gmra.mxu0 %v3181_v57  ;;  %1087 = vmatprep.subr.mxu0 %v2777_v4  ;;  %v1206_v49 = vand.u32 4294901760, %v1205_v56  ;;  %v4438_v41 = vand.u32 4294901760, %v3437_v2  ;;  %v3537_v56 = vsub.f32 %v283_v5, %v3507_v23  ;;  %v297_v5 = vld [vmem:[%s4413_s1 + $0x88] sm:$0xff] }
  0x8a   : > { %1058 = vmatpush2.msra.mxu1 %v3071_v37  ;;  %1089 = vmatpush1.msra.mxu0 %v3361_v42  ;;  %v286_v37 = vld [vmem:[%s4413_s1 + $0x30] sm:$0xff] }
  0x8b   : > { %1059 = vmatprep.subr.mxu1 %v2777_v4  ;;  %1090 = vmatprep.subr.mxu0 %v2777_v4  ;;  %v3463_v45 = vand.u32 4294901760, %v286_v37  ;;  %v1240_v11 = vsub.f32 %v3437_v2, %v4438_v41 }
  0x8c   : > { %1061 = vmatpush2.msra.mxu1 %v3089_v52  ;;  %1063 = vmatprep.mubr.f32.mxu1 %v3054_v59  ;;  %v3458_v59 = vsub.f32 %v288_v46, %v3431_v8  ;;  %v1219_v52 = vsub.f32 %v3398_v0, %v4443_v38  ;;  %v3533_v46 = vand.u32 4294901760, %v282_v24 }
  0x8d   : > { %1092 = vmatpush1.msra.mxu0 %v3374_v28  ;;  %1065 = vmatmul.mubr.f32.vlgmr.msra.gmra.mxu1 %v3067_v3  ;;  %v4439_v3 = vand.u32 4294901760, %v3429_v20  ;;  %v3490_v6 = vsub.f32 %v286_v37, %v3463_v45  ;;  %v1241_v34 = vand.u32 4294901760, %v1240_v11  ;;  %v280_v37 = vld [vmem:[%s4413_s1] sm:$0xff] }
  0x8e   : > { %1093 = vmatprep.subr.mxu0 %v2777_v4  ;;  %1194 = vmatprep.subr.mxu1 %v2777_v4  ;;  %v1220_v22 = vand.u32 4294901760, %v1219_v52  ;;  %v3563_v62 = vsub.f32 %v282_v24, %v3533_v46  ;;  %v3565_v17 = vand.u32 4294901760, %v280_v37 }
  0x8f   : > { %1095 = vmatpush1.msra.mxu0 %v3387_v55  ;;  %1200 = vmatpush1.msra.mxu1 %v1199_v50  ;;  %v1233_v7 = vsub.f32 %v3429_v20, %v4439_v3  ;;  %v4433_v36 = vand.u32 4294901760, %v3490_v6  ;;  %v4432_v50 = vand.u32 4294901760, %v3505_v18 }
  0x90   : > { %1096 = vmatprep.subr.mxu0 %v2777_v4  ;;  %1201 = vmatprep.subr.mxu1 %v2777_v4 }
  0x91   : > { %1070 = vmatprep.mubr.f32.mxu1 %v3177_v54  ;;  %1098 = vmatpush1.msra.mxu0 %v3400_v9  ;;  %v4436_v54 = vand.u32 4294901760, %v3458_v59  ;;  %v1234_v26 = vand.u32 4294901760, %v1233_v7  ;;  %v1261_v52 = vsub.f32 %v3490_v6, %v4433_v36  ;;  %v3574_v7 = vand.u32 4294901760, %v1079_v27 }
  0x92   : > { %1207 = vmatpush1.msra.mxu1 %v1206_v49  ;;  %1099 = vmatprep.subr.mxu0 %v2777_v4  ;;  %v3550_v49 = vand.u32 4294901760, %v281_v47  ;;  %v4440_v36 = vand.u32 4294901760, %v3563_v62 }
  0x93   : > { %1072 = vmatmul.mubr.f32.gmra.mxu1 %v3181_v57  ;;  %1208 = vmatprep.subr.mxu1 %v2777_v4  ;;  %v4435_v57 = vand.u32 4294901760, %v3474_v16  ;;  %v1247_v31 = vsub.f32 %v3458_v59, %v4436_v54 }
  0x94   : > { %1101 = vmatpush1.msra.mxu0 %v3407_v39  ;;  %1214 = vmatpush1.msra.mxu1 %v1213_v33  ;;  %v3558_v33 = vsub.f32 %v1077_v12, %v3526_v48  ;;  %v1268_v12 = vsub.f32 %v3505_v18, %v4432_v50  ;;  %v3584_v24 = vsub.f32 %v281_v47, %v3550_v49 }
  0x95   : > { %1102 = vmatprep.subr.mxu0 %v2777_v4  ;;  %1215 = vmatprep.subr.mxu1 %v2777_v4  ;;  %v1254_v15 = vsub.f32 %v3474_v16, %v4435_v57  ;;  %v1248_v40 = vand.u32 4294901760, %v1247_v31  ;;  %v1262_v31 = vand.u32 4294901760, %v1261_v52  ;;  %v3602_v50 = vsub.f32 %v280_v37, %v3565_v17 }
  0x96   : > { %1104 = vmatpush1.msra.mxu0 %v3431_v8  ;;  %1221 = vmatpush1.msra.mxu1 %v1220_v22  ;;  %v3572_v22 = vsub.f32 %v3001_v1, %v3529_v60  ;;  %v296_v1 = vld [vmem:[%s4413_s1 + $0x80] sm:$0xff]  ;;  %v1165_v47 = vand.u32 4294901760, %v3558_v33  ;;  %v3607_v52 = vsub.f32 %v1079_v27, %v3574_v7  ;;  %v4444_v37 = vand.u32 4294901760, %v3584_v24 }
  0x97   : > { %1105 = vmatprep.subr.mxu0 %v2777_v4  ;;  %1222 = vmatprep.subr.mxu1 %v2777_v4  ;;  %v1255_v11 = vand.u32 4294901760, %v1254_v15  ;;  %v3596_v15 = vand.u32 4294901760, %v297_v5  ;;  %v3613_v54 = vand.u32 4294901760, %v296_v1 }
  0x98   : > { %1107 = vmatpush1.msra.mxu0 %v3447_v43  ;;  %1228 = vmatpush1.msra.mxu1 %v1227_v13  ;;  %v4437_v13 = vand.u32 4294901760, %v3537_v56 }
  0x99   : > { %1108 = vmatprep.subr.mxu0 %v2777_v4  ;;  %1229 = vmatprep.subr.mxu1 %v2777_v4  ;;  %v3641_v3 = vsub.f32 %v296_v1, %v3613_v54 }
  0x9a   : > { %1110 = vmatpush1.msra.mxu0 %v3463_v45  ;;  %1235 = vmatpush1.msra.mxu1 %v1234_v26  ;;  %v3590_v26 = vand.u32 4294901760, %v3013_v14  ;;  %v1282_v57 = vsub.f32 %v3537_v56, %v4437_v13  ;;  %v1166_v13 = vsub.f32 %v3558_v33, %v1165_v47 }
  0x9b   : > { %1111 = vmatprep.subr.mxu0 %v2777_v4  ;;  %1236 = vmatprep.subr.mxu1 %v2777_v4 }
  0x9c   : > { %1113 = vmatpush1.msra.mxu0 %v3479_v19  ;;  %1242 = vmatpush1.msra.mxu1 %v1241_v34  ;;  %v1275_v34 = vsub.f32 %v3516_v58, %v4434_v63  ;;  %v1269_v63 = vand.u32 4294901760, %v1268_v12  ;;  %v3620_v27 = vsub.f32 %v3013_v14, %v3590_v26  ;;  %v3624_v12 = vsub.f32 %v297_v5, %v3596_v15 }
  0x9d   : > { %1114 = vmatprep.subr.mxu0 %v2777_v4  ;;  %1243 = vmatprep.subr.mxu1 %v2777_v4  ;;  %v1289_v14 = vsub.f32 %v3563_v62, %v4440_v36  ;;  %v4445_v5 = vand.u32 4294901760, %v3602_v50  ;;  %v1283_v41 = vand.u32 4294901760, %v1282_v57  ;;  %v1296_v36 = vsub.f32 %v3584_v24, %v4444_v37 }
  0x9e   : > { %1116 = vmatpush1.msra.mxu0 %v3483_v21  ;;  %1249 = vmatpush1.msra.mxu1 %v1248_v40  ;;  %v4442_v40 = vand.u32 4294901760, %v3572_v22  ;;  %v1186_v32 = vand.u32 4294901760, %v3620_v27 }
  0x9f   : > { %1117 = vmatprep.subr.mxu0 %v2777_v4  ;;  %1250 = vmatprep.subr.mxu1 %v2777_v4  ;;  %v1290_v57 = vand.u32 4294901760, %v1289_v14  ;;  %v1303_v37 = vsub.f32 %v3602_v50, %v4445_v5 }
  0xa0   : > { %1119 = vmatpush1.msra.mxu0 %v3507_v23  ;;  %1256 = vmatpush1.msra.mxu1 %v1255_v11  ;;  %v1276_v11 = vand.u32 4294901760, %v1275_v34  ;;  %v1180_v34 = vand.u32 4294901760, %v3607_v52  ;;  %v1187_v14 = vsub.f32 %v3620_v27, %v1186_v32 }
  0xa1   : > { %1120 = vmatprep.subr.mxu0 %v2777_v4  ;;  %1257 = vmatprep.subr.mxu1 %v2777_v4  ;;  %v1304_v5 = vand.u32 4294901760, %v1303_v37 }
  0xa2   : > { %1122 = vmatpush1.msra.mxu0 %v3533_v46  ;;  %1263 = vmatpush1.msra.mxu1 %v1262_v31  ;;  %v1172_v31 = vsub.f32 %v3572_v22, %v4442_v40  ;;  %v1167_v40 = vand.u32 4294901760, %v1166_v13  ;;  %v1181_v38 = vsub.f32 %v3607_v52, %v1180_v34  ;;  %v1344_v13 = vand.u32 4294901760, %v3641_v3 }
  0xa3   : > { %1123 = vmatprep.subr.mxu0 %v2777_v4  ;;  %1264 = vmatprep.subr.mxu1 %v2777_v4 }
  0xa4   : > { %1125 = vmatpush1.msra.mxu0 %v3550_v49  ;;  %1270 = vmatpush1.msra.mxu1 %v1269_v63  ;;  %v1337_v63 = vand.u32 4294901760, %v3624_v12  ;;  %v1173_v1 = vand.u32 4294901760, %v1172_v31 }
  0xa5   : > { %1126 = vmatprep.subr.mxu0 %v2777_v4  ;;  %1271 = vmatprep.subr.mxu1 %v2777_v4 }
  0xa6   : > { %1128 = vmatpush1.msra.mxu0 %v3565_v17  ;;  %1277 = vmatpush1.msra.mxu1 %v1276_v11  ;;  %v1297_v11 = vand.u32 4294901760, %v1296_v36  ;;  %v1338_v31 = vsub.f32 %v3624_v12, %v1337_v63  ;;  %v1345_v36 = vsub.f32 %v3641_v3, %v1344_v13 }
  0xa7   : > { %1157 = vmatprep.subr.mxu0 %v2777_v4  ;;  %1278 = vmatprep.subr.mxu1 %v2777_v4 }
  0xa8   : > { %1159 = vmatpush2.msra.mxu0 %v3596_v15  ;;  %1284 = vmatpush1.msra.mxu1 %v1283_v41  ;;  %v1182_v41 = vand.u32 4294901760, %v1181_v38  ;;  %v1346_v38 = vand.u32 4294901760, %v1345_v36 }
  0xa9   : > { %1160 = vmatprep.subr.mxu0 %v2777_v4  ;;  %1285 = vmatprep.subr.mxu1 %v2777_v4 }
  0xaa   : > { %1162 = vmatpush2.msra.mxu0 %v3613_v54  ;;  %1168 = vmatprep.mubr.f32.mxu0 %v1167_v40  ;;  %v1188_v40 = vand.u32 4294901760, %v1187_v14 }
  0xab   : > { %1291 = vmatpush1.msra.mxu1 %v1290_v57  ;;  %1174 = vmatmul.mubr.f32.vlgmr.msra.gmra.mxu0 %v1173_v1  ;;  %v1339_v57 = vand.u32 4294901760, %v1338_v31 }
  0xac   : > { %1292 = vmatprep.subr.mxu1 %v2777_v4  ;;  %1363 = vmatprep.subr.mxu0 %v2777_v4 }
  0xad   : > { %1298 = vmatpush1.msra.mxu1 %v1297_v11  ;;  %1366 = vmatpush1.msra.mxu0 %v3353_v35  ;;  %v4476_v35 = vand.u32 4294901760, %v3398_v0 }
  0xae   : > { %1299 = vmatprep.subr.mxu1 %v2777_v4  ;;  %1367 = vmatprep.subr.mxu0 %v2777_v4 }
  0xaf   : > { %1183 = vmatprep.mubr.f32.mxu0 %v1182_v41  ;;  %1305 = vmatpush1.msra.mxu1 %v1304_v5  ;;  %v2733_v5 = vld [vmem:[%s4413_s1 + $0x158] sm:$0xff] }
  0xb0   : > { %1370 = vmatpush1.msra.mxu0 %v3366_v44  ;;  %1334 = vmatprep.subr.mxu1 %v2777_v4  ;;  %v4477_v44 = vand.u32 4294901760, %v3572_v22  ;;  %v3950_v41 = vand.u32 4294901760, %v2733_v5 }
  0xb1   : > { %1189 = vmatmul.mubr.f32.gmra.mxu0 %v1188_v40  ;;  %1371 = vmatprep.subr.mxu0 %v2777_v4 }
  0xb2   : > { %1340 = vmatpush2.msra.mxu1 %v1339_v57  ;;  %1374 = vmatpush1.msra.mxu0 %v3385_v53  ;;  %v4479_v53 = vand.u32 4294901760, %v3429_v20  ;;  %v2731_v57 = vld [vmem:[%s4413_s1 + $0x148] sm:$0xff] }
  0xb3   : > { %1341 = vmatprep.subr.mxu1 %v2777_v4  ;;  %1375 = vmatprep.subr.mxu0 %v2777_v4 }
  0xb4   : > { %1347 = vmatpush2.msra.mxu1 %v1346_v38  ;;  %1349 = vmatprep.mubr.f32.mxu1 %v3526_v48 }
  0xb5   : > { %1378 = vmatpush1.msra.mxu0 %v3398_v0  ;;  %1351 = vmatmul.mubr.f32.vlgmr.msra.gmra.mxu1 %v3529_v60  ;;  %v4486_v0 = vand.u32 4294901760, %v3537_v56 }
  0xb6   : > { %1379 = vmatprep.subr.mxu0 %v2777_v4  ;;  %1482 = vmatprep.subr.mxu1 %v2777_v4 }
  0xb7   : > { %1382 = vmatpush1.msra.mxu0 %v3415_v51  ;;  %1484 = vmatpush1.msra.mxu1 %v3335_v25 }
  0xb8   : > { %1383 = vmatprep.subr.mxu0 %v2777_v4  ;;  %1485 = vmatprep.subr.mxu1 %v2777_v4 }
  0xb9   : > { %1356 = vmatprep.mubr.f32.mxu1 %v3574_v7  ;;  %1386 = vmatpush1.msra.mxu0 %v3429_v20  ;;  %v4488_v20 = vand.u32 4294901760, %v3584_v24 }
  0xba   : > { %1487 = vmatpush1.msra.mxu1 %v3342_v29  ;;  %1387 = vmatprep.subr.mxu0 %v2777_v4 }
  0xbb   : > { %1358 = vmatmul.mubr.f32.gmra.mxu1 %v3590_v26  ;;  %1488 = vmatprep.subr.mxu1 %v2777_v4 }
  0xbc   : > { %1390 = vmatpush1.msra.mxu0 %v3437_v2  ;;  %1490 = vmatpush1.msra.mxu1 %v3361_v42 }
  0xbd   : > { %1391 = vmatprep.subr.mxu0 %v2777_v4  ;;  %1491 = vmatprep.subr.mxu1 %v2777_v4 }
  0xbe   : > { %1394 = vmatpush1.msra.mxu0 %v3458_v59  ;;  %1493 = vmatpush1.msra.mxu1 %v3374_v28 }
  0xbf   : > { %1395 = vmatprep.subr.mxu0 %v2777_v4  ;;  %1494 = vmatprep.subr.mxu1 %v2777_v4 }
  0xc0   : > { %1398 = vmatpush1.msra.mxu0 %v3474_v16  ;;  %1496 = vmatpush1.msra.mxu1 %v3387_v55 }
  0xc1   : > { %1399 = vmatprep.subr.mxu0 %v2777_v4  ;;  %1497 = vmatprep.subr.mxu1 %v2777_v4 }
  0xc2   : > { %1402 = vmatpush1.msra.mxu0 %v3490_v6  ;;  %1499 = vmatpush1.msra.mxu1 %v3400_v9 }
  0xc3   : > { %1403 = vmatprep.subr.mxu0 %v2777_v4  ;;  %1500 = vmatprep.subr.mxu1 %v2777_v4 }
  0xc4   : > { %1406 = vmatpush1.msra.mxu0 %v3505_v18  ;;  %1502 = vmatpush1.msra.mxu1 %v3407_v39 }
  0xc5   : > { %1407 = vmatprep.subr.mxu0 %v2777_v4  ;;  %1503 = vmatprep.subr.mxu1 %v2777_v4 }
  0xc6   : > { %1410 = vmatpush1.msra.mxu0 %v3516_v58  ;;  %1505 = vmatpush1.msra.mxu1 %v3431_v8 }
  0xc7   : > { %1411 = vmatprep.subr.mxu0 %v2777_v4  ;;  %1506 = vmatprep.subr.mxu1 %v2777_v4 }
  0xc8   : > { %1414 = vmatpush1.msra.mxu0 %v3537_v56  ;;  %1508 = vmatpush1.msra.mxu1 %v3447_v43 }
  0xc9   : > { %1415 = vmatprep.subr.mxu0 %v2777_v4  ;;  %1509 = vmatprep.subr.mxu1 %v2777_v4 }
  0xca   : > { %1418 = vmatpush1.msra.mxu0 %v3563_v62  ;;  %1511 = vmatpush1.msra.mxu1 %v3463_v45 }
  0xcb   : > { %1419 = vmatprep.subr.mxu0 %v2777_v4  ;;  %1512 = vmatprep.subr.mxu1 %v2777_v4 }
  0xcc   : > { %1422 = vmatpush1.msra.mxu0 %v3584_v24  ;;  %1514 = vmatpush1.msra.mxu1 %v3479_v19 }
  0xcd   : > { %1423 = vmatprep.subr.mxu0 %v2777_v4  ;;  %1515 = vmatprep.subr.mxu1 %v2777_v4 }
  0xce   : > { %1426 = vmatpush1.msra.mxu0 %v3602_v50  ;;  %1517 = vmatpush1.msra.mxu1 %v3483_v21 }
  0xcf   : > { %1455 = vmatprep.subr.mxu0 %v2777_v4  ;;  %1518 = vmatprep.subr.mxu1 %v2777_v4 }
  0xd0   : > { %1458 = vmatpush2.msra.mxu0 %v3624_v12  ;;  %1520 = vmatpush1.msra.mxu1 %v3507_v23 }
  0xd1   : > { %1459 = vmatprep.subr.mxu0 %v2777_v4  ;;  %1521 = vmatprep.subr.mxu1 %v2777_v4 }
  0xd2   : > { %1462 = vmatpush2.msra.mxu0 %v3641_v3  ;;  %1465 = vmatprep.mubr.f32.mxu0 %v3558_v33 }
  0xd3   : > { %1523 = vmatpush1.msra.mxu1 %v3533_v46  ;;  %1468 = vmatmul.mubr.f32.vlgmr.msra.gmra.mxu0 %v3572_v22 }
  0xd4   : > { %1524 = vmatprep.subr.mxu1 %v2777_v4  ;;  %1587 = vmatprep.subr.mxu0 %v2777_v4 }
  0xd5   : > { %1526 = vmatpush1.msra.mxu1 %v3550_v49  ;;  %1591 = vmatpush1.msra.mxu0 %v1197_v30  ;;  %v4478_v30 = vand.u32 4294901760, %v3415_v51  ;;  %v2740_v51 = vld [vmem:[%s4413_s1 + $0x190] sm:$0xff] }
  0xd6   : > { %1527 = vmatprep.subr.mxu1 %v2777_v4  ;;  %1592 = vmatprep.subr.mxu0 %v2777_v4 }
  0xd7   : > { %1474 = vmatprep.mubr.f32.mxu0 %v3607_v52  ;;  %1529 = vmatpush1.msra.mxu1 %v3565_v17 }
  0xd8   : > { %1596 = vmatpush1.msra.mxu0 %v1204_v61  ;;  %1558 = vmatprep.subr.mxu1 %v2777_v4  ;;  %v4481_v61 = vand.u32 4294901760, %v3458_v59 }
  0xd9   : > { %1477 = vmatmul.mubr.f32.gmra.mxu0 %v3620_v27  ;;  %1597 = vmatprep.subr.mxu0 %v2777_v4  ;;  %v2734_v27 = vld [vmem:[%s4413_s1 + $0x160] sm:$0xff] }
  0xda   : > { %1560 = vmatpush2.msra.mxu1 %v3596_v15  ;;  %1601 = vmatpush1.msra.mxu0 %v1211_v10 }
  0xdb   : > { %1561 = vmatprep.subr.mxu1 %v2777_v4  ;;  %1602 = vmatprep.subr.mxu0 %v2777_v4 }
  0xdc   : > { %1563 = vmatpush2.msra.mxu1 %v3613_v54  ;;  %1567 = vmatprep.mubr.f32.mxu1 %v1165_v47 }
  0xdd   : > { %1606 = vmatpush1.msra.mxu0 %v4476_v35  ;;  %1571 = vmatmul.mubr.f32.vlgmr.msra.gmra.mxu1 %v4477_v44 }
  0xde   : > { %1607 = vmatprep.subr.mxu0 %v2777_v4  ;;  %1720 = vmatprep.subr.mxu1 %v2777_v4 }
  0xdf   : > { %1611 = vmatpush1.msra.mxu0 %v4478_v30  ;;  %1722 = vmatpush1.msra.mxu1 %v3335_v25  ;;  %v4480_v25 = vand.u32 4294901760, %v3437_v2  ;;  %v3842_v2 = vand.u32 4294901760, %v2740_v51 }
  0xe0   : > { %1612 = vmatprep.subr.mxu0 %v2777_v4  ;;  %1723 = vmatprep.subr.mxu1 %v2777_v4 }
  0xe1   : > { %1578 = vmatprep.mubr.f32.mxu1 %v1180_v34  ;;  %1616 = vmatpush1.msra.mxu0 %v4479_v53 }
  0xe2   : > { %1725 = vmatpush1.msra.mxu1 %v3342_v29  ;;  %1617 = vmatprep.subr.mxu0 %v2777_v4  ;;  %v4482_v29 = vand.u32 4294901760, %v3474_v16  ;;  %v2738_v16 = vld [vmem:[%s4413_s1 + $0x180] sm:$0xff] }
  0xe3   : > { %1582 = vmatmul.mubr.f32.gmra.mxu1 %v1186_v32  ;;  %1726 = vmatprep.subr.mxu1 %v2777_v4  ;;  %v4489_v32 = vand.u32 4294901760, %v3602_v50  ;;  %v2735_v50 = vld [vmem:[%s4413_s1 + $0x168] sm:$0xff] }
  0xe4   : > { %1621 = vmatpush1.msra.mxu0 %v4480_v25  ;;  %1728 = vmatpush1.msra.mxu1 %v3361_v42  ;;  %v4483_v42 = vand.u32 4294901760, %v3490_v6  ;;  %v3869_v6 = vsub.f32 %v2740_v51, %v3842_v2  ;;  %v3912_v37 = vand.u32 4294901760, %v2735_v50 }
  0xe5   : > { %1622 = vmatprep.subr.mxu0 %v2777_v4  ;;  %1729 = vmatprep.subr.mxu1 %v2777_v4 }
  0xe6   : > { %1626 = vmatpush1.msra.mxu0 %v4481_v61  ;;  %1731 = vmatpush1.msra.mxu1 %v3374_v28  ;;  %v4484_v28 = vand.u32 4294901760, %v3505_v18  ;;  %v3874_v18 = vand.u32 4294901760, %v2738_v16  ;;  %v3939_v11 = vsub.f32 %v2735_v50, %v3912_v37  ;;  %v2730_v61 = vld [vmem:[%s4413_s1 + $0x140] sm:$0xff] }
  0xe7   : > { %1627 = vmatprep.subr.mxu0 %v2777_v4  ;;  %1732 = vmatprep.subr.mxu1 %v2777_v4 }
  0xe8   : > { %1631 = vmatpush1.msra.mxu0 %v4482_v29  ;;  %1734 = vmatpush1.msra.mxu1 %v3387_v55  ;;  %v4485_v55 = vand.u32 4294901760, %v3516_v58  ;;  %v3902_v24 = vsub.f32 %v2738_v16, %v3874_v18  ;;  %v4450_v25 = vand.u32 4294901760, %v3939_v11 }
  0xe9   : > { %1632 = vmatprep.subr.mxu0 %v2777_v4  ;;  %1735 = vmatprep.subr.mxu1 %v2777_v4 }
  0xea   : > { %1636 = vmatpush1.msra.mxu0 %v4483_v42  ;;  %1737 = vmatpush1.msra.mxu1 %v3400_v9  ;;  %v2741_v9 = vld [vmem:[%s4413_s1 + $0x198] sm:$0xff]  ;;  %v4455_v1 = vand.u32 4294901760, %v3902_v24  ;;  %v3984_v42 = vsub.f32 %v2733_v5, %v3950_v41 }
  0xeb   : > { %1637 = vmatprep.subr.mxu0 %v2777_v4  ;;  %1738 = vmatprep.subr.mxu1 %v2777_v4  ;;  %v3835_v10 = vand.u32 4294901760, %v2741_v9 }
  0xec   : > { %1641 = vmatpush1.msra.mxu0 %v4484_v28  ;;  %1740 = vmatpush1.msra.mxu1 %v3407_v39  ;;  %v4487_v39 = vand.u32 4294901760, %v3563_v62  ;;  %v4461_v62 = vand.u32 4294901760, %v3869_v6  ;;  %v3986_v28 = vand.u32 4294901760, %v2731_v57 }
  0xed   : > { %1642 = vmatprep.subr.mxu0 %v2777_v4  ;;  %1741 = vmatprep.subr.mxu1 %v2777_v4 }
  0xee   : > { %1646 = vmatpush1.msra.mxu0 %v4485_v55  ;;  %1743 = vmatpush1.msra.mxu1 %v3431_v8  ;;  %v1977_v34 = vsub.f32 %v3869_v6, %v4461_v62  ;;  %v4021_v50 = vsub.f32 %v2731_v57, %v3986_v28 }
  0xef   : > { %1647 = vmatprep.subr.mxu0 %v2777_v4  ;;  %1744 = vmatprep.subr.mxu1 %v2777_v4 }
  0xf0   : > { %1651 = vmatpush1.msra.mxu0 %v4486_v0  ;;  %1746 = vmatpush1.msra.mxu1 %v3447_v43  ;;  %v2739_v43 = vld [vmem:[%s4413_s1 + $0x188] sm:$0xff]  ;;  %v1978_v36 = vand.u32 4294901760, %v1977_v34  ;;  %v2729_v0 = vld [vmem:[%s4413_s1 + $0x138] sm:$0xff] }
  0xf1   : > { %1652 = vmatprep.subr.mxu0 %v2777_v4  ;;  %1747 = vmatprep.subr.mxu1 %v2777_v4 }
  0xf2   : > { %1656 = vmatpush1.msra.mxu0 %v4487_v39  ;;  %1749 = vmatpush1.msra.mxu1 %v3463_v45  ;;  %v3853_v45 = vsub.f32 %v2741_v9, %v3835_v10  ;;  %v2765_v39 = vld [vmem:[%s2955_s29] sm:$0xff] }
  0xf3   : > { %1657 = vmatprep.subr.mxu0 %v2777_v4  ;;  %1750 = vmatprep.subr.mxu1 %v2777_v4  ;;  %v1837_v51 = vrot.slane %v2765_v39, 2 }
  0xf4   : > { %1661 = vmatpush1.msra.mxu0 %v4488_v20  ;;  %1752 = vmatpush1.msra.mxu1 %v3479_v19  ;;  %v435_v8 = vpop.f32.mrf.mxu0  ;;  %v3861_v19 = vand.u32 4294901760, %v2739_v43  ;;  %v1969_v56 = vand.u32 4294901760, %v3853_v45  ;;  %v4001_v20 = vld [vmem:[%s2955_s29 + $0x10] sm:$0xff] }
  0xf5   : > { %1662 = vmatprep.subr.mxu0 %v2777_v4  ;;  %1753 = vmatprep.subr.mxu1 %v2777_v4 }
  0xf6   : > { %1666 = vmatpush1.msra.mxu0 %v4489_v32  ;;  %1755 = vmatpush1.msra.mxu1 %v3483_v21  ;;  %v437_v59 = vpop.f32.mrf.mxu0  ;;  %v2737_v21 = vld [vmem:[%s4413_s1 + $0x178] sm:$0xff]  ;;  %v3887_v3 = vsub.f32 %v2739_v43, %v3861_v19  ;;  %v1970_v52 = vsub.f32 %v3853_v45, %v1969_v56  ;;  %v4008_v32 = vand.u32 4294901760, %v2730_v61 }
  0xf7   : > { %1695 = vmatprep.subr.mxu0 %v2777_v4  ;;  %1756 = vmatprep.subr.mxu1 %v2777_v4  ;;  %v3881_v58 = vand.u32 4294901760, %v2737_v21 }
  0xf8   : > { %1699 = vmatpush2.msra.mxu0 %v1337_v63  ;;  %1758 = vmatpush1.msra.mxu1 %v3507_v23  ;;  %v2736_v23 = vld [vmem:[%s4413_s1 + $0x170] sm:$0xff]  ;;  %v4457_v12 = vand.u32 4294901760, %v3887_v3  ;;  %v3933_v63 = vand.u32 4294901760, %v2734_v27  ;;  %v4034_v34 = vsub.f32 %v2730_v61, %v4008_v32 }
  0xf9   : > { %1700 = vmatprep.subr.mxu0 %v2777_v4  ;;  %1759 = vmatprep.subr.mxu1 %v2777_v4 }
  0xfa   : > { %1704 = vmatpush2.msra.mxu0 %v1344_v13  ;;  %1706 = vmatprep.mubr.f32.mxu0 %v3526_v48  ;;  %v1971_v13 = vand.u32 4294901760, %v1970_v52  ;;  %v1984_v31 = vsub.f32 %v3887_v3, %v4457_v12  ;;  %v3966_v44 = vsub.f32 %v2734_v27, %v3933_v63  ;;  %v4452_v39 = vand.u32 4294901760, %v4034_v34 }
  0xfb   : > { %1761 = vmatpush1.msra.mxu1 %v3533_v46  ;;  %1708 = vmatmul.mubr.f32.vlgmr.msra.gmra.mxu0 %v3529_v60  ;;  %v3894_v46 = vand.u32 4294901760, %v2736_v23 }
  0xfc   : > { %1762 = vmatprep.subr.mxu1 %v2777_v4  ;;  %1853 = vmatprep.subr.mxu0 %v2777_v4  ;;  %v612_v33 = vpop.f32.mrf.mxu1  ;;  %v1985_v29 = vand.u32 4294901760, %v1984_v31  ;;  %v4449_v59 = vand.u32 4294901760, %v3966_v44  ;;  %v2727_v31 = vld [vmem:[%s4413_s1 + $0x128] sm:$0xff] }
  0xfd   : > { %1764 = vmatpush1.msra.mxu1 %v3550_v49  ;;  %1855 = vmatpush1.msra.mxu0 %v3835_v10  ;;  %v3897_v22 = vadd.f32 %v612_v33, %v435_v8  ;;  %v3907_v49 = vsub.f32 %v2737_v21, %v3881_v58  ;;  %v2012_v21 = vsub.f32 %v3939_v11, %v4450_v25  ;;  %v4023_v33 = vand.u32 4294901760, %v2729_v0 }
  0xfe   : > { %1765 = vmatprep.subr.mxu1 %v2777_v4  ;;  %1856 = vmatprep.subr.mxu0 %v2777_v4  ;;  %v614_v47 = vpop.f32.mrf.mxu1  ;;  %v2019_v5 = vsub.f32 %v3966_v44, %v4449_v59 }
  0xff   : > { %1713 = vmatprep.mubr.f32.mxu0 %v3574_v7  ;;  %1767 = vmatpush1.msra.mxu1 %v3565_v17  ;;  %v3923_v17 = vsub.f32 %v2736_v23, %v3894_v46  ;;  %v4453_v14 = vand.u32 4294901760, %v3907_v49  ;;  %v2728_v23 = vld [vmem:[%s4413_s1 + $0x130] sm:$0xff] }
 0x100   : > { %1858 = vmatpush1.msra.mxu0 %v3842_v2  ;;  %1796 = vmatprep.subr.mxu1 %v2777_v4 }
 0x101   : > { %1715 = vmatmul.mubr.f32.gmra.mxu0 %v3590_v26  ;;  %1859 = vmatprep.subr.mxu0 %v2777_v4  ;;  %v4451_v40 = vand.u32 4294901760, %v3923_v17  ;;  %v1998_v53 = vsub.f32 %v3907_v49, %v4453_v14 }
 0x102   : > { %1798 = vmatpush2.msra.mxu1 %v3596_v15  ;;  %1861 = vmatpush1.msra.mxu0 %v3861_v19  ;;  %v2732_v15 = vld [vmem:[%s4413_s1 + $0x150] sm:$0xff] }
 0x103   : > { %1799 = vmatprep.subr.mxu1 %v2777_v4  ;;  %1862 = vmatprep.subr.mxu0 %v2777_v4  ;;  %v3971_v30 = vand.u32 4294901760, %v2732_v15  ;;  %v2005_v55 = vsub.f32 %v3923_v17, %v4451_v40  ;;  %v1999_v16 = vand.u32 4294901760, %v1998_v53  ;;  %v2726_v53 = vld [vmem:[%s4413_s1 + $0x120] sm:$0xff] }
 0x104   : > { %1801 = vmatpush2.msra.mxu1 %v3613_v54  ;;  %1803 = vmatprep.mubr.f32.mxu1 %v3526_v48  ;;  %v2763_v54 = vld [vmem:[%s2955_s29 + $0x8] sm:$0xff]  ;;  %v3960_v48 = vld [vmem:[%s2955_s29 + $0x18] sm:$0xff] }
 0x105   : > { %1864 = vmatpush1.msra.mxu0 %v3874_v18  ;;  %1805 = vmatmul.mubr.f32.vlgmr.msra.gmra.mxu1 %v3529_v60  ;;  %v1840_v38 = vrot.slane %v2763_v54, 2  ;;  %v1841_v35 = vrot.slane %v3960_v48, 2  ;;  %v1991_v60 = vsub.f32 %v3902_v24, %v4455_v1  ;;  %v4006_v43 = vsub.f32 %v2732_v15, %v3971_v30 }
 0x106   : > { %1865 = vmatprep.subr.mxu0 %v2777_v4  ;;  %1966 = vmatprep.subr.mxu1 %v2777_v4  ;;  %v2006_v52 = vand.u32 4294901760, %v2005_v55  ;;  %v4051_v54 = vsub.f32 %v2729_v0, %v4023_v33  ;;  %v2020_v55 = vand.u32 4294901760, %v2019_v5  ;;  %v2742_v5 = vld [vmem:[%s4413_s1 + $0x1a0] sm:$0xff] }
 0x107   : > { %1867 = vmatpush1.msra.mxu0 %v3881_v58  ;;  %1972 = vmatpush1.msra.mxu1 %v1971_v13  ;;  %v1842_v9 = vsel %vm1836_vm2, %v1840_v38, %v1841_v35  ;;  %v1992_v8 = vand.u32 4294901760, %v1991_v60  ;;  %v4039_v13 = vand.u32 4294901760, %v2728_v23  ;;  %v4446_v15 = vand.u32 4294901760, %v4006_v43 }
 0x108   : > { %1868 = vmatprep.subr.mxu0 %v2777_v4  ;;  %1973 = vmatprep.subr.mxu1 %v2777_v4  ;;  %v1849_v47 = vsel %vm336_vm1, %v1842_v9, 0  ;;  %v4447_v60 = vand.u32 4294901760, %v4021_v50  ;;  %v4112_v59 = vand.u32 4294901760, %v2742_v5 }
 0x109   : > { %1810 = vmatprep.mubr.f32.mxu1 %v3574_v7  ;;  %1870 = vmatpush1.msra.mxu0 %v3894_v46  ;;  %v1838_v7 = vrot.slane %v4001_v20, 2  ;;  %v4047_v57 = vand.u32 4294901760, %v1849_v47  ;;  %v4068_v0 = vsub.f32 %v2728_v23, %v4039_v13  ;;  %v2033_v9 = vsub.f32 %v4006_v43, %v4446_v15 }
 0x10a   : > { %1979 = vmatpush1.msra.mxu1 %v1978_v36  ;;  %1871 = vmatprep.subr.mxu0 %v2777_v4  ;;  %v2013_v36 = vand.u32 4294901760, %v2012_v21  ;;  %v2040_v23 = vsub.f32 %v4021_v50, %v4447_v60 }
 0x10b   : > { %1812 = vmatmul.mubr.f32.gmra.mxu1 %v3590_v26  ;;  %1980 = vmatprep.subr.mxu1 %v2777_v4  ;;  %v4448_v26 = vand.u32 4294901760, %v3984_v42  ;;  %v1839_v27 = vsel %vm1836_vm2, %v1837_v51, %v1838_v7  ;;  %v2743_v51 = vld [vmem:[%s4413_s1 + $0x1a8] sm:$0xff]  ;;  %v2034_v60 = vand.u32 4294901760, %v2033_v9 }
 0x10c   : > { %1873 = vmatpush1.msra.mxu0 %v3912_v37  ;;  %1986 = vmatpush1.msra.mxu1 %v1985_v29  ;;  %v4060_v61 = vand.u32 4294901760, %v1839_v27  ;;  %v4064_v29 = vand.u32 4294901760, %v2727_v31 }
 0x10d   : > { %1874 = vmatprep.subr.mxu0 %v2777_v4  ;;  %1987 = vmatprep.subr.mxu1 %v2777_v4  ;;  %v2026_v38 = vsub.f32 %v3984_v42, %v4448_v26  ;;  %v2047_v26 = vsub.f32 %v4034_v34, %v4452_v39 }
 0x10e   : > { %1876 = vmatpush1.msra.mxu0 %v3933_v63  ;;  %1993 = vmatpush1.msra.mxu1 %v1992_v8  ;;  %v4079_v8 = vand.u32 4294901760, %v2726_v53  ;;  %v4093_v15 = vsub.f32 %v1839_v27, %v4060_v61  ;;  %v4456_v27 = vand.u32 4294901760, %v4068_v0 }
 0x10f   : > { %1877 = vmatprep.subr.mxu0 %v2777_v4  ;;  %1994 = vmatprep.subr.mxu1 %v2777_v4  ;;  %v2027_v21 = vand.u32 4294901760, %v2026_v38 }
 0x110   : > { %1879 = vmatpush1.msra.mxu0 %v3950_v41  ;;  %2000 = vmatpush1.msra.mxu1 %v1999_v16  ;;  %v4082_v16 = vsub.f32 %v1849_v47, %v4047_v57  ;;  %v4098_v47 = vsub.f32 %v2727_v31, %v4064_v29  ;;  %v4110_v31 = vsub.f32 %v2726_v53, %v4079_v8  ;;  %v4459_v39 = vand.u32 4294901760, %v4093_v15 }
 0x111   : > { %1880 = vmatprep.subr.mxu0 %v2777_v4  ;;  %2001 = vmatprep.subr.mxu1 %v2777_v4 }
 0x112   : > { %1882 = vmatpush1.msra.mxu0 %v3971_v30  ;;  %2007 = vmatpush1.msra.mxu1 %v2006_v52  ;;  %v4454_v52 = vand.u32 4294901760, %v4051_v54  ;;  %v4458_v25 = vand.u32 4294901760, %v4082_v16  ;;  %v4460_v14 = vand.u32 4294901760, %v4098_v47  ;;  %v2074_v1 = vand.u32 4294901760, %v4110_v31 }
 0x113   : > { %1883 = vmatprep.subr.mxu0 %v2777_v4  ;;  %2008 = vmatprep.subr.mxu1 %v2777_v4 }
 0x114   : > { %1885 = vmatpush1.msra.mxu0 %v3986_v28  ;;  %2014 = vmatpush1.msra.mxu1 %v2013_v36  ;;  %v4100_v36 = vand.u32 4294901760, %v2743_v51  ;;  %v2054_v9 = vsub.f32 %v4051_v54, %v4454_v52  ;;  %v4133_v52 = vsub.f32 %v2742_v5, %v4112_v59  ;;  %v2068_v5 = vsub.f32 %v4098_v47, %v4460_v14 }
 0x115   : > { %1886 = vmatprep.subr.mxu0 %v2777_v4  ;;  %2015 = vmatprep.subr.mxu1 %v2777_v4  ;;  %v450_v38 = vpop.f32.mrf.mxu0 }
 0x116   : > { %1888 = vmatpush1.msra.mxu0 %v4008_v32  ;;  %2021 = vmatpush1.msra.mxu1 %v2020_v55  ;;  %v2041_v55 = vand.u32 4294901760, %v2040_v23  ;;  %v4123_v53 = vsub.f32 %v2743_v51, %v4100_v36  ;;  %v1938_v51 = vsub.f32 %v4082_v16, %v4458_v25 }
 0x117   : > { %1889 = vmatprep.subr.mxu0 %v2777_v4  ;;  %2022 = vmatprep.subr.mxu1 %v2777_v4  ;;  %v452_v40 = vpop.f32.mrf.mxu0 }
 0x118   : > { %1891 = vmatpush1.msra.mxu0 %v4023_v33  ;;  %2028 = vmatpush1.msra.mxu1 %v2027_v21  ;;  %v2048_v40 = vand.u32 4294901760, %v2047_v26  ;;  %v2061_v21 = vsub.f32 %v4068_v0, %v4456_v27  ;;  %v1944_v27 = vsub.f32 %v4093_v15, %v4459_v39  ;;  %v2109_v25 = vand.u32 4294901760, %v4123_v53 }
 0x119   : > { %1892 = vmatprep.subr.mxu0 %v2777_v4  ;;  %2029 = vmatprep.subr.mxu1 %v2777_v4 }
 0x11a   : > { %1894 = vmatpush1.msra.mxu0 %v4039_v13  ;;  %2035 = vmatpush1.msra.mxu1 %v2034_v60  ;;  %v729_v23 = vpop.f32.mrf.mxu0  ;;  %v2055_v60 = vand.u32 4294901760, %v2054_v9  ;;  %v2075_v9 = vsub.f32 %v4110_v31, %v2074_v1  ;;  %v1945_v14 = vand.u32 4294901760, %v1944_v27 }
 0x11b   : > { %1895 = vmatprep.subr.mxu0 %v2777_v4  ;;  %2036 = vmatprep.subr.mxu1 %v2777_v4  ;;  %v730_v26 = vadd.f32 %v729_v23, %v3897_v22  ;;  %v2062_v22 = vand.u32 4294901760, %v2061_v21  ;;  %v2116_v23 = vand.u32 4294901760, %v4133_v52  ;;  %v2110_v21 = vsub.f32 %v4123_v53, %v2109_v25 }
 0x11c   : > { %1897 = vmatpush1.msra.mxu0 %v4064_v29  ;;  %2042 = vmatpush1.msra.mxu1 %v2041_v55  ;;  %v731_v12 = vpop.f32.mrf.mxu0  ;;  %v2076_v27 = vand.u32 4294901760, %v2075_v9 }
 0x11d   : > { %1898 = vmatprep.subr.mxu0 %v2777_v4  ;;  %2043 = vmatprep.subr.mxu1 %v2777_v4  ;;  %v1939_v12 = vand.u32 4294901760, %v1938_v51 }
 0x11e   : > { %1900 = vmatpush1.msra.mxu0 %v4079_v8  ;;  %2049 = vmatpush1.msra.mxu1 %v2048_v40  ;;  %v619_v55 = vpop.f32.mrf.mxu1  ;;  %v2069_v40 = vand.u32 4294901760, %v2068_v5  ;;  %v2111_v5 = vand.u32 4294901760, %v2110_v21 }
 0x11f   : > { %1929 = vmatprep.subr.mxu0 %v2777_v4  ;;  %2050 = vmatprep.subr.mxu1 %v2777_v4  ;;  %v620_v39 = vadd.f32 %v619_v55, %v450_v38 }
 0x120   : > { %1931 = vmatpush2.msra.mxu0 %v4100_v36  ;;  %2056 = vmatpush1.msra.mxu1 %v2055_v60  ;;  %v621_v62 = vpop.f32.mrf.mxu1 }
 0x121   : > { %1932 = vmatprep.subr.mxu0 %v2777_v4  ;;  %2057 = vmatprep.subr.mxu1 %v2777_v4  ;;  %v738_v51 = vpop.f32.mrf.mxu0  ;;  %v2117_v62 = vsub.f32 %v4133_v52, %v2116_v23 }
 0x122   : > { %1934 = vmatpush2.msra.mxu0 %v4112_v59  ;;  %2063 = vmatpush1.msra.mxu1 %v2062_v22  ;;  %v739_v38 = vadd.f32 %v738_v51, %v620_v39  ;;  %v2767_v22 = vld [vmem:[%s2955_s29 + $0x28] sm:$0x3] }
 0x123   : > { %1940 = vmatprep.mubr.f32.mxu0 %v1939_v12  ;;  %2064 = vmatprep.subr.mxu1 %v2777_v4  ;;  %v740_v60 = vpop.f32.mrf.mxu0  ;;  %v1845_v12 = vrot.slane %v2767_v22, 2  ;;  %v2118_v9 = vand.u32 4294901760, %v2117_v62 }
 0x124   : > { %2135 = vmatprep.subr.mxu0 %v2777_v4  ;;  %1946 = vmatmul.mubr.f32.vlgmr.msra.gmra.mxu0 %v1945_v14 }
 0x125   : > { %2070 = vmatpush1.msra.mxu1 %v2069_v40  ;;  %2138 = vmatpush1.msra.mxu0 %v3853_v45  ;;  %v832_v55 = vpop.f32.mrf.mxu1  ;;  %v1846_v14 = vsel %vm1836_vm2, %v1841_v35, %v1845_v12  ;;  %v4491_v45 = vand.u32 4294901760, %v3887_v3 }
 0x126   : > { %2071 = vmatprep.subr.mxu1 %v2777_v4  ;;  %2139 = vmatprep.subr.mxu0 %v2777_v4  ;;  %v4172_v39 = vadd.f32 %v832_v55, %v730_v26  ;;  %v2768_v26 = vld [vmem:[%s2955_s29 + $0x20] sm:$0x3]  ;;  %v1851_v48 = vsel %vm336_vm1, %v1846_v14, 0 }
 0x127   : > { %2077 = vmatpush1.msra.mxu1 %v2076_v27  ;;  %2142 = vmatpush1.msra.mxu0 %v3869_v6  ;;  %v834_v51 = vpop.f32.mrf.mxu1  ;;  %v1843_v40 = vrot.slane %v2768_v26, 2 }
 0x128   : > { %2106 = vmatprep.subr.mxu1 %v2777_v4  ;;  %2143 = vmatprep.subr.mxu0 %v2777_v4 }
 0x129   : > { %2112 = vmatpush2.msra.mxu1 %v2111_v5  ;;  %2146 = vmatpush1.msra.mxu0 %v3887_v3  ;;  %v1844_v35 = vsel %vm1836_vm2, %v1838_v7, %v1843_v40 }
 0x12a   : > { %2113 = vmatprep.subr.mxu1 %v2777_v4  ;;  %2147 = vmatprep.subr.mxu0 %v2777_v4  ;;  %v4206_v60 = vand.u32 4294901760, %v1844_v35 }
 0x12b   : > { %2119 = vmatpush2.msra.mxu1 %v2118_v9  ;;  %2121 = vmatprep.mubr.f32.mxu1 %v4047_v57  ;;  %v843_v21 = vpop.f32.mrf.mxu1 }
 0x12c   : > { %2150 = vmatpush1.msra.mxu0 %v3902_v24  ;;  %2123 = vmatmul.mubr.f32.vlgmr.msra.gmra.mxu1 %v4060_v61  ;;  %v4188_v27 = vadd.f32 %v843_v21, %v739_v38  ;;  %v4202_v38 = vand.u32 4294901760, %v1851_v48  ;;  %v4220_v7 = vsub.f32 %v1844_v35, %v4206_v60  ;;  %v4490_v35 = vand.u32 4294901760, %v3869_v6 }
 0x12d   : > { %2151 = vmatprep.subr.mxu0 %v2777_v4  ;;  %2254 = vmatprep.subr.mxu1 %v2777_v4  ;;  %v845_v62 = vpop.f32.mrf.mxu1 }
 0x12e   : > { %2154 = vmatpush1.msra.mxu0 %v3907_v49  ;;  %2256 = vmatpush1.msra.mxu1 %v3835_v10  ;;  %v4215_v20 = vsub.f32 %v1851_v48, %v4202_v38  ;;  %v1958_v55 = vand.u32 4294901760, %v4220_v7 }
 0x12f   : > { %2155 = vmatprep.subr.mxu0 %v2777_v4  ;;  %2257 = vmatprep.subr.mxu1 %v2777_v4 }
 0x130   : > { %2158 = vmatpush1.msra.mxu0 %v3923_v17  ;;  %2259 = vmatpush1.msra.mxu1 %v3842_v2  ;;  %v1952_v5 = vand.u32 4294901760, %v4215_v20  ;;  %v1959_v12 = vsub.f32 %v4220_v7, %v1958_v55 }
 0x131   : > { %2159 = vmatprep.subr.mxu0 %v2777_v4  ;;  %2260 = vmatprep.subr.mxu1 %v2777_v4 }
 0x132   : > { %2162 = vmatpush1.msra.mxu0 %v3939_v11  ;;  %2262 = vmatpush1.msra.mxu1 %v3861_v19  ;;  %v1953_v22 = vsub.f32 %v4215_v20, %v1952_v5  ;;  %v1960_v51 = vand.u32 4294901760, %v1959_v12 }
 0x133   : > { %2163 = vmatprep.subr.mxu0 %v2777_v4  ;;  %2263 = vmatprep.subr.mxu1 %v2777_v4 }
 0x134   : > { %2166 = vmatpush1.msra.mxu0 %v3966_v44  ;;  %2265 = vmatpush1.msra.mxu1 %v3874_v18  ;;  %v1954_v9 = vand.u32 4294901760, %v1953_v22 }
 0x135   : > { %2167 = vmatprep.subr.mxu0 %v2777_v4  ;;  %2266 = vmatprep.subr.mxu1 %v2777_v4 }
 0x136   : > { %2170 = vmatpush1.msra.mxu0 %v3984_v42  ;;  %2268 = vmatpush1.msra.mxu1 %v3881_v58 }
 0x137   : > { %2171 = vmatprep.subr.mxu0 %v2777_v4  ;;  %2269 = vmatprep.subr.mxu1 %v2777_v4 }
 0x138   : > { %2174 = vmatpush1.msra.mxu0 %v4006_v43  ;;  %2271 = vmatpush1.msra.mxu1 %v3894_v46 }
 0x139   : > { %2175 = vmatprep.subr.mxu0 %v2777_v4  ;;  %2272 = vmatprep.subr.mxu1 %v2777_v4 }
 0x13a   : > { %2178 = vmatpush1.msra.mxu0 %v4021_v50  ;;  %2274 = vmatpush1.msra.mxu1 %v3912_v37 }
 0x13b   : > { %2179 = vmatprep.subr.mxu0 %v2777_v4  ;;  %2275 = vmatprep.subr.mxu1 %v2777_v4 }
 0x13c   : > { %2182 = vmatpush1.msra.mxu0 %v4034_v34  ;;  %2277 = vmatpush1.msra.mxu1 %v3933_v63 }
 0x13d   : > { %2183 = vmatprep.subr.mxu0 %v2777_v4  ;;  %2278 = vmatprep.subr.mxu1 %v2777_v4 }
 0x13e   : > { %2186 = vmatpush1.msra.mxu0 %v4051_v54  ;;  %2280 = vmatpush1.msra.mxu1 %v3950_v41 }
 0x13f   : > { %2187 = vmatprep.subr.mxu0 %v2777_v4  ;;  %2281 = vmatprep.subr.mxu1 %v2777_v4 }
 0x140   : > { %2190 = vmatpush1.msra.mxu0 %v4068_v0  ;;  %2283 = vmatpush1.msra.mxu1 %v3971_v30 }
 0x141   : > { %2191 = vmatprep.subr.mxu0 %v2777_v4  ;;  %2284 = vmatprep.subr.mxu1 %v2777_v4 }
 0x142   : > { %2194 = vmatpush1.msra.mxu0 %v4098_v47  ;;  %2286 = vmatpush1.msra.mxu1 %v3986_v28 }
 0x143   : > { %2195 = vmatprep.subr.mxu0 %v2777_v4  ;;  %2287 = vmatprep.subr.mxu1 %v2777_v4  ;;  %v969_v14 = vpop.f32.mrf.mxu0 }
 0x144   : > { %1955 = vmatprep.mubr.f32.mxu0 %v1954_v9  ;;  %2198 = vmatpush1.msra.mxu0 %v4110_v31  ;;  %v970_v26 = vadd.f32 %v969_v14, %v4172_v39  ;;  %v4493_v9 = vand.u32 4294901760, %v3902_v24  ;;  %v4495_v14 = vand.u32 4294901760, %v3907_v49  ;;  %v4496_v24 = vand.u32 4294901760, %v3923_v17 }
 0x145   : > { %2289 = vmatpush1.msra.mxu1 %v4008_v32  ;;  %1961 = vmatmul.mubr.f32.gmra.mxu0 %v1960_v51  ;;  %v971_v40 = vpop.f32.mrf.mxu0  ;;  %v4494_v51 = vand.u32 4294901760, %v4093_v15  ;;  %v4498_v49 = vand.u32 4294901760, %v3966_v44 }
 0x146   : > { %2227 = vmatprep.subr.mxu0 %v2777_v4  ;;  %2290 = vmatprep.subr.mxu1 %v2777_v4 }
 0x147   : > { %2230 = vmatpush2.msra.mxu0 %v4123_v53  ;;  %2292 = vmatpush1.msra.mxu1 %v4023_v33 }
 0x148   : > { %2231 = vmatprep.subr.mxu0 %v2777_v4  ;;  %2293 = vmatprep.subr.mxu1 %v2777_v4 }
 0x149   : > { %2234 = vmatpush2.msra.mxu0 %v4133_v52  ;;  %2237 = vmatprep.mubr.f32.mxu0 %v4082_v16  ;;  %v976_v39 = vpop.f32.mrf.mxu0 }
 0x14a   : > { %2295 = vmatpush1.msra.mxu1 %v4039_v13  ;;  %2240 = vmatmul.mubr.f32.vlgmr.msra.gmra.mxu0 %v4093_v15  ;;  %v977_v21 = vadd.f32 %v976_v39, %v4188_v27 }
 0x14b   : > { %2296 = vmatprep.subr.mxu1 %v2777_v4  ;;  %2359 = vmatprep.subr.mxu0 %v2777_v4  ;;  %v978_v48 = vpop.f32.mrf.mxu0 }
 0x14c   : > { %2298 = vmatpush1.msra.mxu1 %v4064_v29  ;;  %2363 = vmatpush1.msra.mxu0 %v1969_v56  ;;  %v4492_v56 = vand.u32 4294901760, %v4082_v16 }
 0x14d   : > { %2128 = vmatprep.mubr.f32.mxu1 %v4202_v38  ;;  %2299 = vmatprep.subr.mxu1 %v2777_v4  ;;  %v1066_v62 = vpop.f32.mrf.mxu1 }
 0x14e   : > { %2364 = vmatprep.subr.mxu0 %v2777_v4  ;;  %2130 = vmatmul.mubr.f32.gmra.mxu1 %v4206_v60  ;;  %v4281_v27 = vadd.f32 %v1066_v62, %v970_v26 }
 0x14f   : > { %2301 = vmatpush1.msra.mxu1 %v4079_v8  ;;  %2368 = vmatpush1.msra.mxu0 %v4490_v35  ;;  %v1068_v22 = vpop.f32.mrf.mxu1 }
 0x150   : > { %2246 = vmatprep.mubr.f32.mxu0 %v4215_v20  ;;  %2330 = vmatprep.subr.mxu1 %v2777_v4 }
 0x151   : > { %2369 = vmatprep.subr.mxu0 %v2777_v4  ;;  %2249 = vmatmul.mubr.f32.gmra.mxu0 %v4220_v7 }
 0x152   : > { %2332 = vmatpush2.msra.mxu1 %v4100_v36  ;;  %2373 = vmatpush1.msra.mxu0 %v4491_v45 }
 0x153   : > { %2333 = vmatprep.subr.mxu1 %v2777_v4  ;;  %2374 = vmatprep.subr.mxu0 %v2777_v4  ;;  %v1073_v6 = vpop.f32.mrf.mxu1 }
 0x154   : > { %2335 = vmatpush2.msra.mxu1 %v4112_v59  ;;  %2339 = vmatprep.mubr.f32.mxu1 %v4492_v56  ;;  %v4298_v12 = vadd.f32 %v1073_v6, %v977_v21 }
 0x155   : > { %2378 = vmatpush1.msra.mxu0 %v4493_v9  ;;  %2343 = vmatmul.mubr.f32.vlgmr.msra.gmra.mxu1 %v4494_v51  ;;  %v1075_v3 = vpop.f32.mrf.mxu1 }
 0x156   : > { %2379 = vmatprep.subr.mxu0 %v2777_v4  ;;  %2492 = vmatprep.subr.mxu1 %v2777_v4 }
 0x157   : > { %2383 = vmatpush1.msra.mxu0 %v4495_v14  ;;  %2494 = vmatpush1.msra.mxu1 %v3835_v10  ;;  %v4497_v10 = vand.u32 4294901760, %v3939_v11 }
 0x158   : > { %2384 = vmatprep.subr.mxu0 %v2777_v4  ;;  %2495 = vmatprep.subr.mxu1 %v2777_v4 }
 0x159   : > { %2350 = vmatprep.mubr.f32.mxu1 %v1952_v5  ;;  %2388 = vmatpush1.msra.mxu0 %v4496_v24 }
 0x15a   : > { %2497 = vmatpush1.msra.mxu1 %v3842_v2  ;;  %2389 = vmatprep.subr.mxu0 %v2777_v4  ;;  %v4499_v2 = vand.u32 4294901760, %v3984_v42  ;;  %v2746_v42 = vld [vmem:[#allocation2] ss:$0 sm:$0xff] }
 0x15b   : > { %2354 = vmatmul.mubr.f32.gmra.mxu1 %v1958_v55  ;;  %2498 = vmatprep.subr.mxu1 %v2777_v4 }
 0x15c   : > { %2393 = vmatpush1.msra.mxu0 %v4497_v10  ;;  %2500 = vmatpush1.msra.mxu1 %v3861_v19  ;;  %v4500_v19 = vand.u32 4294901760, %v4006_v43  ;;  %v2778_v43 = vmov 0  }
 0x15d   : > { %2394 = vmatprep.subr.mxu0 %v2777_v4  ;;  %2501 = vmatprep.subr.mxu1 %v2777_v4 }
 0x15e   : > { %2398 = vmatpush1.msra.mxu0 %v4498_v49  ;;  %2503 = vmatpush1.msra.mxu1 %v3874_v18  ;;  %v4501_v18 = vand.u32 4294901760, %v4021_v50 }
 0x15f   : > { %2399 = vmatprep.subr.mxu0 %v2777_v4  ;;  %2504 = vmatprep.subr.mxu1 %v2777_v4 }
 0x160   : > { %2403 = vmatpush1.msra.mxu0 %v4499_v2  ;;  %2506 = vmatpush1.msra.mxu1 %v3881_v58  ;;  %v4502_v58 = vand.u32 4294901760, %v4034_v34 }
 0x161   : > { %2404 = vmatprep.subr.mxu0 %v2777_v4  ;;  %2507 = vmatprep.subr.mxu1 %v2777_v4 }
 0x162   : > { %2408 = vmatpush1.msra.mxu0 %v4500_v19  ;;  %2509 = vmatpush1.msra.mxu1 %v3894_v46  ;;  %v4503_v46 = vand.u32 4294901760, %v4051_v54 }
 0x163   : > { %2409 = vmatprep.subr.mxu0 %v2777_v4  ;;  %2510 = vmatprep.subr.mxu1 %v2777_v4 }
 0x164   : > { %2413 = vmatpush1.msra.mxu0 %v4501_v18  ;;  %2512 = vmatpush1.msra.mxu1 %v3912_v37  ;;  %v4504_v37 = vand.u32 4294901760, %v4068_v0 }
 0x165   : > { %2414 = vmatprep.subr.mxu0 %v2777_v4  ;;  %2513 = vmatprep.subr.mxu1 %v2777_v4 }
 0x166   : > { %2418 = vmatpush1.msra.mxu0 %v4502_v58  ;;  %2515 = vmatpush1.msra.mxu1 %v3933_v63  ;;  %v4505_v63 = vand.u32 4294901760, %v4098_v47 }
 0x167   : > { %2419 = vmatprep.subr.mxu0 %v2777_v4  ;;  %2516 = vmatprep.subr.mxu1 %v2777_v4 }
 0x168   : > { %2423 = vmatpush1.msra.mxu0 %v4503_v46  ;;  %2518 = vmatpush1.msra.mxu1 %v3950_v41 }
 0x169   : > { %2424 = vmatprep.subr.mxu0 %v2777_v4  ;;  %2519 = vmatprep.subr.mxu1 %v2777_v4 }
 0x16a   : > { %2428 = vmatpush1.msra.mxu0 %v4504_v37  ;;  %2521 = vmatpush1.msra.mxu1 %v3971_v30 }
 0x16b   : > { %2429 = vmatprep.subr.mxu0 %v2777_v4  ;;  %2522 = vmatprep.subr.mxu1 %v2777_v4  ;;  %v1175_v17 = vpop.f32.mrf.mxu0 }
 0x16c   : > { %2433 = vmatpush1.msra.mxu0 %v4505_v63  ;;  %2524 = vmatpush1.msra.mxu1 %v3986_v28  ;;  %v1176_v11 = vadd.f32 %v1175_v17, %v4281_v27 }
 0x16d   : > { %2434 = vmatprep.subr.mxu0 %v2777_v4  ;;  %2525 = vmatprep.subr.mxu1 %v2777_v4  ;;  %v1177_v41 = vpop.f32.mrf.mxu0 }
 0x16e   : > { %2438 = vmatpush1.msra.mxu0 %v2074_v1  ;;  %2527 = vmatpush1.msra.mxu1 %v4008_v32 }
 0x16f   : > { %2467 = vmatprep.subr.mxu0 %v2777_v4  ;;  %2528 = vmatprep.subr.mxu1 %v2777_v4 }
 0x170   : > { %2471 = vmatpush2.msra.mxu0 %v2109_v25  ;;  %2530 = vmatpush1.msra.mxu1 %v4023_v33 }
 0x171   : > { %2472 = vmatprep.subr.mxu0 %v2777_v4  ;;  %2531 = vmatprep.subr.mxu1 %v2777_v4  ;;  %v1190_v44 = vpop.f32.mrf.mxu0 }
 0x172   : > { %2476 = vmatpush2.msra.mxu0 %v2116_v23  ;;  %2478 = vmatprep.mubr.f32.mxu0 %v4047_v57  ;;  %v1191_v1 = vadd.f32 %v1190_v44, %v4298_v12  ;;  %v2744_v44 = vld [vmem:[%s4414_s2] ss:$0 sm:$0xff] }
 0x173   : > { %2533 = vmatpush1.msra.mxu1 %v4039_v13  ;;  %2480 = vmatmul.mubr.f32.vlgmr.msra.gmra.mxu0 %v4060_v61  ;;  %v1192_v30 = vpop.f32.mrf.mxu0 }
 0x174   : > { %2534 = vmatprep.subr.mxu1 %v2777_v4  ;;  %2485 = vmatprep.mubr.f32.mxu0 %v4202_v38 }
 0x175   : > { %2536 = vmatpush1.msra.mxu1 %v4064_v29  ;;  %2575 = vmatprep.mubr.f32.mxu1 %v4047_v57  ;;  %v1352_v25 = vpop.f32.mrf.mxu1 }
 0x176   : > { %2537 = vmatprep.subr.mxu1 %v2777_v4  ;;  %v1353_v28 = vadd.f32 %v1352_v25, %v1176_v11  ;;  %2762 = vset.pattern.permute.xlu0 %v2778_v43 }
 0x177   : > { %2539 = vmatpush1.msra.mxu1 %v4079_v8  ;;  %2487 = vmatmul.mubr.f32.gmra.mxu0 %v4206_v60  ;;  %v1354_v32 = vpop.f32.mrf.mxu1 }
 0x178   : > { %2568 = vmatprep.subr.mxu1 %v2777_v4  ;;  %2618 = vperm.xlu0 %2762, %v2746_v42  }
 0x179   : > { %2570 = vmatpush2.msra.mxu1 %v4100_v36 }
 0x17a   : > { %2571 = vmatprep.subr.mxu1 %v2777_v4 }
 0x17b   : > { %2573 = vmatpush2.msra.mxu1 %v4112_v59  ;;  %v1359_v50 = vpop.f32.mrf.mxu1 }
 0x17c   : > { %2577 = vmatmul.mubr.f32.vlgmr.msra.gmra.mxu1 %v4060_v61  ;;  %v1360_v33 = vadd.f32 %v1359_v50, %v1191_v1 }
 0x17d   : > { %2582 = vmatprep.mubr.f32.mxu1 %v4202_v38  ;;  %v1361_v34 = vpop.f32.mrf.mxu1 }
 0x180   : > { %2584 = vmatmul.mubr.f32.gmra.mxu1 %v4206_v60 }
 0x193   : > { %v1469_v13 = vpop.f32.mrf.mxu0 }
 0x194   : > { %v1470_v15 = vadd.f32 %v1469_v13, %v1353_v28  ;;  %v2745_v28 = vld [vmem:[%s4415_s3] ss:$0 sm:$0xff] }
 0x195   : > { %v1471_v57 = vpop.f32.mrf.mxu0 }
 0x199   : > { %v1478_v54 = vpop.f32.mrf.mxu0 }
 0x19a   : > { %v1479_v29 = vadd.f32 %v1478_v54, %v1360_v33  ;;  %v2625_v54 = vld [vmem:[%s268_s8] sm:$0xff] }
 0x19b   : > { %v1480_v0 = vpop.f32.mrf.mxu0 }
 0x19d   : > { %v1572_v8 = vpop.f32.mrf.mxu1 }
 0x19e   : > { %v1573_v16 = vadd.f32 %v1572_v8, %v1470_v15 }
 0x19f   : > { %v1574_v4 = vpop.f32.mrf.mxu1 }
 0x1a0   : > { %v2626_v4 = vld [vmem:[%s268_s8 + $0x8] sm:$0xff] }
 0x1a3   : > { %v1583_v52 = vpop.f32.mrf.mxu1 }
 0x1a4   : > { %v1584_v59 = vadd.f32 %v1583_v52, %v1479_v29 }
 0x1a5   : > { %v1585_v47 = vpop.f32.mrf.mxu1 }
 0x1bb   : > { %v1709_v36 = vpop.f32.mrf.mxu0 }
 0x1bc   : > { %v1710_v61 = vadd.f32 %v1709_v36, %v1573_v16 }
 0x1bd   : > { %v1711_v31 = vpop.f32.mrf.mxu0 }
 0x1c1   : > { %v1716_v53 = vpop.f32.mrf.mxu0 }
 0x1c2   : > { %v1717_v23 = vadd.f32 %v1716_v53, %v1584_v59 }
 0x1c3   : > { %v1718_v38 = vpop.f32.mrf.mxu0 }
 0x1c5   : > { %v1806_v20 = vpop.f32.mrf.mxu1 }
 0x1c6   : > { %v1807_v60 = vadd.f32 %v1806_v20, %v1710_v61 }
 0x1c7   : > { %v1808_v7 = vpop.f32.mrf.mxu1 }
 0x1cb   : > { %v1813_v5 = vpop.f32.mrf.mxu1 }
 0x1cc   : > { %v1814_v55 = vadd.f32 %v1813_v5, %v1717_v23 }
 0x1cd   : > { %v1815_v26 = vpop.f32.mrf.mxu1 }
 0x1e4   : > { %v1947_v40 = vpop.f32.mrf.mxu0 }
 0x1e6   : > { %v1949_v39 = vpop.f32.mrf.mxu0 }
 0x1ec   : > { %v2124_v21 = vpop.f32.mrf.mxu1 }
 0x1ed   : > { %v2125_v48 = vadd.f32 %v2124_v21, %v1947_v40 }
 0x1ee   : > { %v2126_v62 = vpop.f32.mrf.mxu1 }
 0x1f3   : > { %v2619_v33 = vpop.permute.xlu0 %2618 }
 0x205   : > { %v1962_v27 = vpop.f32.mrf.mxu0 }
 0x207   : > { %v1964_v35 = vpop.f32.mrf.mxu0 }
 0x20a   : > { %v2241_v22 = vpop.f32.mrf.mxu0 }
 0x20b   : > { %v2242_v2 = vadd.f32 %v2241_v22, %v2125_v48 }
 0x20c   : > { %v2243_v45 = vpop.f32.mrf.mxu0 }
 0x20e   : > { %v2131_v6 = vpop.f32.mrf.mxu1 }
 0x20f   : > { %v2132_v19 = vadd.f32 %v2131_v6, %v1962_v27 }
 0x210   : > { %v2133_v56 = vpop.f32.mrf.mxu1 }
 0x211   : > { %v2250_v12 = vpop.f32.mrf.mxu0 }
 0x212   : > { %v2251_v37 = vadd.f32 %v2250_v12, %v2132_v19 }
 0x213   : > { %v2252_v9 = vpop.f32.mrf.mxu0 }
 0x215   : > { %v2344_v51 = vpop.f32.mrf.mxu1 }
 0x216   : > { %v2345_v58 = vadd.f32 %v2344_v51, %v2242_v2 }
 0x217   : > { %v2346_v3 = vpop.f32.mrf.mxu1 }
 0x21b   : > { %v2355_v14 = vpop.f32.mrf.mxu1 }
 0x21c   : > { %v2356_v11 = vadd.f32 %v2355_v14, %v2251_v37 }
 0x21d   : > { %v2357_v24 = vpop.f32.mrf.mxu1 }
 0x233   : > { %v2481_v10 = vpop.f32.mrf.mxu0 }
 0x234   : > { %v2482_v17 = vadd.f32 %v2481_v10, %v2345_v58 }
 0x235   : > { %v2483_v49 = vpop.f32.mrf.mxu0 }
 0x237   : > { %v2488_v18 = vpop.f32.mrf.mxu0 }
 0x238   : > { %v2489_v30 = vadd.f32 %v2488_v18, %v2356_v11 }
 0x239   : > { %v2490_v46 = vpop.f32.mrf.mxu0 }
 0x23c   : > { %v2578_v63 = vpop.f32.mrf.mxu1 }
 0x23d   : > { %v2579_v41 = vadd.f32 %v2578_v63, %v2482_v17 }
 0x23e   : > { %v2580_v1 = vpop.f32.mrf.mxu1 }
 0x23f   : > { %v2589_v25 = vadd.f32 %v2579_v41, %v1807_v60 }
 0x240   : > { %v2585_v42 = vpop.f32.mrf.mxu1 }
 0x241   : > { %v2598_v43 = vmul.f32 %v2744_v44, %v2589_v25  ;;  %v2586_v32 = vadd.f32 %v2585_v42, %v2489_v30 }
 0x242   : > { %v2587_v50 = vpop.f32.mrf.mxu1 }
 0x243   : > { %v2590_v34 = vadd.f32 %v2586_v32, %v1814_v55  ;;  %v2607_v13 = vadd.f32 %v2745_v28, %v2598_v43 }
 0x245   : > { %v2599_v15 = vmul.f32 %v2744_v44, %v2590_v34  ;;  %vm2609_vm3 = vcmp.gt.f32.partialorder %v2607_v13, 0.0  ;;  %v2621_v57 = vmul.f32 %v2619_v33, %v2607_v13 }
 0x247   : > { %v2608_v29 = vadd.f32 %v2745_v28, %v2599_v15  ;;  %v2623_v0 = vsel %vm2609_vm3, %v2607_v13, %v2621_v57 }
 0x248   : > { %v2627_v8 = vadd.f32 %v2625_v54, %v2623_v0 }
 0x249   : > { %vm2610_vm4 = vcmp.gt.f32.partialorder %v2608_v29, 0.0  ;;  %v2622_v16 = vmul.f32 %v2619_v33, %v2608_v29 }
 0x24a   : > { %2629 = vst [vmem:[%s273_s10] sm:$0xff] %v2627_v8 }
 0x24b   : > { %v2624_v52 = vsel %vm2610_vm4, %v2608_v29, %v2622_v16 }
 0x24c   : > { %v2628_v59 = vadd.f32 %v2626_v4, %v2624_v52 }
 0x24e   : > { %2630 = vst [vmem:[%s273_s10 + $0x8] sm:$0xff] %v2628_v59 }
 0x24f PF: > { %s18_s23 = sadd.s32 1, %s2775_s23  }
 0x250   : > { %p15_p4 = scmp.ge.s32.totalorder %s18_s23, 4  }
 0x252   :  { %17 = sbr.rel (!%p15_p4) target bundleno = 3 (0x3), region = 79 }

// kernel: meta_res_forward.9
= control target key start
LH: loop header
LB: loop body
LE: loop exit
PB: predicated region body
PF: predicated region fallthrough
CT: control target
= control target key end

     0   :  { %s2689_s15 = smov 0   ;;  %s4281_s0 = inlined_call_operand.vmem [shape: f32[2,18,144], index: 0, kind: input, shape index: {}]   ;;  %s4282_s1 = inlined_call_operand.vmem [shape: f32[3,144,128], index: 1, kind: input, shape index: {}]   ;;  %s4283_s2 = inlined_call_operand.vmem [shape: f32[1,128], index: 2, kind: input, shape index: {}]   ;;  %s4284_s3 = inlined_call_operand.vmem [shape: f32[1,128], index: 3, kind: input, shape index: {}]   ;;  %s4285_s4 = inlined_call_operand.vmem [shape: f32[2,16,128], index: 4, kind: output, shape index: {}]  }
   0x1 LB: > { %s2590_s16 = sadd.s32 4294967295, %s2661_s15   ;;  %p2594_p0 = scmp.ge.s32.totalorder %s2661_s15, 1  ;;  %s2661_s15 = sphi %s2689_s15, %s14_s15  }
   0x2   : > { %p162_p1 = scmp.lt.s32.totalorder %s2661_s15, 3 }
   0x4   : > { %p163_p2 = pnand %p2594_p0, %p162_p1 }
   0x5   : > { %p2706_p3 = scmp.lt.s32.totalorder (!%p163_p2), %s2590_s16, 1 }
   0x6   : > { %166 = sbr.rel (%p163_p2) target bundleno = 584 (0x248), region = 36 }
   0xb   : > { %v2613_v0 = vld [vmem:[%s4282_s1 + $0x108] sm:$0xff]  ;;  %v2612_v1 = vld [vmem:[%s4282_s1 + $0x100] sm:$0xff]  ;;  %v2611_v2 = vld [vmem:[%s4282_s1 + $0xf8] sm:$0xff]  ;;  %v2663_v3 = vmov 0.0   ;;  %s4374_s16 = smov (!%p2706_p3, %s2590_s16), 1  ;;  %vm247_vm0 = vcmask 1046528  }
   0xc   : > { %265 = vmatprep.subr.mxu0 %v2663_v3  ;;  %v2711_v4 = vand.u32 4294901760, %v2613_v0  ;;  %v2713_v5 = vand.u32 4294901760, %v2612_v1  ;;  %v2715_v6 = vand.u32 4294901760, %v2611_v2  ;;  %v2610_v7 = vld [vmem:[%s4282_s1 + $0xf0] sm:$0xff]  ;;  %378 = vmatprep.subr.mxu1 %v2663_v3  ;;  %v2609_v8 = vld [vmem:[%s4282_s1 + $0xe8] sm:$0xff]  ;;  %v2608_v9 = vld [vmem:[%s4282_s1 + $0xe0] sm:$0xff] }
   0xd   : > { %v2727_v10 = vand.u32 4294901760, %v2610_v7  ;;  %v2729_v11 = vand.u32 4294901760, %v2609_v8  ;;  %v2731_v12 = vand.u32 4294901760, %v2608_v9  ;;  %v2607_v13 = vld [vmem:[%s4282_s1 + $0xd8] sm:$0xff]  ;;  %v2606_v14 = vld [vmem:[%s4282_s1 + $0xd0] sm:$0xff]  ;;  %v2605_v19 = vld [vmem:[%s4282_s1 + $0xc8] sm:$0xff] }
   0xe   : > { %267 = vmatpush1.msra.mxu0 %v2711_v4  ;;  %v2741_v15 = vsub.f32 %v2613_v0, %v2711_v4  ;;  %v2744_v16 = vsub.f32 %v2612_v1, %v2713_v5  ;;  %v2746_v17 = vand.u32 4294901760, %v2607_v13  ;;  %v2749_v18 = vsub.f32 %v2611_v2, %v2715_v6  ;;  %v2604_v26 = vld [vmem:[%s4282_s1 + $0xc0] sm:$0xff]  ;;  %s2639_s12 = smul.u32 48, %s4374_s16  ;;  %v2603_v36 = vld [vmem:[%s4282_s1 + $0xb8] sm:$0xff]  ;;  %v2602_v42 = vld [vmem:[%s4282_s1 + $0xb0] sm:$0xff] }
   0xf   : > { %268 = vmatprep.subr.mxu0 %v2663_v3  ;;  %v2760_v20 = vsub.f32 %v2610_v7, %v2727_v10  ;;  %v2763_v21 = vsub.f32 %v2609_v8, %v2729_v11  ;;  %v2769_v25 = vand.u32 4294901760, %v2606_v14  ;;  %v2776_v28 = vand.u32 4294901760, %v2605_v19  ;;  %v2601_v49 = vld [vmem:[%s4282_s1 + $0xa8] sm:$0xff]  ;;  %v2600_v53 = vld [vmem:[%s4282_s1 + $0xa0] sm:$0xff]  ;;  %v2599_v7 = vld [vmem:[%s4282_s1 + $0x98] sm:$0xff] }
  0x10   : > { %270 = vmatpush1.msra.mxu0 %v2713_v5  ;;  %v381_v22 = vand.u32 4294901760, %v2741_v15  ;;  %v388_v23 = vand.u32 4294901760, %v2744_v16  ;;  %v395_v24 = vand.u32 4294901760, %v2749_v18  ;;  %v2780_v30 = vsub.f32 %v2608_v9, %v2731_v12  ;;  %s2827_s21 = scalar_lea.vmem %s4281_s0, %s2639_s12  ;;  %s2638_s12 = sshll.u32 %s4374_s16, 4 }
  0x11   : > { %271 = vmatprep.subr.mxu0 %v2663_v3  ;;  %v4296_v27 = vand.u32 4294901760, %v2760_v20  ;;  %v4293_v29 = vand.u32 4294901760, %v2763_v21  ;;  %v2793_v34 = vsub.f32 %v2607_v13, %v2746_v17  ;;  %v2797_v35 = vand.u32 4294901760, %v2604_v26  ;;  %v2854_v57 = vld [vmem:[%s2827_s21 + $0x8] sm:$0xff]  ;;  %v2863_v61 = vld [vmem:[%s2827_s21 + $0x18] sm:$0xff]  ;;  %v2873_v0 = vld [vmem:[%s2827_s21] sm:$0xff]  ;;  %s197_s19 = scalar_lea.vmem %s4285_s4, %s2638_s12 }
  0x12   : > { %273 = vmatpush1.msra.mxu0 %v2715_v6  ;;  %v382_v31 = vsub.f32 %v2741_v15, %v381_v22  ;;  %v389_v32 = vsub.f32 %v2744_v16, %v388_v23  ;;  %v396_v33 = vsub.f32 %v2749_v18, %v395_v24  ;;  %v4292_v40 = vand.u32 4294901760, %v2780_v30  ;;  %v2885_v13 = vld [vmem:[%s2827_s21 + $0x10] sm:$0xff] }
  0x13   : > { %274 = vmatprep.subr.mxu0 %v2663_v3  ;;  %v403_v39 = vsub.f32 %v2760_v20, %v4296_v27  ;;  %v4290_v41 = vand.u32 4294901760, %v2793_v34  ;;  %v2813_v43 = vsub.f32 %v2606_v14, %v2769_v25  ;;  %v410_v45 = vsub.f32 %v2763_v21, %v4293_v29 }
  0x14   : > { %276 = vmatpush1.msra.mxu0 %v2727_v10  ;;  %v383_v37 = vand.u32 4294901760, %v382_v31  ;;  %v390_v38 = vand.u32 4294901760, %v389_v32  ;;  %v397_v44 = vand.u32 4294901760, %v396_v33  ;;  %v2819_v46 = vand.u32 4294901760, %v2603_v36  ;;  %v2598_v32 = vld [vmem:[%s4282_s1 + $0x90] sm:$0xff] }
  0x15   : > { %277 = vmatprep.subr.mxu0 %v2663_v3  ;;  %v2822_v47 = vsub.f32 %v2605_v19, %v2776_v28  ;;  %v4289_v48 = vand.u32 4294901760, %v2813_v43  ;;  %v404_v50 = vand.u32 4294901760, %v403_v39  ;;  %v417_v51 = vsub.f32 %v2780_v30, %v4292_v40 }
  0x16   : > { %279 = vmatpush1.msra.mxu0 %v2729_v11  ;;  %384 = vmatpush1.msra.mxu1 %v383_v37  ;;  %v2839_v52 = vand.u32 4294901760, %v2602_v42  ;;  %v2845_v54 = vsub.f32 %v2604_v26, %v2797_v35  ;;  %v424_v55 = vsub.f32 %v2793_v34, %v4290_v41  ;;  %v411_v58 = vand.u32 4294901760, %v410_v45 }
  0x17   : > { %280 = vmatprep.subr.mxu0 %v2663_v3  ;;  %385 = vmatprep.subr.mxu1 %v2663_v3  ;;  %v4288_v56 = vand.u32 4294901760, %v2822_v47  ;;  %v2857_v59 = vand.u32 4294901760, %v2601_v49  ;;  %v2860_v60 = vsub.f32 %v2603_v36, %v2819_v46  ;;  %v431_v62 = vsub.f32 %v2813_v43, %v4289_v48 }
  0x18   : > { %282 = vmatpush1.msra.mxu0 %v2731_v12  ;;  %391 = vmatpush1.msra.mxu1 %v390_v38  ;;  %v2870_v63 = vand.u32 4294901760, %v2600_v53  ;;  %v418_v1 = vand.u32 4294901760, %v417_v51  ;;  %v4286_v2 = vand.u32 4294901760, %v2845_v54  ;;  %v2881_v8 = vsub.f32 %v2602_v42, %v2839_v52 }
  0x19   : > { %283 = vmatprep.subr.mxu0 %v2663_v3  ;;  %392 = vmatprep.subr.mxu1 %v2663_v3  ;;  %v251_v9 = vrot.slane %v2854_v57, 1  ;;  %v425_v14 = vand.u32 4294901760, %v424_v55  ;;  %v438_v19 = vsub.f32 %v2822_v47, %v4288_v56  ;;  %v252_v26 = vrot.slane %v2863_v61, 1 }
  0x1a   : > { %285 = vmatpush1.msra.mxu0 %v2746_v17  ;;  %398 = vmatpush1.msra.mxu1 %v397_v44  ;;  %v4287_v31 = vand.u32 4294901760, %v2860_v60  ;;  %v2899_v33 = vsub.f32 %v2601_v49, %v2857_v59  ;;  %vm260_vm1 = vcmask 130048   ;;  %v248_v36 = vrot.slane %v2873_v0, 1  ;;  %v2615_v49 = vld [vmem:[%s4282_s1 + $0x118] sm:$0xff] }
  0x1b   : > { %286 = vmatprep.subr.mxu0 %v2663_v3  ;;  %399 = vmatprep.subr.mxu1 %v2663_v3  ;;  %v432_v37 = vand.u32 4294901760, %v431_v62  ;;  %v2904_v38 = vand.u32 4294901760, %v2599_v7  ;;  %v253_v39 = vsel %vm247_vm0, %v251_v9, %v252_v26  ;;  %v249_v42 = vrot.slane %v2885_v13, 1 }
  0x1c   : > { %288 = vmatpush1.msra.mxu0 %v2769_v25  ;;  %405 = vmatpush1.msra.mxu1 %v404_v50  ;;  %v445_v44 = vsub.f32 %v2845_v54, %v4286_v2  ;;  %v4291_v45 = vand.u32 4294901760, %v2881_v8  ;;  %v2919_v50 = vsub.f32 %v2600_v53, %v2870_v63  ;;  %v261_v51 = vsel %vm260_vm1, %v253_v39, 0  ;;  %v2614_v39 = vld [vmem:[%s4282_s1 + $0x110] sm:$0xff] }
  0x1d   : > { %289 = vmatprep.subr.mxu0 %v2663_v3  ;;  %406 = vmatprep.subr.mxu1 %v2663_v3  ;;  %v2924_v55 = vand.u32 4294901760, %v2598_v32  ;;  %v250_v62 = vsel %vm247_vm0, %v248_v36, %v249_v42  ;;  %v452_v53 = vsub.f32 %v2860_v60, %v4287_v31  ;;  %v4294_v9 = vand.u32 4294901760, %v2899_v33 }
  0x1e   : > { %291 = vmatpush1.msra.mxu0 %v2776_v28  ;;  %412 = vmatpush1.msra.mxu1 %v411_v58  ;;  %v2926_v58 = vand.u32 4294901760, %v261_v51  ;;  %v2939_v2 = vand.u32 4294901760, %v250_v62  ;;  %v2943_v36 = vand.u32 4294901760, %v2615_v49  ;;  %v446_v31 = vand.u32 4294901760, %v445_v44 }
  0x1f   : > { %292 = vmatprep.subr.mxu0 %v2663_v3  ;;  %413 = vmatprep.subr.mxu1 %v2663_v3  ;;  %v459_v56 = vsub.f32 %v2881_v8, %v4291_v45  ;;  %v4295_v48 = vand.u32 4294901760, %v2919_v50  ;;  %v453_v44 = vand.u32 4294901760, %v452_v53  ;;  %vm1760_vm2 = vcmask 1045504  }
  0x20   : > { %294 = vmatpush1.msra.mxu0 %v2797_v35  ;;  %419 = vmatpush1.msra.mxu1 %v418_v1  ;;  %v439_v1 = vand.u32 4294901760, %v438_v19  ;;  %v2949_v19 = vsub.f32 %v2599_v7, %v2904_v38  ;;  %v2957_v41 = vsub.f32 %v250_v62, %v2939_v2  ;;  %v466_v62 = vsub.f32 %v2899_v33, %v4294_v9 }
  0x21   : > { %295 = vmatprep.subr.mxu0 %v2663_v3  ;;  %420 = vmatprep.subr.mxu1 %v2663_v3  ;;  %v2976_v29 = vsub.f32 %v2615_v49, %v2943_v36 }
  0x22   : > { %297 = vmatpush1.msra.mxu0 %v2819_v46  ;;  %426 = vmatpush1.msra.mxu1 %v425_v14  ;;  %v2946_v14 = vsub.f32 %v261_v51, %v2926_v58  ;;  %v2961_v51 = vand.u32 4294901760, %v2614_v39  ;;  %v4297_v45 = vand.u32 4294901760, %v2957_v41  ;;  %v4298_v40 = vand.u32 4294901760, %v2949_v19 }
  0x23   : > { %298 = vmatprep.subr.mxu0 %v2663_v3  ;;  %427 = vmatprep.subr.mxu1 %v2663_v3  ;;  %v521_v27 = vand.u32 4294901760, %v2976_v29 }
  0x24   : > { %300 = vmatpush1.msra.mxu0 %v2839_v52  ;;  %433 = vmatpush1.msra.mxu1 %v432_v37  ;;  %v349_v7 = vand.u32 4294901760, %v2946_v14  ;;  %v2965_v37 = vsub.f32 %v2598_v32, %v2924_v55  ;;  %v460_v32 = vand.u32 4294901760, %v459_v56  ;;  %v2989_v49 = vsub.f32 %v2614_v39, %v2961_v51 }
  0x25   : > { %301 = vmatprep.subr.mxu0 %v2663_v3  ;;  %434 = vmatprep.subr.mxu1 %v2663_v3  ;;  %v467_v56 = vand.u32 4294901760, %v466_v62 }
  0x26   : > { %303 = vmatpush1.msra.mxu0 %v2857_v59  ;;  %440 = vmatpush1.msra.mxu1 %v439_v1  ;;  %v473_v1 = vsub.f32 %v2919_v50, %v4295_v48  ;;  %v350_v53 = vsub.f32 %v2946_v14, %v349_v7  ;;  %v486_v9 = vand.u32 4294901760, %v2965_v37  ;;  %v480_v48 = vsub.f32 %v2949_v19, %v4298_v40 }
  0x27   : > { %304 = vmatprep.subr.mxu0 %v2663_v3  ;;  %441 = vmatprep.subr.mxu1 %v2663_v3 }
  0x28   : > { %306 = vmatpush1.msra.mxu0 %v2870_v63  ;;  %447 = vmatpush1.msra.mxu1 %v446_v31  ;;  %v356_v31 = vsub.f32 %v2957_v41, %v4297_v45  ;;  %v474_v39 = vand.u32 4294901760, %v473_v1  ;;  %v487_v62 = vsub.f32 %v2965_v37, %v486_v9  ;;  %v528_v45 = vand.u32 4294901760, %v2989_v49 }
  0x29   : > { %307 = vmatprep.subr.mxu0 %v2663_v3  ;;  %448 = vmatprep.subr.mxu1 %v2663_v3  ;;  %v522_v1 = vsub.f32 %v2976_v29, %v521_v27 }
  0x2a   : > { %309 = vmatpush1.msra.mxu0 %v2904_v38  ;;  %454 = vmatpush1.msra.mxu1 %v453_v44  ;;  %v351_v44 = vand.u32 4294901760, %v350_v53  ;;  %v357_v40 = vand.u32 4294901760, %v356_v31  ;;  %v488_v53 = vand.u32 4294901760, %v487_v62  ;;  %v203_v31 = vld [vmem:[%s2827_s21 + $0x28] sm:$0x3] }
  0x2b   : > { %310 = vmatprep.subr.mxu0 %v2663_v3  ;;  %455 = vmatprep.subr.mxu1 %v2663_v3  ;;  %v202_v62 = vld [vmem:[%s2827_s21 + $0x20] sm:$0x3] }
  0x2c   : > { %312 = vmatpush1.msra.mxu0 %v2924_v55  ;;  %461 = vmatpush1.msra.mxu1 %v460_v32  ;;  %v481_v32 = vand.u32 4294901760, %v480_v48  ;;  %v523_v48 = vand.u32 4294901760, %v522_v1 }
  0x2d   : > { %341 = vmatprep.subr.mxu0 %v2663_v3  ;;  %462 = vmatprep.subr.mxu1 %v2663_v3 }
  0x2e   : > { %343 = vmatpush2.msra.mxu0 %v2943_v36  ;;  %468 = vmatpush1.msra.mxu1 %v467_v56  ;;  %v529_v56 = vsub.f32 %v2989_v49, %v528_v45 }
  0x2f   : > { %344 = vmatprep.subr.mxu0 %v2663_v3  ;;  %469 = vmatprep.subr.mxu1 %v2663_v3 }
  0x30   : > { %346 = vmatpush2.msra.mxu0 %v2961_v51  ;;  %475 = vmatpush1.msra.mxu1 %v474_v39  ;;  %v256_v39 = vrot.slane %v203_v31, 1 }
  0x31   : > { %352 = vmatprep.mubr.f32.mxu0 %v351_v44  ;;  %476 = vmatprep.subr.mxu1 %v2663_v3  ;;  %v530_v44 = vand.u32 4294901760, %v529_v56 }
  0x32   : > { %547 = vmatprep.subr.mxu0 %v2663_v3  ;;  %358 = vmatmul.mubr.f32.vlgmr.msra.gmra.mxu0 %v357_v40  ;;  %v257_v40 = vsel %vm247_vm0, %v252_v26, %v256_v39 }
  0x33   : > { %482 = vmatpush1.msra.mxu1 %v481_v32  ;;  %550 = vmatpush1.msra.mxu0 %v2741_v15  ;;  %v254_v32 = vrot.slane %v202_v62, 1  ;;  %v263_v1 = vsel %vm260_vm1, %v257_v40, 0  ;;  %v4330_v15 = vand.u32 4294901760, %v2760_v20 }
  0x34   : > { %483 = vmatprep.subr.mxu1 %v2663_v3  ;;  %551 = vmatprep.subr.mxu0 %v2663_v3 }
  0x35   : > { %489 = vmatpush1.msra.mxu1 %v488_v53  ;;  %554 = vmatpush1.msra.mxu0 %v2744_v16  ;;  %v255_v26 = vsel %vm247_vm0, %v249_v42, %v254_v32  ;;  %v3049_v53 = vand.u32 4294901760, %v263_v1  ;;  %v4331_v16 = vand.u32 4294901760, %v2957_v41 }
  0x36   : > { %518 = vmatprep.subr.mxu1 %v2663_v3  ;;  %555 = vmatprep.subr.mxu0 %v2663_v3  ;;  %v3053_v56 = vand.u32 4294901760, %v255_v26 }
  0x37   : > { %524 = vmatpush2.msra.mxu1 %v523_v48  ;;  %558 = vmatpush1.msra.mxu0 %v2749_v18  ;;  %v3062_v42 = vsub.f32 %v263_v1, %v3049_v53  ;;  %v4332_v18 = vand.u32 4294901760, %v2763_v21 }
  0x38   : > { %525 = vmatprep.subr.mxu1 %v2663_v3  ;;  %559 = vmatprep.subr.mxu0 %v2663_v3  ;;  %v3067_v31 = vsub.f32 %v255_v26, %v3053_v56 }
  0x39   : > { %531 = vmatpush2.msra.mxu1 %v530_v44  ;;  %533 = vmatprep.mubr.f32.mxu1 %v2926_v58  ;;  %v364_v48 = vand.u32 4294901760, %v3062_v42 }
  0x3a   : > { %562 = vmatpush1.msra.mxu0 %v2760_v20  ;;  %535 = vmatmul.mubr.f32.vlgmr.msra.gmra.mxu1 %v2939_v2  ;;  %v370_v39 = vand.u32 4294901760, %v3067_v31  ;;  %v4333_v20 = vand.u32 4294901760, %v2780_v30 }
  0x3b   : > { %563 = vmatprep.subr.mxu0 %v2663_v3  ;;  %666 = vmatprep.subr.mxu1 %v2663_v3  ;;  %v365_v44 = vsub.f32 %v3062_v42, %v364_v48 }
  0x3c   : > { %566 = vmatpush1.msra.mxu0 %v2763_v21  ;;  %668 = vmatpush1.msra.mxu1 %v2711_v4  ;;  %v371_v62 = vsub.f32 %v3067_v31, %v370_v39  ;;  %v4335_v21 = vand.u32 4294901760, %v2813_v43 }
  0x3d   : > { %567 = vmatprep.subr.mxu0 %v2663_v3  ;;  %669 = vmatprep.subr.mxu1 %v2663_v3  ;;  %v366_v40 = vand.u32 4294901760, %v365_v44 }
  0x3e   : > { %570 = vmatpush1.msra.mxu0 %v2780_v30  ;;  %671 = vmatpush1.msra.mxu1 %v2713_v5  ;;  %v372_v32 = vand.u32 4294901760, %v371_v62  ;;  %v217_v30 = vld [vmem:[%s4282_s1 + $0x68] sm:$0xff]  ;;  %v208_v62 = vld [vmem:[%s4282_s1 + $0x20] sm:$0xff] }
  0x3f   : > { %571 = vmatprep.subr.mxu0 %v2663_v3  ;;  %672 = vmatprep.subr.mxu1 %v2663_v3 }
  0x40   : > { %574 = vmatpush1.msra.mxu0 %v2793_v34  ;;  %674 = vmatpush1.msra.mxu1 %v2715_v6 }
  0x41   : > { %575 = vmatprep.subr.mxu0 %v2663_v3  ;;  %675 = vmatprep.subr.mxu1 %v2663_v3 }
  0x42   : > { %578 = vmatpush1.msra.mxu0 %v2813_v43  ;;  %677 = vmatpush1.msra.mxu1 %v2727_v10 }
  0x43   : > { %579 = vmatprep.subr.mxu0 %v2663_v3  ;;  %678 = vmatprep.subr.mxu1 %v2663_v3 }
  0x44   : > { %582 = vmatpush1.msra.mxu0 %v2822_v47  ;;  %680 = vmatpush1.msra.mxu1 %v2729_v11 }
  0x45   : > { %583 = vmatprep.subr.mxu0 %v2663_v3  ;;  %681 = vmatprep.subr.mxu1 %v2663_v3 }
  0x46   : > { %586 = vmatpush1.msra.mxu0 %v2845_v54  ;;  %683 = vmatpush1.msra.mxu1 %v2731_v12 }
  0x47   : > { %587 = vmatprep.subr.mxu0 %v2663_v3  ;;  %684 = vmatprep.subr.mxu1 %v2663_v3 }
  0x48   : > { %590 = vmatpush1.msra.mxu0 %v2860_v60  ;;  %686 = vmatpush1.msra.mxu1 %v2746_v17 }
  0x49   : > { %591 = vmatprep.subr.mxu0 %v2663_v3  ;;  %687 = vmatprep.subr.mxu1 %v2663_v3 }
  0x4a   : > { %594 = vmatpush1.msra.mxu0 %v2881_v8  ;;  %689 = vmatpush1.msra.mxu1 %v2769_v25 }
  0x4b   : > { %595 = vmatprep.subr.mxu0 %v2663_v3  ;;  %690 = vmatprep.subr.mxu1 %v2663_v3 }
  0x4c   : > { %598 = vmatpush1.msra.mxu0 %v2899_v33  ;;  %692 = vmatpush1.msra.mxu1 %v2776_v28 }
  0x4d   : > { %599 = vmatprep.subr.mxu0 %v2663_v3  ;;  %693 = vmatprep.subr.mxu1 %v2663_v3 }
  0x4e   : > { %602 = vmatpush1.msra.mxu0 %v2919_v50  ;;  %695 = vmatpush1.msra.mxu1 %v2797_v35 }
  0x4f   : > { %603 = vmatprep.subr.mxu0 %v2663_v3  ;;  %696 = vmatprep.subr.mxu1 %v2663_v3 }
  0x50   : > { %606 = vmatpush1.msra.mxu0 %v2949_v19  ;;  %698 = vmatpush1.msra.mxu1 %v2819_v46 }
  0x51   : > { %607 = vmatprep.subr.mxu0 %v2663_v3  ;;  %699 = vmatprep.subr.mxu1 %v2663_v3 }
  0x52   : > { %367 = vmatprep.mubr.f32.mxu0 %v366_v40  ;;  %610 = vmatpush1.msra.mxu0 %v2965_v37 }
  0x53   : > { %701 = vmatpush1.msra.mxu1 %v2839_v52  ;;  %373 = vmatmul.mubr.f32.gmra.mxu0 %v372_v32 }
  0x54   : > { %639 = vmatprep.subr.mxu0 %v2663_v3  ;;  %702 = vmatprep.subr.mxu1 %v2663_v3 }
  0x55   : > { %642 = vmatpush2.msra.mxu0 %v2976_v29  ;;  %704 = vmatpush1.msra.mxu1 %v2857_v59 }
  0x56   : > { %643 = vmatprep.subr.mxu0 %v2663_v3  ;;  %705 = vmatprep.subr.mxu1 %v2663_v3 }
  0x57   : > { %646 = vmatpush2.msra.mxu0 %v2989_v49  ;;  %649 = vmatprep.mubr.f32.mxu0 %v2946_v14  ;;  %v211_v14 = vld [vmem:[%s4282_s1 + $0x38] sm:$0xff] }
  0x58   : > { %707 = vmatpush1.msra.mxu1 %v2870_v63  ;;  %652 = vmatmul.mubr.f32.vlgmr.msra.gmra.mxu0 %v2957_v41  ;;  %v3233_v41 = vand.u32 4294901760, %v217_v30 }
  0x59   : > { %708 = vmatprep.subr.mxu1 %v2663_v3  ;;  %771 = vmatprep.subr.mxu0 %v2663_v3 }
  0x5a   : > { %710 = vmatpush1.msra.mxu1 %v2904_v38  ;;  %775 = vmatpush1.msra.mxu0 %v381_v22  ;;  %v4341_v22 = vand.u32 4294901760, %v2919_v50 }
  0x5b   : > { %540 = vmatprep.mubr.f32.mxu1 %v3049_v53  ;;  %711 = vmatprep.subr.mxu1 %v2663_v3 }
  0x5c   : > { %776 = vmatprep.subr.mxu0 %v2663_v3  ;;  %542 = vmatmul.mubr.f32.gmra.mxu1 %v3053_v56 }
  0x5d   : > { %713 = vmatpush1.msra.mxu1 %v2924_v55  ;;  %780 = vmatpush1.msra.mxu0 %v388_v23  ;;  %v218_v23 = vld [vmem:[%s4282_s1 + $0x70] sm:$0xff] }
  0x5e   : > { %658 = vmatprep.mubr.f32.mxu0 %v3062_v42  ;;  %742 = vmatprep.subr.mxu1 %v2663_v3  ;;  %v3319_v42 = vand.u32 4294901760, %v211_v14 }
  0x5f   : > { %781 = vmatprep.subr.mxu0 %v2663_v3  ;;  %661 = vmatmul.mubr.f32.gmra.mxu0 %v3067_v31 }
  0x60   : > { %744 = vmatpush2.msra.mxu1 %v2943_v36  ;;  %785 = vmatpush1.msra.mxu0 %v395_v24 }
  0x61   : > { %745 = vmatprep.subr.mxu1 %v2663_v3  ;;  %786 = vmatprep.subr.mxu0 %v2663_v3 }
  0x62   : > { %747 = vmatpush2.msra.mxu1 %v2961_v51  ;;  %751 = vmatprep.mubr.f32.mxu1 %v349_v7 }
  0x63   : > { %790 = vmatpush1.msra.mxu0 %v4330_v15  ;;  %755 = vmatmul.mubr.f32.vlgmr.msra.gmra.mxu1 %v4331_v16  ;;  %v3346_v15 = vsub.f32 %v211_v14, %v3319_v42 }
  0x64   : > { %791 = vmatprep.subr.mxu0 %v2663_v3  ;;  %904 = vmatprep.subr.mxu1 %v2663_v3 }
  0x65   : > { %795 = vmatpush1.msra.mxu0 %v4332_v18  ;;  %906 = vmatpush1.msra.mxu1 %v2711_v4  ;;  %v4334_v4 = vand.u32 4294901760, %v2793_v34 }
  0x66   : > { %796 = vmatprep.subr.mxu0 %v2663_v3  ;;  %907 = vmatprep.subr.mxu1 %v2663_v3 }
  0x67   : > { %762 = vmatprep.mubr.f32.mxu1 %v364_v48  ;;  %800 = vmatpush1.msra.mxu0 %v4333_v20  ;;  %v3355_v20 = vand.u32 4294901760, %v208_v62 }
  0x68   : > { %909 = vmatpush1.msra.mxu1 %v2713_v5  ;;  %801 = vmatprep.subr.mxu0 %v2663_v3  ;;  %v4336_v5 = vand.u32 4294901760, %v2822_v47  ;;  %v214_v47 = vld [vmem:[%s4282_s1 + $0x50] sm:$0xff] }
  0x69   : > { %766 = vmatmul.mubr.f32.gmra.mxu1 %v370_v39  ;;  %910 = vmatprep.subr.mxu1 %v2663_v3  ;;  %v209_v39 = vld [vmem:[%s4282_s1 + $0x28] sm:$0xff] }
  0x6a   : > { %805 = vmatpush1.msra.mxu0 %v4334_v4  ;;  %912 = vmatpush1.msra.mxu1 %v2715_v6  ;;  %v4337_v6 = vand.u32 4294901760, %v2845_v54  ;;  %v3351_v18 = vand.u32 4294901760, %v209_v39  ;;  %v207_v4 = vld [vmem:[%s4282_s1 + $0x18] sm:$0xff] }
  0x6b   : > { %806 = vmatprep.subr.mxu0 %v2663_v3  ;;  %913 = vmatprep.subr.mxu1 %v2663_v3 }
  0x6c   : > { %810 = vmatpush1.msra.mxu0 %v4335_v21  ;;  %915 = vmatpush1.msra.mxu1 %v2727_v10  ;;  %v4338_v10 = vand.u32 4294901760, %v2860_v60 }
  0x6d   : > { %811 = vmatprep.subr.mxu0 %v2663_v3  ;;  %916 = vmatprep.subr.mxu1 %v2663_v3 }
  0x6e   : > { %815 = vmatpush1.msra.mxu0 %v4336_v5  ;;  %918 = vmatpush1.msra.mxu1 %v2729_v11  ;;  %v4339_v11 = vand.u32 4294901760, %v2881_v8  ;;  %v3272_v8 = vand.u32 4294901760, %v214_v47 }
  0x6f   : > { %816 = vmatprep.subr.mxu0 %v2663_v3  ;;  %919 = vmatprep.subr.mxu1 %v2663_v3 }
  0x70   : > { %820 = vmatpush1.msra.mxu0 %v4337_v6  ;;  %921 = vmatpush1.msra.mxu1 %v2731_v12  ;;  %v4340_v12 = vand.u32 4294901760, %v2899_v33 }
  0x71   : > { %821 = vmatprep.subr.mxu0 %v2663_v3  ;;  %922 = vmatprep.subr.mxu1 %v2663_v3 }
  0x72   : > { %825 = vmatpush1.msra.mxu0 %v4338_v10  ;;  %924 = vmatpush1.msra.mxu1 %v2746_v17  ;;  %v219_v17 = vld [vmem:[%s4282_s1 + $0x78] sm:$0xff] }
  0x73   : > { %826 = vmatprep.subr.mxu0 %v2663_v3  ;;  %925 = vmatprep.subr.mxu1 %v2663_v3  ;;  %v3207_v24 = vand.u32 4294901760, %v219_v17 }
  0x74   : > { %830 = vmatpush1.msra.mxu0 %v4339_v11  ;;  %927 = vmatpush1.msra.mxu1 %v2769_v25  ;;  %v4342_v25 = vand.u32 4294901760, %v2949_v19  ;;  %v3301_v19 = vsub.f32 %v214_v47, %v3272_v8  ;;  %v1001_v11 = vsel %vm260_vm1, %v2854_v57, 0  ;;  %v3388_v57 = vsub.f32 %v208_v62, %v3355_v20 }
  0x75   : > { %831 = vmatprep.subr.mxu0 %v2663_v3  ;;  %928 = vmatprep.subr.mxu1 %v2663_v3  ;;  %v3225_v34 = vsub.f32 %v219_v17, %v3207_v24  ;;  %v3377_v17 = vsub.f32 %v209_v39, %v3351_v18  ;;  %v3398_v47 = vand.u32 4294901760, %v1001_v11 }
  0x76   : > { %835 = vmatpush1.msra.mxu0 %v4340_v12  ;;  %930 = vmatpush1.msra.mxu1 %v2776_v28  ;;  %v3214_v28 = vand.u32 4294901760, %v218_v23  ;;  %v4301_v62 = vand.u32 4294901760, %v3388_v57 }
  0x77   : > { %836 = vmatprep.subr.mxu0 %v2663_v3  ;;  %931 = vmatprep.subr.mxu1 %v2663_v3  ;;  %v1121_v29 = vand.u32 4294901760, %v3225_v34 }
  0x78   : > { %840 = vmatpush1.msra.mxu0 %v4341_v22  ;;  %933 = vmatpush1.msra.mxu1 %v2797_v35  ;;  %v216_v35 = vld [vmem:[%s4282_s1 + $0x60] sm:$0xff]  ;;  %v3238_v43 = vsub.f32 %v218_v23, %v3214_v28  ;;  %v3379_v22 = vand.u32 4294901760, %v207_v4  ;;  %v206_v23 = vld [vmem:[%s4282_s1 + $0x10] sm:$0xff] }
  0x79   : > { %841 = vmatprep.subr.mxu0 %v2663_v3  ;;  %934 = vmatprep.subr.mxu1 %v2663_v3  ;;  %v1122_v33 = vsub.f32 %v3225_v34, %v1121_v29 }
  0x7a   : > { %845 = vmatpush1.msra.mxu0 %v4342_v25  ;;  %936 = vmatpush1.msra.mxu1 %v2819_v46  ;;  %v215_v46 = vld [vmem:[%s4282_s1 + $0x58] sm:$0xff]  ;;  %v1128_v60 = vand.u32 4294901760, %v3238_v43 }
  0x7b   : > { %846 = vmatprep.subr.mxu0 %v2663_v3  ;;  %937 = vmatprep.subr.mxu1 %v2663_v3  ;;  %v3259_v54 = vand.u32 4294901760, %v215_v46  ;;  %v1123_v49 = vand.u32 4294901760, %v1122_v33 }
  0x7c   : > { %850 = vmatpush1.msra.mxu0 %v486_v9  ;;  %939 = vmatpush1.msra.mxu1 %v2839_v52  ;;  %v3257_v52 = vsub.f32 %v217_v30, %v3233_v41 }
  0x7d   : > { %879 = vmatprep.subr.mxu0 %v2663_v3  ;;  %940 = vmatprep.subr.mxu1 %v2663_v3  ;;  %v3287_v50 = vsub.f32 %v215_v46, %v3259_v54  ;;  %v205_v46 = vld [vmem:[%s4282_s1 + $0x8] sm:$0xff] }
  0x7e   : > { %883 = vmatpush2.msra.mxu0 %v521_v27  ;;  %942 = vmatpush1.msra.mxu1 %v2857_v59  ;;  %v3246_v27 = vand.u32 4294901760, %v216_v35  ;;  %v213_v59 = vld [vmem:[%s4282_s1 + $0x48] sm:$0xff]  ;;  %v1135_v9 = vand.u32 4294901760, %v3257_v52 }
  0x7f   : > { %884 = vmatprep.subr.mxu0 %v2663_v3  ;;  %943 = vmatprep.subr.mxu1 %v2663_v3  ;;  %v4308_v31 = vand.u32 4294901760, %v3287_v50 }
  0x80   : > { %888 = vmatpush2.msra.mxu0 %v528_v45  ;;  %890 = vmatprep.mubr.f32.mxu0 %v2926_v58  ;;  %v212_v45 = vld [vmem:[%s4282_s1 + $0x40] sm:$0xff]  ;;  %v1136_v26 = vsub.f32 %v3257_v52, %v1135_v9 }
  0x81   : > { %945 = vmatpush1.msra.mxu1 %v2870_v63  ;;  %892 = vmatmul.mubr.f32.vlgmr.msra.gmra.mxu0 %v2939_v2  ;;  %v3270_v63 = vsub.f32 %v216_v35, %v3246_v27  ;;  %v3303_v7 = vand.u32 4294901760, %v212_v45  ;;  %v1150_v16 = vsub.f32 %v3287_v50, %v4308_v31 }
  0x82   : > { %946 = vmatprep.subr.mxu1 %v2663_v3  ;;  %1005 = vmatprep.subr.mxu0 %v2663_v3  ;;  %v1137_v32 = vand.u32 4294901760, %v1136_v26  ;;  %v1003_v26 = vsel %vm260_vm1, %v2863_v61, 0 }
  0x83   : > { %948 = vmatpush1.msra.mxu1 %v2904_v38  ;;  %1007 = vmatpush1.msra.mxu0 %v3207_v24  ;;  %v3279_v38 = vand.u32 4294901760, %v213_v59  ;;  %v4310_v37 = vand.u32 4294901760, %v3270_v63  ;;  %v1151_v12 = vand.u32 4294901760, %v1150_v16 }
  0x84   : > { %949 = vmatprep.subr.mxu1 %v2663_v3  ;;  %1008 = vmatprep.subr.mxu0 %v2663_v3 }
  0x85   : > { %897 = vmatprep.mubr.f32.mxu0 %v3049_v53  ;;  %951 = vmatpush1.msra.mxu1 %v2924_v55  ;;  %v1129_v55 = vsub.f32 %v3238_v43, %v1128_v60  ;;  %v3309_v1 = vsub.f32 %v213_v59, %v3279_v38  ;;  %v3401_v59 = vand.u32 4294901760, %v2873_v0 }
  0x86   : > { %1010 = vmatpush1.msra.mxu0 %v3214_v28  ;;  %980 = vmatprep.subr.mxu1 %v2663_v3 }
  0x87   : > { %899 = vmatmul.mubr.f32.gmra.mxu0 %v3053_v56  ;;  %1011 = vmatprep.subr.mxu0 %v2663_v3  ;;  %v1130_v48 = vand.u32 4294901760, %v1129_v55  ;;  %v4305_v40 = vand.u32 4294901760, %v3309_v1  ;;  %v3409_v55 = vsub.f32 %v207_v4, %v3379_v22  ;;  %v221_v4 = vld [vmem:[%s4282_s1 + $0x88] sm:$0xff] }
  0x88   : > { %982 = vmatpush2.msra.mxu1 %v2943_v36  ;;  %1013 = vmatpush1.msra.mxu0 %v3233_v41  ;;  %v210_v36 = vld [vmem:[%s4282_s1 + $0x30] sm:$0xff] }
  0x89   : > { %983 = vmatprep.subr.mxu1 %v2663_v3  ;;  %1014 = vmatprep.subr.mxu0 %v2663_v3  ;;  %v3335_v44 = vand.u32 4294901760, %v210_v36  ;;  %v1164_v10 = vsub.f32 %v3309_v1, %v4305_v40 }
  0x8a   : > { %985 = vmatpush2.msra.mxu1 %v2961_v51  ;;  %987 = vmatprep.mubr.f32.mxu1 %v2926_v58  ;;  %v3330_v58 = vsub.f32 %v212_v45, %v3303_v7  ;;  %v1143_v51 = vsub.f32 %v3270_v63, %v4310_v37  ;;  %v3405_v45 = vand.u32 4294901760, %v206_v23 }
  0x8b   : > { %1016 = vmatpush1.msra.mxu0 %v3246_v27  ;;  %989 = vmatmul.mubr.f32.vlgmr.msra.gmra.mxu1 %v2939_v2  ;;  %v4306_v2 = vand.u32 4294901760, %v3301_v19  ;;  %v3362_v5 = vsub.f32 %v210_v36, %v3335_v44  ;;  %v1165_v33 = vand.u32 4294901760, %v1164_v10  ;;  %v204_v36 = vld [vmem:[%s4282_s1] sm:$0xff] }
  0x8c   : > { %1017 = vmatprep.subr.mxu0 %v2663_v3  ;;  %1118 = vmatprep.subr.mxu1 %v2663_v3  ;;  %v1144_v21 = vand.u32 4294901760, %v1143_v51  ;;  %v3435_v61 = vsub.f32 %v206_v23, %v3405_v45  ;;  %v3437_v16 = vand.u32 4294901760, %v204_v36 }
  0x8d   : > { %1019 = vmatpush1.msra.mxu0 %v3259_v54  ;;  %1124 = vmatpush1.msra.mxu1 %v1123_v49  ;;  %v1157_v6 = vsub.f32 %v3301_v19, %v4306_v2  ;;  %v4300_v35 = vand.u32 4294901760, %v3362_v5  ;;  %v4299_v49 = vand.u32 4294901760, %v3377_v17 }
  0x8e   : > { %1020 = vmatprep.subr.mxu0 %v2663_v3  ;;  %1125 = vmatprep.subr.mxu1 %v2663_v3 }
  0x8f   : > { %994 = vmatprep.mubr.f32.mxu1 %v3049_v53  ;;  %1022 = vmatpush1.msra.mxu0 %v3272_v8  ;;  %v4303_v53 = vand.u32 4294901760, %v3330_v58  ;;  %v1158_v25 = vand.u32 4294901760, %v1157_v6  ;;  %v1185_v51 = vsub.f32 %v3362_v5, %v4300_v35  ;;  %v3446_v6 = vand.u32 4294901760, %v1003_v26 }
  0x90   : > { %1131 = vmatpush1.msra.mxu1 %v1130_v48  ;;  %1023 = vmatprep.subr.mxu0 %v2663_v3  ;;  %v3422_v48 = vand.u32 4294901760, %v205_v46  ;;  %v4307_v35 = vand.u32 4294901760, %v3435_v61 }
  0x91   : > { %996 = vmatmul.mubr.f32.gmra.mxu1 %v3053_v56  ;;  %1132 = vmatprep.subr.mxu1 %v2663_v3  ;;  %v4302_v56 = vand.u32 4294901760, %v3346_v15  ;;  %v1171_v30 = vsub.f32 %v3330_v58, %v4303_v53 }
  0x92   : > { %1025 = vmatpush1.msra.mxu0 %v3279_v38  ;;  %1138 = vmatpush1.msra.mxu1 %v1137_v32  ;;  %v3430_v32 = vsub.f32 %v1001_v11, %v3398_v47  ;;  %v1192_v11 = vsub.f32 %v3377_v17, %v4299_v49  ;;  %v3456_v23 = vsub.f32 %v205_v46, %v3422_v48 }
  0x93   : > { %1026 = vmatprep.subr.mxu0 %v2663_v3  ;;  %1139 = vmatprep.subr.mxu1 %v2663_v3  ;;  %v1178_v14 = vsub.f32 %v3346_v15, %v4302_v56  ;;  %v1172_v39 = vand.u32 4294901760, %v1171_v30  ;;  %v1186_v30 = vand.u32 4294901760, %v1185_v51  ;;  %v3474_v49 = vsub.f32 %v204_v36, %v3437_v16 }
  0x94   : > { %1028 = vmatpush1.msra.mxu0 %v3303_v7  ;;  %1145 = vmatpush1.msra.mxu1 %v1144_v21  ;;  %v3444_v21 = vsub.f32 %v2873_v0, %v3401_v59  ;;  %v220_v0 = vld [vmem:[%s4282_s1 + $0x80] sm:$0xff]  ;;  %v1089_v46 = vand.u32 4294901760, %v3430_v32  ;;  %v3479_v51 = vsub.f32 %v1003_v26, %v3446_v6  ;;  %v4311_v36 = vand.u32 4294901760, %v3456_v23 }
  0x95   : > { %1029 = vmatprep.subr.mxu0 %v2663_v3  ;;  %1146 = vmatprep.subr.mxu1 %v2663_v3  ;;  %v1179_v10 = vand.u32 4294901760, %v1178_v14  ;;  %v3468_v14 = vand.u32 4294901760, %v221_v4  ;;  %v3485_v53 = vand.u32 4294901760, %v220_v0 }
  0x96   : > { %1031 = vmatpush1.msra.mxu0 %v3319_v42  ;;  %1152 = vmatpush1.msra.mxu1 %v1151_v12  ;;  %v4304_v12 = vand.u32 4294901760, %v3409_v55 }
  0x97   : > { %1032 = vmatprep.subr.mxu0 %v2663_v3  ;;  %1153 = vmatprep.subr.mxu1 %v2663_v3  ;;  %v3513_v2 = vsub.f32 %v220_v0, %v3485_v53 }
  0x98   : > { %1034 = vmatpush1.msra.mxu0 %v3335_v44  ;;  %1159 = vmatpush1.msra.mxu1 %v1158_v25  ;;  %v3462_v25 = vand.u32 4294901760, %v2885_v13  ;;  %v1206_v56 = vsub.f32 %v3409_v55, %v4304_v12  ;;  %v1090_v12 = vsub.f32 %v3430_v32, %v1089_v46 }
  0x99   : > { %1035 = vmatprep.subr.mxu0 %v2663_v3  ;;  %1160 = vmatprep.subr.mxu1 %v2663_v3 }
  0x9a   : > { %1037 = vmatpush1.msra.mxu0 %v3351_v18  ;;  %1166 = vmatpush1.msra.mxu1 %v1165_v33  ;;  %v1199_v33 = vsub.f32 %v3388_v57, %v4301_v62  ;;  %v1193_v62 = vand.u32 4294901760, %v1192_v11  ;;  %v3492_v26 = vsub.f32 %v2885_v13, %v3462_v25  ;;  %v3496_v11 = vsub.f32 %v221_v4, %v3468_v14 }
  0x9b   : > { %1038 = vmatprep.subr.mxu0 %v2663_v3  ;;  %1167 = vmatprep.subr.mxu1 %v2663_v3  ;;  %v1213_v13 = vsub.f32 %v3435_v61, %v4307_v35  ;;  %v4312_v4 = vand.u32 4294901760, %v3474_v49  ;;  %v1207_v40 = vand.u32 4294901760, %v1206_v56  ;;  %v1220_v35 = vsub.f32 %v3456_v23, %v4311_v36 }
  0x9c   : > { %1040 = vmatpush1.msra.mxu0 %v3355_v20  ;;  %1173 = vmatpush1.msra.mxu1 %v1172_v39  ;;  %v4309_v39 = vand.u32 4294901760, %v3444_v21  ;;  %v1110_v31 = vand.u32 4294901760, %v3492_v26 }
  0x9d   : > { %1041 = vmatprep.subr.mxu0 %v2663_v3  ;;  %1174 = vmatprep.subr.mxu1 %v2663_v3  ;;  %v1214_v56 = vand.u32 4294901760, %v1213_v13  ;;  %v1227_v36 = vsub.f32 %v3474_v49, %v4312_v4 }
  0x9e   : > { %1043 = vmatpush1.msra.mxu0 %v3379_v22  ;;  %1180 = vmatpush1.msra.mxu1 %v1179_v10  ;;  %v1200_v10 = vand.u32 4294901760, %v1199_v33  ;;  %v1104_v33 = vand.u32 4294901760, %v3479_v51  ;;  %v1111_v13 = vsub.f32 %v3492_v26, %v1110_v31 }
  0x9f   : > { %1044 = vmatprep.subr.mxu0 %v2663_v3  ;;  %1181 = vmatprep.subr.mxu1 %v2663_v3  ;;  %v1228_v4 = vand.u32 4294901760, %v1227_v36 }
  0xa0   : > { %1046 = vmatpush1.msra.mxu0 %v3405_v45  ;;  %1187 = vmatpush1.msra.mxu1 %v1186_v30  ;;  %v1096_v30 = vsub.f32 %v3444_v21, %v4309_v39  ;;  %v1091_v39 = vand.u32 4294901760, %v1090_v12  ;;  %v1105_v37 = vsub.f32 %v3479_v51, %v1104_v33  ;;  %v1268_v12 = vand.u32 4294901760, %v3513_v2 }
  0xa1   : > { %1047 = vmatprep.subr.mxu0 %v2663_v3  ;;  %1188 = vmatprep.subr.mxu1 %v2663_v3 }
  0xa2   : > { %1049 = vmatpush1.msra.mxu0 %v3422_v48  ;;  %1194 = vmatpush1.msra.mxu1 %v1193_v62  ;;  %v1261_v62 = vand.u32 4294901760, %v3496_v11  ;;  %v1097_v0 = vand.u32 4294901760, %v1096_v30 }
  0xa3   : > { %1050 = vmatprep.subr.mxu0 %v2663_v3  ;;  %1195 = vmatprep.subr.mxu1 %v2663_v3 }
  0xa4   : > { %1052 = vmatpush1.msra.mxu0 %v3437_v16  ;;  %1201 = vmatpush1.msra.mxu1 %v1200_v10  ;;  %v1221_v10 = vand.u32 4294901760, %v1220_v35  ;;  %v1262_v30 = vsub.f32 %v3496_v11, %v1261_v62  ;;  %v1269_v35 = vsub.f32 %v3513_v2, %v1268_v12 }
  0xa5   : > { %1081 = vmatprep.subr.mxu0 %v2663_v3  ;;  %1202 = vmatprep.subr.mxu1 %v2663_v3 }
  0xa6   : > { %1083 = vmatpush2.msra.mxu0 %v3468_v14  ;;  %1208 = vmatpush1.msra.mxu1 %v1207_v40  ;;  %v1106_v40 = vand.u32 4294901760, %v1105_v37  ;;  %v1270_v37 = vand.u32 4294901760, %v1269_v35 }
  0xa7   : > { %1084 = vmatprep.subr.mxu0 %v2663_v3  ;;  %1209 = vmatprep.subr.mxu1 %v2663_v3 }
  0xa8   : > { %1086 = vmatpush2.msra.mxu0 %v3485_v53  ;;  %1092 = vmatprep.mubr.f32.mxu0 %v1091_v39  ;;  %v1112_v39 = vand.u32 4294901760, %v1111_v13 }
  0xa9   : > { %1215 = vmatpush1.msra.mxu1 %v1214_v56  ;;  %1098 = vmatmul.mubr.f32.vlgmr.msra.gmra.mxu0 %v1097_v0  ;;  %v1263_v56 = vand.u32 4294901760, %v1262_v30 }
  0xaa   : > { %1216 = vmatprep.subr.mxu1 %v2663_v3  ;;  %1287 = vmatprep.subr.mxu0 %v2663_v3 }
  0xab   : > { %1222 = vmatpush1.msra.mxu1 %v1221_v10  ;;  %1290 = vmatpush1.msra.mxu0 %v3225_v34  ;;  %v4343_v34 = vand.u32 4294901760, %v3270_v63 }
  0xac   : > { %1223 = vmatprep.subr.mxu1 %v2663_v3  ;;  %1291 = vmatprep.subr.mxu0 %v2663_v3 }
  0xad   : > { %1107 = vmatprep.mubr.f32.mxu0 %v1106_v40  ;;  %1229 = vmatpush1.msra.mxu1 %v1228_v4  ;;  %v2623_v4 = vld [vmem:[%s4282_s1 + $0x158] sm:$0xff] }
  0xae   : > { %1294 = vmatpush1.msra.mxu0 %v3238_v43  ;;  %1258 = vmatprep.subr.mxu1 %v2663_v3  ;;  %v4344_v43 = vand.u32 4294901760, %v3444_v21  ;;  %v3822_v40 = vand.u32 4294901760, %v2623_v4 }
  0xaf   : > { %1113 = vmatmul.mubr.f32.gmra.mxu0 %v1112_v39  ;;  %1295 = vmatprep.subr.mxu0 %v2663_v3 }
  0xb0   : > { %1264 = vmatpush2.msra.mxu1 %v1263_v56  ;;  %1298 = vmatpush1.msra.mxu0 %v3257_v52  ;;  %v4346_v52 = vand.u32 4294901760, %v3301_v19  ;;  %v2621_v56 = vld [vmem:[%s4282_s1 + $0x148] sm:$0xff] }
  0xb1   : > { %1265 = vmatprep.subr.mxu1 %v2663_v3  ;;  %1299 = vmatprep.subr.mxu0 %v2663_v3 }
  0xb2   : > { %1271 = vmatpush2.msra.mxu1 %v1270_v37  ;;  %1273 = vmatprep.mubr.f32.mxu1 %v3398_v47 }
  0xb3   : > { %1302 = vmatpush1.msra.mxu0 %v3270_v63  ;;  %1275 = vmatmul.mubr.f32.vlgmr.msra.gmra.mxu1 %v3401_v59  ;;  %v4353_v63 = vand.u32 4294901760, %v3409_v55 }
  0xb4   : > { %1303 = vmatprep.subr.mxu0 %v2663_v3  ;;  %1406 = vmatprep.subr.mxu1 %v2663_v3 }
  0xb5   : > { %1306 = vmatpush1.msra.mxu0 %v3287_v50  ;;  %1408 = vmatpush1.msra.mxu1 %v3207_v24 }
  0xb6   : > { %1307 = vmatprep.subr.mxu0 %v2663_v3  ;;  %1409 = vmatprep.subr.mxu1 %v2663_v3 }
  0xb7   : > { %1280 = vmatprep.mubr.f32.mxu1 %v3446_v6  ;;  %1310 = vmatpush1.msra.mxu0 %v3301_v19  ;;  %v4355_v19 = vand.u32 4294901760, %v3456_v23 }
  0xb8   : > { %1411 = vmatpush1.msra.mxu1 %v3214_v28  ;;  %1311 = vmatprep.subr.mxu0 %v2663_v3 }
  0xb9   : > { %1282 = vmatmul.mubr.f32.gmra.mxu1 %v3462_v25  ;;  %1412 = vmatprep.subr.mxu1 %v2663_v3 }
  0xba   : > { %1314 = vmatpush1.msra.mxu0 %v3309_v1  ;;  %1414 = vmatpush1.msra.mxu1 %v3233_v41 }
  0xbb   : > { %1315 = vmatprep.subr.mxu0 %v2663_v3  ;;  %1415 = vmatprep.subr.mxu1 %v2663_v3 }
  0xbc   : > { %1318 = vmatpush1.msra.mxu0 %v3330_v58  ;;  %1417 = vmatpush1.msra.mxu1 %v3246_v27 }
  0xbd   : > { %1319 = vmatprep.subr.mxu0 %v2663_v3  ;;  %1418 = vmatprep.subr.mxu1 %v2663_v3 }
  0xbe   : > { %1322 = vmatpush1.msra.mxu0 %v3346_v15  ;;  %1420 = vmatpush1.msra.mxu1 %v3259_v54 }
  0xbf   : > { %1323 = vmatprep.subr.mxu0 %v2663_v3  ;;  %1421 = vmatprep.subr.mxu1 %v2663_v3 }
  0xc0   : > { %1326 = vmatpush1.msra.mxu0 %v3362_v5  ;;  %1423 = vmatpush1.msra.mxu1 %v3272_v8 }
  0xc1   : > { %1327 = vmatprep.subr.mxu0 %v2663_v3  ;;  %1424 = vmatprep.subr.mxu1 %v2663_v3 }
  0xc2   : > { %1330 = vmatpush1.msra.mxu0 %v3377_v17  ;;  %1426 = vmatpush1.msra.mxu1 %v3279_v38 }
  0xc3   : > { %1331 = vmatprep.subr.mxu0 %v2663_v3  ;;  %1427 = vmatprep.subr.mxu1 %v2663_v3 }
  0xc4   : > { %1334 = vmatpush1.msra.mxu0 %v3388_v57  ;;  %1429 = vmatpush1.msra.mxu1 %v3303_v7 }
  0xc5   : > { %1335 = vmatprep.subr.mxu0 %v2663_v3  ;;  %1430 = vmatprep.subr.mxu1 %v2663_v3 }
  0xc6   : > { %1338 = vmatpush1.msra.mxu0 %v3409_v55  ;;  %1432 = vmatpush1.msra.mxu1 %v3319_v42 }
  0xc7   : > { %1339 = vmatprep.subr.mxu0 %v2663_v3  ;;  %1433 = vmatprep.subr.mxu1 %v2663_v3 }
  0xc8   : > { %1342 = vmatpush1.msra.mxu0 %v3435_v61  ;;  %1435 = vmatpush1.msra.mxu1 %v3335_v44 }
  0xc9   : > { %1343 = vmatprep.subr.mxu0 %v2663_v3  ;;  %1436 = vmatprep.subr.mxu1 %v2663_v3 }
  0xca   : > { %1346 = vmatpush1.msra.mxu0 %v3456_v23  ;;  %1438 = vmatpush1.msra.mxu1 %v3351_v18 }
  0xcb   : > { %1347 = vmatprep.subr.mxu0 %v2663_v3  ;;  %1439 = vmatprep.subr.mxu1 %v2663_v3 }
  0xcc   : > { %1350 = vmatpush1.msra.mxu0 %v3474_v49  ;;  %1441 = vmatpush1.msra.mxu1 %v3355_v20 }
  0xcd   : > { %1379 = vmatprep.subr.mxu0 %v2663_v3  ;;  %1442 = vmatprep.subr.mxu1 %v2663_v3 }
  0xce   : > { %1382 = vmatpush2.msra.mxu0 %v3496_v11  ;;  %1444 = vmatpush1.msra.mxu1 %v3379_v22 }
  0xcf   : > { %1383 = vmatprep.subr.mxu0 %v2663_v3  ;;  %1445 = vmatprep.subr.mxu1 %v2663_v3 }
  0xd0   : > { %1386 = vmatpush2.msra.mxu0 %v3513_v2  ;;  %1389 = vmatprep.mubr.f32.mxu0 %v3430_v32 }
  0xd1   : > { %1447 = vmatpush1.msra.mxu1 %v3405_v45  ;;  %1392 = vmatmul.mubr.f32.vlgmr.msra.gmra.mxu0 %v3444_v21 }
  0xd2   : > { %1448 = vmatprep.subr.mxu1 %v2663_v3  ;;  %1511 = vmatprep.subr.mxu0 %v2663_v3 }
  0xd3   : > { %1450 = vmatpush1.msra.mxu1 %v3422_v48  ;;  %1515 = vmatpush1.msra.mxu0 %v1121_v29  ;;  %v4345_v29 = vand.u32 4294901760, %v3287_v50  ;;  %v2630_v50 = vld [vmem:[%s4282_s1 + $0x190] sm:$0xff] }
  0xd4   : > { %1451 = vmatprep.subr.mxu1 %v2663_v3  ;;  %1516 = vmatprep.subr.mxu0 %v2663_v3 }
  0xd5   : > { %1398 = vmatprep.mubr.f32.mxu0 %v3479_v51  ;;  %1453 = vmatpush1.msra.mxu1 %v3437_v16 }
  0xd6   : > { %1520 = vmatpush1.msra.mxu0 %v1128_v60  ;;  %1482 = vmatprep.subr.mxu1 %v2663_v3  ;;  %v4348_v60 = vand.u32 4294901760, %v3330_v58 }
  0xd7   : > { %1401 = vmatmul.mubr.f32.gmra.mxu0 %v3492_v26  ;;  %1521 = vmatprep.subr.mxu0 %v2663_v3  ;;  %v2624_v26 = vld [vmem:[%s4282_s1 + $0x160] sm:$0xff] }
  0xd8   : > { %1484 = vmatpush2.msra.mxu1 %v3468_v14  ;;  %1525 = vmatpush1.msra.mxu0 %v1135_v9 }
  0xd9   : > { %1485 = vmatprep.subr.mxu1 %v2663_v3  ;;  %1526 = vmatprep.subr.mxu0 %v2663_v3 }
  0xda   : > { %1487 = vmatpush2.msra.mxu1 %v3485_v53  ;;  %1491 = vmatprep.mubr.f32.mxu1 %v1089_v46 }
  0xdb   : > { %1530 = vmatpush1.msra.mxu0 %v4343_v34  ;;  %1495 = vmatmul.mubr.f32.vlgmr.msra.gmra.mxu1 %v4344_v43 }
  0xdc   : > { %1531 = vmatprep.subr.mxu0 %v2663_v3  ;;  %1644 = vmatprep.subr.mxu1 %v2663_v3 }
  0xdd   : > { %1535 = vmatpush1.msra.mxu0 %v4345_v29  ;;  %1646 = vmatpush1.msra.mxu1 %v3207_v24  ;;  %v4347_v24 = vand.u32 4294901760, %v3309_v1  ;;  %v3714_v1 = vand.u32 4294901760, %v2630_v50 }
  0xde   : > { %1536 = vmatprep.subr.mxu0 %v2663_v3  ;;  %1647 = vmatprep.subr.mxu1 %v2663_v3 }
  0xdf   : > { %1502 = vmatprep.mubr.f32.mxu1 %v1104_v33  ;;  %1540 = vmatpush1.msra.mxu0 %v4346_v52 }
  0xe0   : > { %1649 = vmatpush1.msra.mxu1 %v3214_v28  ;;  %1541 = vmatprep.subr.mxu0 %v2663_v3  ;;  %v4349_v28 = vand.u32 4294901760, %v3346_v15  ;;  %v2628_v15 = vld [vmem:[%s4282_s1 + $0x180] sm:$0xff] }
  0xe1   : > { %1506 = vmatmul.mubr.f32.gmra.mxu1 %v1110_v31  ;;  %1650 = vmatprep.subr.mxu1 %v2663_v3  ;;  %v4356_v31 = vand.u32 4294901760, %v3474_v49  ;;  %v2625_v49 = vld [vmem:[%s4282_s1 + $0x168] sm:$0xff] }
  0xe2   : > { %1545 = vmatpush1.msra.mxu0 %v4347_v24  ;;  %1652 = vmatpush1.msra.mxu1 %v3233_v41  ;;  %v4350_v41 = vand.u32 4294901760, %v3362_v5  ;;  %v3741_v5 = vsub.f32 %v2630_v50, %v3714_v1  ;;  %v3784_v36 = vand.u32 4294901760, %v2625_v49 }
  0xe3   : > { %1546 = vmatprep.subr.mxu0 %v2663_v3  ;;  %1653 = vmatprep.subr.mxu1 %v2663_v3 }
  0xe4   : > { %1550 = vmatpush1.msra.mxu0 %v4348_v60  ;;  %1655 = vmatpush1.msra.mxu1 %v3246_v27  ;;  %v4351_v27 = vand.u32 4294901760, %v3377_v17  ;;  %v3746_v17 = vand.u32 4294901760, %v2628_v15  ;;  %v3811_v10 = vsub.f32 %v2625_v49, %v3784_v36  ;;  %v2620_v60 = vld [vmem:[%s4282_s1 + $0x140] sm:$0xff] }
  0xe5   : > { %1551 = vmatprep.subr.mxu0 %v2663_v3  ;;  %1656 = vmatprep.subr.mxu1 %v2663_v3 }
  0xe6   : > { %1555 = vmatpush1.msra.mxu0 %v4349_v28  ;;  %1658 = vmatpush1.msra.mxu1 %v3259_v54  ;;  %v4352_v54 = vand.u32 4294901760, %v3388_v57  ;;  %v3774_v23 = vsub.f32 %v2628_v15, %v3746_v17  ;;  %v4317_v24 = vand.u32 4294901760, %v3811_v10 }
  0xe7   : > { %1556 = vmatprep.subr.mxu0 %v2663_v3  ;;  %1659 = vmatprep.subr.mxu1 %v2663_v3 }
  0xe8   : > { %1560 = vmatpush1.msra.mxu0 %v4350_v41  ;;  %1661 = vmatpush1.msra.mxu1 %v3272_v8  ;;  %v2631_v8 = vld [vmem:[%s4282_s1 + $0x198] sm:$0xff]  ;;  %v4322_v0 = vand.u32 4294901760, %v3774_v23  ;;  %v3856_v41 = vsub.f32 %v2623_v4, %v3822_v40 }
  0xe9   : > { %1561 = vmatprep.subr.mxu0 %v2663_v3  ;;  %1662 = vmatprep.subr.mxu1 %v2663_v3  ;;  %v3707_v9 = vand.u32 4294901760, %v2631_v8 }
  0xea   : > { %1565 = vmatpush1.msra.mxu0 %v4351_v27  ;;  %1664 = vmatpush1.msra.mxu1 %v3279_v38  ;;  %v4354_v38 = vand.u32 4294901760, %v3435_v61  ;;  %v4328_v61 = vand.u32 4294901760, %v3741_v5  ;;  %v3858_v27 = vand.u32 4294901760, %v2621_v56 }
  0xeb   : > { %1566 = vmatprep.subr.mxu0 %v2663_v3  ;;  %1665 = vmatprep.subr.mxu1 %v2663_v3 }
  0xec   : > { %1570 = vmatpush1.msra.mxu0 %v4352_v54  ;;  %1667 = vmatpush1.msra.mxu1 %v3303_v7  ;;  %v1901_v33 = vsub.f32 %v3741_v5, %v4328_v61  ;;  %v3893_v49 = vsub.f32 %v2621_v56, %v3858_v27 }
  0xed   : > { %1571 = vmatprep.subr.mxu0 %v2663_v3  ;;  %1668 = vmatprep.subr.mxu1 %v2663_v3 }
  0xee   : > { %1575 = vmatpush1.msra.mxu0 %v4353_v63  ;;  %1670 = vmatpush1.msra.mxu1 %v3319_v42  ;;  %v2629_v42 = vld [vmem:[%s4282_s1 + $0x188] sm:$0xff]  ;;  %v1902_v35 = vand.u32 4294901760, %v1901_v33  ;;  %v2619_v63 = vld [vmem:[%s4282_s1 + $0x138] sm:$0xff] }
  0xef   : > { %1576 = vmatprep.subr.mxu0 %v2663_v3  ;;  %1671 = vmatprep.subr.mxu1 %v2663_v3 }
  0xf0   : > { %1580 = vmatpush1.msra.mxu0 %v4354_v38  ;;  %1673 = vmatpush1.msra.mxu1 %v3335_v44  ;;  %v3725_v44 = vsub.f32 %v2631_v8, %v3707_v9  ;;  %v2651_v38 = vld [vmem:[%s2827_s21] sm:$0xff] }
  0xf1   : > { %1581 = vmatprep.subr.mxu0 %v2663_v3  ;;  %1674 = vmatprep.subr.mxu1 %v2663_v3  ;;  %v1761_v50 = vrot.slane %v2651_v38, 2 }
  0xf2   : > { %1585 = vmatpush1.msra.mxu0 %v4355_v19  ;;  %1676 = vmatpush1.msra.mxu1 %v3351_v18  ;;  %v359_v7 = vpop.f32.mrf.mxu0  ;;  %v3733_v18 = vand.u32 4294901760, %v2629_v42  ;;  %v1893_v55 = vand.u32 4294901760, %v3725_v44  ;;  %v3873_v19 = vld [vmem:[%s2827_s21 + $0x10] sm:$0xff] }
  0xf3   : > { %1586 = vmatprep.subr.mxu0 %v2663_v3  ;;  %1677 = vmatprep.subr.mxu1 %v2663_v3 }
  0xf4   : > { %1590 = vmatpush1.msra.mxu0 %v4356_v31  ;;  %1679 = vmatpush1.msra.mxu1 %v3355_v20  ;;  %v361_v58 = vpop.f32.mrf.mxu0  ;;  %v2627_v20 = vld [vmem:[%s4282_s1 + $0x178] sm:$0xff]  ;;  %v3759_v2 = vsub.f32 %v2629_v42, %v3733_v18  ;;  %v1894_v51 = vsub.f32 %v3725_v44, %v1893_v55  ;;  %v3880_v31 = vand.u32 4294901760, %v2620_v60 }
  0xf5   : > { %1619 = vmatprep.subr.mxu0 %v2663_v3  ;;  %1680 = vmatprep.subr.mxu1 %v2663_v3  ;;  %v3753_v57 = vand.u32 4294901760, %v2627_v20 }
  0xf6   : > { %1623 = vmatpush2.msra.mxu0 %v1261_v62  ;;  %1682 = vmatpush1.msra.mxu1 %v3379_v22  ;;  %v2626_v22 = vld [vmem:[%s4282_s1 + $0x170] sm:$0xff]  ;;  %v4324_v11 = vand.u32 4294901760, %v3759_v2  ;;  %v3805_v62 = vand.u32 4294901760, %v2624_v26  ;;  %v3906_v33 = vsub.f32 %v2620_v60, %v3880_v31 }
  0xf7   : > { %1624 = vmatprep.subr.mxu0 %v2663_v3  ;;  %1683 = vmatprep.subr.mxu1 %v2663_v3 }
  0xf8   : > { %1628 = vmatpush2.msra.mxu0 %v1268_v12  ;;  %1630 = vmatprep.mubr.f32.mxu0 %v3398_v47  ;;  %v1895_v12 = vand.u32 4294901760, %v1894_v51  ;;  %v1908_v30 = vsub.f32 %v3759_v2, %v4324_v11  ;;  %v3838_v43 = vsub.f32 %v2624_v26, %v3805_v62  ;;  %v4319_v38 = vand.u32 4294901760, %v3906_v33 }
  0xf9   : > { %1685 = vmatpush1.msra.mxu1 %v3405_v45  ;;  %1632 = vmatmul.mubr.f32.vlgmr.msra.gmra.mxu0 %v3401_v59  ;;  %v3766_v45 = vand.u32 4294901760, %v2626_v22 }
  0xfa   : > { %1686 = vmatprep.subr.mxu1 %v2663_v3  ;;  %1777 = vmatprep.subr.mxu0 %v2663_v3  ;;  %v536_v32 = vpop.f32.mrf.mxu1  ;;  %v1909_v28 = vand.u32 4294901760, %v1908_v30  ;;  %v4316_v58 = vand.u32 4294901760, %v3838_v43  ;;  %v2617_v30 = vld [vmem:[%s4282_s1 + $0x128] sm:$0xff] }
  0xfb   : > { %1688 = vmatpush1.msra.mxu1 %v3422_v48  ;;  %1779 = vmatpush1.msra.mxu0 %v3707_v9  ;;  %v3769_v21 = vadd.f32 %v536_v32, %v359_v7  ;;  %v3779_v48 = vsub.f32 %v2627_v20, %v3753_v57  ;;  %v1936_v20 = vsub.f32 %v3811_v10, %v4317_v24  ;;  %v3895_v32 = vand.u32 4294901760, %v2619_v63 }
  0xfc   : > { %1689 = vmatprep.subr.mxu1 %v2663_v3  ;;  %1780 = vmatprep.subr.mxu0 %v2663_v3  ;;  %v538_v46 = vpop.f32.mrf.mxu1  ;;  %v1943_v4 = vsub.f32 %v3838_v43, %v4316_v58 }
  0xfd   : > { %1637 = vmatprep.mubr.f32.mxu0 %v3446_v6  ;;  %1691 = vmatpush1.msra.mxu1 %v3437_v16  ;;  %v3795_v16 = vsub.f32 %v2626_v22, %v3766_v45  ;;  %v4320_v13 = vand.u32 4294901760, %v3779_v48  ;;  %v2618_v22 = vld [vmem:[%s4282_s1 + $0x130] sm:$0xff] }
  0xfe   : > { %1782 = vmatpush1.msra.mxu0 %v3714_v1  ;;  %1720 = vmatprep.subr.mxu1 %v2663_v3 }
  0xff   : > { %1639 = vmatmul.mubr.f32.gmra.mxu0 %v3462_v25  ;;  %1783 = vmatprep.subr.mxu0 %v2663_v3  ;;  %v4318_v39 = vand.u32 4294901760, %v3795_v16  ;;  %v1922_v52 = vsub.f32 %v3779_v48, %v4320_v13 }
 0x100   : > { %1722 = vmatpush2.msra.mxu1 %v3468_v14  ;;  %1785 = vmatpush1.msra.mxu0 %v3733_v18  ;;  %v2622_v14 = vld [vmem:[%s4282_s1 + $0x150] sm:$0xff] }
 0x101   : > { %1723 = vmatprep.subr.mxu1 %v2663_v3  ;;  %1786 = vmatprep.subr.mxu0 %v2663_v3  ;;  %v3843_v29 = vand.u32 4294901760, %v2622_v14  ;;  %v1929_v54 = vsub.f32 %v3795_v16, %v4318_v39  ;;  %v1923_v15 = vand.u32 4294901760, %v1922_v52  ;;  %v2616_v52 = vld [vmem:[%s4282_s1 + $0x120] sm:$0xff] }
 0x102   : > { %1725 = vmatpush2.msra.mxu1 %v3485_v53  ;;  %1727 = vmatprep.mubr.f32.mxu1 %v3398_v47  ;;  %v2649_v53 = vld [vmem:[%s2827_s21 + $0x8] sm:$0xff]  ;;  %v3832_v47 = vld [vmem:[%s2827_s21 + $0x18] sm:$0xff] }
 0x103   : > { %1788 = vmatpush1.msra.mxu0 %v3746_v17  ;;  %1729 = vmatmul.mubr.f32.vlgmr.msra.gmra.mxu1 %v3401_v59  ;;  %v1764_v37 = vrot.slane %v2649_v53, 2  ;;  %v1765_v34 = vrot.slane %v3832_v47, 2  ;;  %v1915_v59 = vsub.f32 %v3774_v23, %v4322_v0  ;;  %v3878_v42 = vsub.f32 %v2622_v14, %v3843_v29 }
 0x104   : > { %1789 = vmatprep.subr.mxu0 %v2663_v3  ;;  %1890 = vmatprep.subr.mxu1 %v2663_v3  ;;  %v1930_v51 = vand.u32 4294901760, %v1929_v54  ;;  %v3923_v53 = vsub.f32 %v2619_v63, %v3895_v32  ;;  %v1944_v54 = vand.u32 4294901760, %v1943_v4  ;;  %v2632_v4 = vld [vmem:[%s4282_s1 + $0x1a0] sm:$0xff] }
 0x105   : > { %1791 = vmatpush1.msra.mxu0 %v3753_v57  ;;  %1896 = vmatpush1.msra.mxu1 %v1895_v12  ;;  %v1766_v8 = vsel %vm1760_vm2, %v1764_v37, %v1765_v34  ;;  %v1916_v7 = vand.u32 4294901760, %v1915_v59  ;;  %v3911_v12 = vand.u32 4294901760, %v2618_v22  ;;  %v4313_v14 = vand.u32 4294901760, %v3878_v42 }
 0x106   : > { %1792 = vmatprep.subr.mxu0 %v2663_v3  ;;  %1897 = vmatprep.subr.mxu1 %v2663_v3  ;;  %v1773_v46 = vsel %vm260_vm1, %v1766_v8, 0  ;;  %v4314_v59 = vand.u32 4294901760, %v3893_v49  ;;  %v3984_v58 = vand.u32 4294901760, %v2632_v4 }
 0x107   : > { %1734 = vmatprep.mubr.f32.mxu1 %v3446_v6  ;;  %1794 = vmatpush1.msra.mxu0 %v3766_v45  ;;  %v1762_v6 = vrot.slane %v3873_v19, 2  ;;  %v3919_v56 = vand.u32 4294901760, %v1773_v46  ;;  %v3940_v63 = vsub.f32 %v2618_v22, %v3911_v12  ;;  %v1957_v8 = vsub.f32 %v3878_v42, %v4313_v14 }
 0x108   : > { %1903 = vmatpush1.msra.mxu1 %v1902_v35  ;;  %1795 = vmatprep.subr.mxu0 %v2663_v3  ;;  %v1937_v35 = vand.u32 4294901760, %v1936_v20  ;;  %v1964_v22 = vsub.f32 %v3893_v49, %v4314_v59 }
 0x109   : > { %1736 = vmatmul.mubr.f32.gmra.mxu1 %v3462_v25  ;;  %1904 = vmatprep.subr.mxu1 %v2663_v3  ;;  %v4315_v25 = vand.u32 4294901760, %v3856_v41  ;;  %v1763_v26 = vsel %vm1760_vm2, %v1761_v50, %v1762_v6  ;;  %v2633_v50 = vld [vmem:[%s4282_s1 + $0x1a8] sm:$0xff]  ;;  %v1958_v59 = vand.u32 4294901760, %v1957_v8 }
 0x10a   : > { %1797 = vmatpush1.msra.mxu0 %v3784_v36  ;;  %1910 = vmatpush1.msra.mxu1 %v1909_v28  ;;  %v3932_v60 = vand.u32 4294901760, %v1763_v26  ;;  %v3936_v28 = vand.u32 4294901760, %v2617_v30 }
 0x10b   : > { %1798 = vmatprep.subr.mxu0 %v2663_v3  ;;  %1911 = vmatprep.subr.mxu1 %v2663_v3  ;;  %v1950_v37 = vsub.f32 %v3856_v41, %v4315_v25  ;;  %v1971_v25 = vsub.f32 %v3906_v33, %v4319_v38 }
 0x10c   : > { %1800 = vmatpush1.msra.mxu0 %v3805_v62  ;;  %1917 = vmatpush1.msra.mxu1 %v1916_v7  ;;  %v3951_v7 = vand.u32 4294901760, %v2616_v52  ;;  %v3965_v14 = vsub.f32 %v1763_v26, %v3932_v60  ;;  %v4323_v26 = vand.u32 4294901760, %v3940_v63 }
 0x10d   : > { %1801 = vmatprep.subr.mxu0 %v2663_v3  ;;  %1918 = vmatprep.subr.mxu1 %v2663_v3  ;;  %v1951_v20 = vand.u32 4294901760, %v1950_v37 }
 0x10e   : > { %1803 = vmatpush1.msra.mxu0 %v3822_v40  ;;  %1924 = vmatpush1.msra.mxu1 %v1923_v15  ;;  %v3954_v15 = vsub.f32 %v1773_v46, %v3919_v56  ;;  %v3970_v46 = vsub.f32 %v2617_v30, %v3936_v28  ;;  %v3982_v30 = vsub.f32 %v2616_v52, %v3951_v7  ;;  %v4326_v38 = vand.u32 4294901760, %v3965_v14 }
 0x10f   : > { %1804 = vmatprep.subr.mxu0 %v2663_v3  ;;  %1925 = vmatprep.subr.mxu1 %v2663_v3 }
 0x110   : > { %1806 = vmatpush1.msra.mxu0 %v3843_v29  ;;  %1931 = vmatpush1.msra.mxu1 %v1930_v51  ;;  %v4321_v51 = vand.u32 4294901760, %v3923_v53  ;;  %v4325_v24 = vand.u32 4294901760, %v3954_v15  ;;  %v4327_v13 = vand.u32 4294901760, %v3970_v46  ;;  %v1998_v0 = vand.u32 4294901760, %v3982_v30 }
 0x111   : > { %1807 = vmatprep.subr.mxu0 %v2663_v3  ;;  %1932 = vmatprep.subr.mxu1 %v2663_v3 }
 0x112   : > { %1809 = vmatpush1.msra.mxu0 %v3858_v27  ;;  %1938 = vmatpush1.msra.mxu1 %v1937_v35  ;;  %v3972_v35 = vand.u32 4294901760, %v2633_v50  ;;  %v1978_v8 = vsub.f32 %v3923_v53, %v4321_v51  ;;  %v4005_v51 = vsub.f32 %v2632_v4, %v3984_v58  ;;  %v1992_v4 = vsub.f32 %v3970_v46, %v4327_v13 }
 0x113   : > { %1810 = vmatprep.subr.mxu0 %v2663_v3  ;;  %1939 = vmatprep.subr.mxu1 %v2663_v3  ;;  %v374_v37 = vpop.f32.mrf.mxu0 }
 0x114   : > { %1812 = vmatpush1.msra.mxu0 %v3880_v31  ;;  %1945 = vmatpush1.msra.mxu1 %v1944_v54  ;;  %v1965_v54 = vand.u32 4294901760, %v1964_v22  ;;  %v3995_v52 = vsub.f32 %v2633_v50, %v3972_v35  ;;  %v1862_v50 = vsub.f32 %v3954_v15, %v4325_v24 }
 0x115   : > { %1813 = vmatprep.subr.mxu0 %v2663_v3  ;;  %1946 = vmatprep.subr.mxu1 %v2663_v3  ;;  %v376_v39 = vpop.f32.mrf.mxu0 }
 0x116   : > { %1815 = vmatpush1.msra.mxu0 %v3895_v32  ;;  %1952 = vmatpush1.msra.mxu1 %v1951_v20  ;;  %v1972_v39 = vand.u32 4294901760, %v1971_v25  ;;  %v1985_v20 = vsub.f32 %v3940_v63, %v4323_v26  ;;  %v1868_v26 = vsub.f32 %v3965_v14, %v4326_v38  ;;  %v2033_v24 = vand.u32 4294901760, %v3995_v52 }
 0x117   : > { %1816 = vmatprep.subr.mxu0 %v2663_v3  ;;  %1953 = vmatprep.subr.mxu1 %v2663_v3 }
 0x118   : > { %1818 = vmatpush1.msra.mxu0 %v3911_v12  ;;  %1959 = vmatpush1.msra.mxu1 %v1958_v59  ;;  %v653_v22 = vpop.f32.mrf.mxu0  ;;  %v1979_v59 = vand.u32 4294901760, %v1978_v8  ;;  %v1999_v8 = vsub.f32 %v3982_v30, %v1998_v0  ;;  %v1869_v13 = vand.u32 4294901760, %v1868_v26 }
 0x119   : > { %1819 = vmatprep.subr.mxu0 %v2663_v3  ;;  %1960 = vmatprep.subr.mxu1 %v2663_v3  ;;  %v654_v25 = vadd.f32 %v653_v22, %v3769_v21  ;;  %v1986_v21 = vand.u32 4294901760, %v1985_v20  ;;  %v2040_v22 = vand.u32 4294901760, %v4005_v51  ;;  %v2034_v20 = vsub.f32 %v3995_v52, %v2033_v24 }
 0x11a   : > { %1821 = vmatpush1.msra.mxu0 %v3936_v28  ;;  %1966 = vmatpush1.msra.mxu1 %v1965_v54  ;;  %v655_v11 = vpop.f32.mrf.mxu0  ;;  %v2000_v26 = vand.u32 4294901760, %v1999_v8 }
 0x11b   : > { %1822 = vmatprep.subr.mxu0 %v2663_v3  ;;  %1967 = vmatprep.subr.mxu1 %v2663_v3  ;;  %v1863_v11 = vand.u32 4294901760, %v1862_v50 }
 0x11c   : > { %1824 = vmatpush1.msra.mxu0 %v3951_v7  ;;  %1973 = vmatpush1.msra.mxu1 %v1972_v39  ;;  %v543_v54 = vpop.f32.mrf.mxu1  ;;  %v1993_v39 = vand.u32 4294901760, %v1992_v4  ;;  %v2035_v4 = vand.u32 4294901760, %v2034_v20 }
 0x11d   : > { %1853 = vmatprep.subr.mxu0 %v2663_v3  ;;  %1974 = vmatprep.subr.mxu1 %v2663_v3  ;;  %v544_v38 = vadd.f32 %v543_v54, %v374_v37 }
 0x11e   : > { %1855 = vmatpush2.msra.mxu0 %v3972_v35  ;;  %1980 = vmatpush1.msra.mxu1 %v1979_v59  ;;  %v545_v61 = vpop.f32.mrf.mxu1 }
 0x11f   : > { %1856 = vmatprep.subr.mxu0 %v2663_v3  ;;  %1981 = vmatprep.subr.mxu1 %v2663_v3  ;;  %v662_v50 = vpop.f32.mrf.mxu0  ;;  %v2041_v61 = vsub.f32 %v4005_v51, %v2040_v22 }
 0x120   : > { %1858 = vmatpush2.msra.mxu0 %v3984_v58  ;;  %1987 = vmatpush1.msra.mxu1 %v1986_v21  ;;  %v663_v37 = vadd.f32 %v662_v50, %v544_v38  ;;  %v2653_v21 = vld [vmem:[%s2827_s21 + $0x28] sm:$0x3] }
 0x121   : > { %1864 = vmatprep.mubr.f32.mxu0 %v1863_v11  ;;  %1988 = vmatprep.subr.mxu1 %v2663_v3  ;;  %v664_v59 = vpop.f32.mrf.mxu0  ;;  %v1769_v11 = vrot.slane %v2653_v21, 2  ;;  %v2042_v8 = vand.u32 4294901760, %v2041_v61 }
 0x122   : > { %2059 = vmatprep.subr.mxu0 %v2663_v3  ;;  %1870 = vmatmul.mubr.f32.vlgmr.msra.gmra.mxu0 %v1869_v13 }
 0x123   : > { %1994 = vmatpush1.msra.mxu1 %v1993_v39  ;;  %2062 = vmatpush1.msra.mxu0 %v3725_v44  ;;  %v756_v54 = vpop.f32.mrf.mxu1  ;;  %v1770_v13 = vsel %vm1760_vm2, %v1765_v34, %v1769_v11  ;;  %v4358_v44 = vand.u32 4294901760, %v3759_v2 }
 0x124   : > { %1995 = vmatprep.subr.mxu1 %v2663_v3  ;;  %2063 = vmatprep.subr.mxu0 %v2663_v3  ;;  %v4044_v38 = vadd.f32 %v756_v54, %v654_v25  ;;  %v2654_v25 = vld [vmem:[%s2827_s21 + $0x20] sm:$0x3]  ;;  %v1775_v47 = vsel %vm260_vm1, %v1770_v13, 0 }
 0x125   : > { %2001 = vmatpush1.msra.mxu1 %v2000_v26  ;;  %2066 = vmatpush1.msra.mxu0 %v3741_v5  ;;  %v758_v50 = vpop.f32.mrf.mxu1  ;;  %v1767_v39 = vrot.slane %v2654_v25, 2 }
 0x126   : > { %2030 = vmatprep.subr.mxu1 %v2663_v3  ;;  %2067 = vmatprep.subr.mxu0 %v2663_v3 }
 0x127   : > { %2036 = vmatpush2.msra.mxu1 %v2035_v4  ;;  %2070 = vmatpush1.msra.mxu0 %v3759_v2  ;;  %v1768_v34 = vsel %vm1760_vm2, %v1762_v6, %v1767_v39 }
 0x128   : > { %2037 = vmatprep.subr.mxu1 %v2663_v3  ;;  %2071 = vmatprep.subr.mxu0 %v2663_v3  ;;  %v4078_v59 = vand.u32 4294901760, %v1768_v34 }
 0x129   : > { %2043 = vmatpush2.msra.mxu1 %v2042_v8  ;;  %2045 = vmatprep.mubr.f32.mxu1 %v3919_v56  ;;  %v767_v20 = vpop.f32.mrf.mxu1 }
 0x12a   : > { %2074 = vmatpush1.msra.mxu0 %v3774_v23  ;;  %2047 = vmatmul.mubr.f32.vlgmr.msra.gmra.mxu1 %v3932_v60  ;;  %v4060_v26 = vadd.f32 %v767_v20, %v663_v37  ;;  %v4074_v37 = vand.u32 4294901760, %v1775_v47  ;;  %v4092_v6 = vsub.f32 %v1768_v34, %v4078_v59  ;;  %v4357_v34 = vand.u32 4294901760, %v3741_v5 }
 0x12b   : > { %2075 = vmatprep.subr.mxu0 %v2663_v3  ;;  %2178 = vmatprep.subr.mxu1 %v2663_v3  ;;  %v769_v61 = vpop.f32.mrf.mxu1 }
 0x12c   : > { %2078 = vmatpush1.msra.mxu0 %v3779_v48  ;;  %2180 = vmatpush1.msra.mxu1 %v3707_v9  ;;  %v4087_v19 = vsub.f32 %v1775_v47, %v4074_v37  ;;  %v1882_v54 = vand.u32 4294901760, %v4092_v6 }
 0x12d   : > { %2079 = vmatprep.subr.mxu0 %v2663_v3  ;;  %2181 = vmatprep.subr.mxu1 %v2663_v3 }
 0x12e   : > { %2082 = vmatpush1.msra.mxu0 %v3795_v16  ;;  %2183 = vmatpush1.msra.mxu1 %v3714_v1  ;;  %v1876_v4 = vand.u32 4294901760, %v4087_v19  ;;  %v1883_v11 = vsub.f32 %v4092_v6, %v1882_v54 }
 0x12f   : > { %2083 = vmatprep.subr.mxu0 %v2663_v3  ;;  %2184 = vmatprep.subr.mxu1 %v2663_v3 }
 0x130   : > { %2086 = vmatpush1.msra.mxu0 %v3811_v10  ;;  %2186 = vmatpush1.msra.mxu1 %v3733_v18  ;;  %v1877_v21 = vsub.f32 %v4087_v19, %v1876_v4  ;;  %v1884_v50 = vand.u32 4294901760, %v1883_v11 }
 0x131   : > { %2087 = vmatprep.subr.mxu0 %v2663_v3  ;;  %2187 = vmatprep.subr.mxu1 %v2663_v3 }
 0x132   : > { %2090 = vmatpush1.msra.mxu0 %v3838_v43  ;;  %2189 = vmatpush1.msra.mxu1 %v3746_v17  ;;  %v1878_v8 = vand.u32 4294901760, %v1877_v21 }
 0x133   : > { %2091 = vmatprep.subr.mxu0 %v2663_v3  ;;  %2190 = vmatprep.subr.mxu1 %v2663_v3 }
 0x134   : > { %2094 = vmatpush1.msra.mxu0 %v3856_v41  ;;  %2192 = vmatpush1.msra.mxu1 %v3753_v57 }
 0x135   : > { %2095 = vmatprep.subr.mxu0 %v2663_v3  ;;  %2193 = vmatprep.subr.mxu1 %v2663_v3 }
 0x136   : > { %2098 = vmatpush1.msra.mxu0 %v3878_v42  ;;  %2195 = vmatpush1.msra.mxu1 %v3766_v45 }
 0x137   : > { %2099 = vmatprep.subr.mxu0 %v2663_v3  ;;  %2196 = vmatprep.subr.mxu1 %v2663_v3 }
 0x138   : > { %2102 = vmatpush1.msra.mxu0 %v3893_v49  ;;  %2198 = vmatpush1.msra.mxu1 %v3784_v36 }
 0x139   : > { %2103 = vmatprep.subr.mxu0 %v2663_v3  ;;  %2199 = vmatprep.subr.mxu1 %v2663_v3 }
 0x13a   : > { %2106 = vmatpush1.msra.mxu0 %v3906_v33  ;;  %2201 = vmatpush1.msra.mxu1 %v3805_v62 }
 0x13b   : > { %2107 = vmatprep.subr.mxu0 %v2663_v3  ;;  %2202 = vmatprep.subr.mxu1 %v2663_v3 }
 0x13c   : > { %2110 = vmatpush1.msra.mxu0 %v3923_v53  ;;  %2204 = vmatpush1.msra.mxu1 %v3822_v40 }
 0x13d   : > { %2111 = vmatprep.subr.mxu0 %v2663_v3  ;;  %2205 = vmatprep.subr.mxu1 %v2663_v3 }
 0x13e   : > { %2114 = vmatpush1.msra.mxu0 %v3940_v63  ;;  %2207 = vmatpush1.msra.mxu1 %v3843_v29 }
 0x13f   : > { %2115 = vmatprep.subr.mxu0 %v2663_v3  ;;  %2208 = vmatprep.subr.mxu1 %v2663_v3 }
 0x140   : > { %2118 = vmatpush1.msra.mxu0 %v3970_v46  ;;  %2210 = vmatpush1.msra.mxu1 %v3858_v27 }
 0x141   : > { %2119 = vmatprep.subr.mxu0 %v2663_v3  ;;  %2211 = vmatprep.subr.mxu1 %v2663_v3  ;;  %v893_v13 = vpop.f32.mrf.mxu0 }
 0x142   : > { %1879 = vmatprep.mubr.f32.mxu0 %v1878_v8  ;;  %2122 = vmatpush1.msra.mxu0 %v3982_v30  ;;  %v894_v25 = vadd.f32 %v893_v13, %v4044_v38  ;;  %v4360_v8 = vand.u32 4294901760, %v3774_v23  ;;  %v4362_v13 = vand.u32 4294901760, %v3779_v48  ;;  %v4363_v23 = vand.u32 4294901760, %v3795_v16 }
 0x143   : > { %2213 = vmatpush1.msra.mxu1 %v3880_v31  ;;  %1885 = vmatmul.mubr.f32.gmra.mxu0 %v1884_v50  ;;  %v895_v39 = vpop.f32.mrf.mxu0  ;;  %v4361_v50 = vand.u32 4294901760, %v3965_v14  ;;  %v4365_v48 = vand.u32 4294901760, %v3838_v43 }
 0x144   : > { %2151 = vmatprep.subr.mxu0 %v2663_v3  ;;  %2214 = vmatprep.subr.mxu1 %v2663_v3 }
 0x145   : > { %2154 = vmatpush2.msra.mxu0 %v3995_v52  ;;  %2216 = vmatpush1.msra.mxu1 %v3895_v32 }
 0x146   : > { %2155 = vmatprep.subr.mxu0 %v2663_v3  ;;  %2217 = vmatprep.subr.mxu1 %v2663_v3 }
 0x147   : > { %2158 = vmatpush2.msra.mxu0 %v4005_v51  ;;  %2161 = vmatprep.mubr.f32.mxu0 %v3954_v15  ;;  %v900_v38 = vpop.f32.mrf.mxu0 }
 0x148   : > { %2219 = vmatpush1.msra.mxu1 %v3911_v12  ;;  %2164 = vmatmul.mubr.f32.vlgmr.msra.gmra.mxu0 %v3965_v14  ;;  %v901_v20 = vadd.f32 %v900_v38, %v4060_v26 }
 0x149   : > { %2220 = vmatprep.subr.mxu1 %v2663_v3  ;;  %2283 = vmatprep.subr.mxu0 %v2663_v3  ;;  %v902_v47 = vpop.f32.mrf.mxu0 }
 0x14a   : > { %2222 = vmatpush1.msra.mxu1 %v3936_v28  ;;  %2287 = vmatpush1.msra.mxu0 %v1893_v55  ;;  %v4359_v55 = vand.u32 4294901760, %v3954_v15 }
 0x14b   : > { %2052 = vmatprep.mubr.f32.mxu1 %v4074_v37  ;;  %2223 = vmatprep.subr.mxu1 %v2663_v3  ;;  %v990_v61 = vpop.f32.mrf.mxu1 }
 0x14c   : > { %2288 = vmatprep.subr.mxu0 %v2663_v3  ;;  %2054 = vmatmul.mubr.f32.gmra.mxu1 %v4078_v59  ;;  %v4153_v26 = vadd.f32 %v990_v61, %v894_v25 }
 0x14d   : > { %2225 = vmatpush1.msra.mxu1 %v3951_v7  ;;  %2292 = vmatpush1.msra.mxu0 %v4357_v34  ;;  %v992_v21 = vpop.f32.mrf.mxu1 }
 0x14e   : > { %2170 = vmatprep.mubr.f32.mxu0 %v4087_v19  ;;  %2254 = vmatprep.subr.mxu1 %v2663_v3 }
 0x14f   : > { %2293 = vmatprep.subr.mxu0 %v2663_v3  ;;  %2173 = vmatmul.mubr.f32.gmra.mxu0 %v4092_v6 }
 0x150   : > { %2256 = vmatpush2.msra.mxu1 %v3972_v35  ;;  %2297 = vmatpush1.msra.mxu0 %v4358_v44 }
 0x151   : > { %2257 = vmatprep.subr.mxu1 %v2663_v3  ;;  %2298 = vmatprep.subr.mxu0 %v2663_v3  ;;  %v997_v5 = vpop.f32.mrf.mxu1 }
 0x152   : > { %2259 = vmatpush2.msra.mxu1 %v3984_v58  ;;  %2263 = vmatprep.mubr.f32.mxu1 %v4359_v55  ;;  %v4170_v11 = vadd.f32 %v997_v5, %v901_v20 }
 0x153   : > { %2302 = vmatpush1.msra.mxu0 %v4360_v8  ;;  %2267 = vmatmul.mubr.f32.vlgmr.msra.gmra.mxu1 %v4361_v50  ;;  %v999_v2 = vpop.f32.mrf.mxu1 }
 0x154   : > { %2303 = vmatprep.subr.mxu0 %v2663_v3  ;;  %2416 = vmatprep.subr.mxu1 %v2663_v3 }
 0x155   : > { %2307 = vmatpush1.msra.mxu0 %v4362_v13  ;;  %2418 = vmatpush1.msra.mxu1 %v3707_v9  ;;  %v4364_v9 = vand.u32 4294901760, %v3811_v10 }
 0x156   : > { %2308 = vmatprep.subr.mxu0 %v2663_v3  ;;  %2419 = vmatprep.subr.mxu1 %v2663_v3 }
 0x157   : > { %2274 = vmatprep.mubr.f32.mxu1 %v1876_v4  ;;  %2312 = vmatpush1.msra.mxu0 %v4363_v23 }
 0x158   : > { %2421 = vmatpush1.msra.mxu1 %v3714_v1  ;;  %2313 = vmatprep.subr.mxu0 %v2663_v3  ;;  %v4366_v1 = vand.u32 4294901760, %v3856_v41 }
 0x159   : > { %2278 = vmatmul.mubr.f32.gmra.mxu1 %v1882_v54  ;;  %2422 = vmatprep.subr.mxu1 %v2663_v3 }
 0x15a   : > { %2317 = vmatpush1.msra.mxu0 %v4364_v9  ;;  %2424 = vmatpush1.msra.mxu1 %v3733_v18  ;;  %v4367_v18 = vand.u32 4294901760, %v3878_v42 }
 0x15b   : > { %2318 = vmatprep.subr.mxu0 %v2663_v3  ;;  %2425 = vmatprep.subr.mxu1 %v2663_v3 }
 0x15c   : > { %2322 = vmatpush1.msra.mxu0 %v4365_v48  ;;  %2427 = vmatpush1.msra.mxu1 %v3746_v17  ;;  %v4368_v17 = vand.u32 4294901760, %v3893_v49 }
 0x15d   : > { %2323 = vmatprep.subr.mxu0 %v2663_v3  ;;  %2428 = vmatprep.subr.mxu1 %v2663_v3 }
 0x15e   : > { %2327 = vmatpush1.msra.mxu0 %v4366_v1  ;;  %2430 = vmatpush1.msra.mxu1 %v3753_v57  ;;  %v4369_v57 = vand.u32 4294901760, %v3906_v33 }
 0x15f   : > { %2328 = vmatprep.subr.mxu0 %v2663_v3  ;;  %2431 = vmatprep.subr.mxu1 %v2663_v3 }
 0x160   : > { %2332 = vmatpush1.msra.mxu0 %v4367_v18  ;;  %2433 = vmatpush1.msra.mxu1 %v3766_v45  ;;  %v4370_v45 = vand.u32 4294901760, %v3923_v53 }
 0x161   : > { %2333 = vmatprep.subr.mxu0 %v2663_v3  ;;  %2434 = vmatprep.subr.mxu1 %v2663_v3 }
 0x162   : > { %2337 = vmatpush1.msra.mxu0 %v4368_v17  ;;  %2436 = vmatpush1.msra.mxu1 %v3784_v36  ;;  %v4371_v36 = vand.u32 4294901760, %v3940_v63 }
 0x163   : > { %2338 = vmatprep.subr.mxu0 %v2663_v3  ;;  %2437 = vmatprep.subr.mxu1 %v2663_v3 }
 0x164   : > { %2342 = vmatpush1.msra.mxu0 %v4369_v57  ;;  %2439 = vmatpush1.msra.mxu1 %v3805_v62  ;;  %v4372_v62 = vand.u32 4294901760, %v3970_v46 }
 0x165   : > { %2343 = vmatprep.subr.mxu0 %v2663_v3  ;;  %2440 = vmatprep.subr.mxu1 %v2663_v3 }
 0x166   : > { %2347 = vmatpush1.msra.mxu0 %v4370_v45  ;;  %2442 = vmatpush1.msra.mxu1 %v3822_v40 }
 0x167   : > { %2348 = vmatprep.subr.mxu0 %v2663_v3  ;;  %2443 = vmatprep.subr.mxu1 %v2663_v3 }
 0x168   : > { %2352 = vmatpush1.msra.mxu0 %v4371_v36  ;;  %2445 = vmatpush1.msra.mxu1 %v3843_v29 }
 0x169   : > { %2353 = vmatprep.subr.mxu0 %v2663_v3  ;;  %2446 = vmatprep.subr.mxu1 %v2663_v3  ;;  %v1099_v16 = vpop.f32.mrf.mxu0 }
 0x16a   : > { %2357 = vmatpush1.msra.mxu0 %v4372_v62  ;;  %2448 = vmatpush1.msra.mxu1 %v3858_v27  ;;  %v1100_v10 = vadd.f32 %v1099_v16, %v4153_v26 }
 0x16b   : > { %2358 = vmatprep.subr.mxu0 %v2663_v3  ;;  %2449 = vmatprep.subr.mxu1 %v2663_v3  ;;  %v1101_v40 = vpop.f32.mrf.mxu0 }
 0x16c   : > { %2362 = vmatpush1.msra.mxu0 %v1998_v0  ;;  %2451 = vmatpush1.msra.mxu1 %v3880_v31 }
 0x16d   : > { %2391 = vmatprep.subr.mxu0 %v2663_v3  ;;  %2452 = vmatprep.subr.mxu1 %v2663_v3 }
 0x16e   : > { %2395 = vmatpush2.msra.mxu0 %v2033_v24  ;;  %2454 = vmatpush1.msra.mxu1 %v3895_v32 }
 0x16f   : > { %2396 = vmatprep.subr.mxu0 %v2663_v3  ;;  %2455 = vmatprep.subr.mxu1 %v2663_v3  ;;  %v1114_v43 = vpop.f32.mrf.mxu0 }
 0x170   : > { %2400 = vmatpush2.msra.mxu0 %v2040_v22  ;;  %2402 = vmatprep.mubr.f32.mxu0 %v3919_v56  ;;  %v1115_v0 = vadd.f32 %v1114_v43, %v4170_v11 }
 0x171   : > { %2457 = vmatpush1.msra.mxu1 %v3911_v12  ;;  %2404 = vmatmul.mubr.f32.vlgmr.msra.gmra.mxu0 %v3932_v60  ;;  %v1116_v29 = vpop.f32.mrf.mxu0 }
 0x172   : > { %2458 = vmatprep.subr.mxu1 %v2663_v3  ;;  %2409 = vmatprep.mubr.f32.mxu0 %v4074_v37  ;;  %v2635_v29 = vld [vmem:[%s4284_s3] ss:$0 sm:$0xff] }
 0x173   : > { %2460 = vmatpush1.msra.mxu1 %v3936_v28  ;;  %2499 = vmatprep.mubr.f32.mxu1 %v3919_v56  ;;  %v1276_v24 = vpop.f32.mrf.mxu1 }
 0x174   : > { %2461 = vmatprep.subr.mxu1 %v2663_v3  ;;  %v1277_v41 = vadd.f32 %v1276_v24, %v1100_v10  ;;  %v2634_v10 = vld [vmem:[%s4283_s2] ss:$0 sm:$0xff] }
 0x175   : > { %2463 = vmatpush1.msra.mxu1 %v3951_v7  ;;  %2411 = vmatmul.mubr.f32.gmra.mxu0 %v4078_v59  ;;  %v1278_v27 = vpop.f32.mrf.mxu1 }
 0x176   : > { %2492 = vmatprep.subr.mxu1 %v2663_v3 }
 0x177   : > { %2494 = vmatpush2.msra.mxu1 %v3972_v35 }
 0x178   : > { %2495 = vmatprep.subr.mxu1 %v2663_v3 }
 0x179   : > { %2497 = vmatpush2.msra.mxu1 %v3984_v58  ;;  %v1283_v42 = vpop.f32.mrf.mxu1 }
 0x17a   : > { %2501 = vmatmul.mubr.f32.vlgmr.msra.gmra.mxu1 %v3932_v60  ;;  %v1284_v31 = vadd.f32 %v1283_v42, %v1115_v0 }
 0x17b   : > { %2506 = vmatprep.mubr.f32.mxu1 %v4074_v37  ;;  %v1285_v49 = vpop.f32.mrf.mxu1 }
 0x17e   : > { %2508 = vmatmul.mubr.f32.gmra.mxu1 %v4078_v59 }
 0x191   : > { %v1393_v32 = vpop.f32.mrf.mxu0 }
 0x192   : > { %v1394_v33 = vadd.f32 %v1393_v32, %v1277_v41 }
 0x193   : > { %v1395_v12 = vpop.f32.mrf.mxu0 }
 0x197   : > { %v1402_v14 = vpop.f32.mrf.mxu0 }
 0x198   : > { %v1403_v56 = vadd.f32 %v1402_v14, %v1284_v31 }
 0x199   : > { %v1404_v53 = vpop.f32.mrf.mxu0 }
 0x19b   : > { %v1496_v28 = vpop.f32.mrf.mxu1 }
 0x19c   : > { %v1497_v63 = vadd.f32 %v1496_v28, %v1394_v33 }
 0x19d   : > { %v1498_v3 = vpop.f32.mrf.mxu1 }
 0x1a1   : > { %v1507_v7 = vpop.f32.mrf.mxu1 }
 0x1a2   : > { %v1508_v58 = vadd.f32 %v1507_v7, %v1403_v56 }
 0x1a3   : > { %v1509_v15 = vpop.f32.mrf.mxu1 }
 0x1b9   : > { %v1633_v51 = vpop.f32.mrf.mxu0 }
 0x1ba   : > { %v1634_v60 = vadd.f32 %v1633_v51, %v1497_v63 }
 0x1bb   : > { %v1635_v46 = vpop.f32.mrf.mxu0 }
 0x1bf   : > { %v1640_v35 = vpop.f32.mrf.mxu0 }
 0x1c0   : > { %v1641_v30 = vadd.f32 %v1640_v35, %v1508_v58 }
 0x1c1   : > { %v1642_v52 = vpop.f32.mrf.mxu0 }
 0x1c3   : > { %v1730_v22 = vpop.f32.mrf.mxu1 }
 0x1c4   : > { %v1731_v37 = vadd.f32 %v1730_v22, %v1634_v60 }
 0x1c5   : > { %v1732_v59 = vpop.f32.mrf.mxu1 }
 0x1c9   : > { %v1737_v19 = vpop.f32.mrf.mxu1 }
 0x1ca   : > { %v1738_v6 = vadd.f32 %v1737_v19, %v1641_v30 }
 0x1cb   : > { %v1739_v4 = vpop.f32.mrf.mxu1 }
 0x1e2   : > { %v1871_v54 = vpop.f32.mrf.mxu0 }
 0x1e4   : > { %v1873_v25 = vpop.f32.mrf.mxu0 }
 0x1ea   : > { %v2048_v39 = vpop.f32.mrf.mxu1 }
 0x1eb   : > { %v2049_v38 = vadd.f32 %v2048_v39, %v1871_v54 }
 0x1ec   : > { %v2050_v20 = vpop.f32.mrf.mxu1 }
 0x203   : > { %v1886_v47 = vpop.f32.mrf.mxu0 }
 0x205   : > { %v1888_v61 = vpop.f32.mrf.mxu0 }
 0x208   : > { %v2165_v26 = vpop.f32.mrf.mxu0 }
 0x209   : > { %v2166_v9 = vadd.f32 %v2165_v26, %v2049_v38 }
 0x20a   : > { %v2167_v34 = vpop.f32.mrf.mxu0 }
 0x20c   : > { %v2055_v21 = vpop.f32.mrf.mxu1 }
 0x20d   : > { %v2056_v48 = vadd.f32 %v2055_v21, %v1886_v47 }
 0x20e   : > { %v2057_v44 = vpop.f32.mrf.mxu1 }
 0x20f   : > { %v2174_v5 = vpop.f32.mrf.mxu0 }
 0x210   : > { %v2175_v57 = vadd.f32 %v2174_v5, %v2056_v48 }
 0x211   : > { %v2176_v55 = vpop.f32.mrf.mxu0 }
 0x213   : > { %v2268_v11 = vpop.f32.mrf.mxu1 }
 0x214   : > { %v2269_v18 = vadd.f32 %v2268_v11, %v2166_v9 }
 0x215   : > { %v2270_v8 = vpop.f32.mrf.mxu1 }
 0x219   : > { %v2279_v50 = vpop.f32.mrf.mxu1 }
 0x21a   : > { %v2280_v16 = vadd.f32 %v2279_v50, %v2175_v57 }
 0x21b   : > { %v2281_v2 = vpop.f32.mrf.mxu1 }
 0x231   : > { %v2405_v13 = vpop.f32.mrf.mxu0 }
 0x232   : > { %v2406_v45 = vadd.f32 %v2405_v13, %v2269_v18 }
 0x233   : > { %v2407_v23 = vpop.f32.mrf.mxu0 }
 0x235   : > { %v2412_v1 = vpop.f32.mrf.mxu0 }
 0x236   : > { %v2413_v43 = vadd.f32 %v2412_v1, %v2280_v16 }
 0x237   : > { %v2414_v17 = vpop.f32.mrf.mxu0 }
 0x23a   : > { %v2502_v36 = vpop.f32.mrf.mxu1 }
 0x23b   : > { %v2503_v62 = vadd.f32 %v2502_v36, %v2406_v45 }
 0x23c   : > { %v2504_v40 = vpop.f32.mrf.mxu1 }
 0x23d   : > { %v2513_v0 = vadd.f32 %v2503_v62, %v1731_v37 }
 0x23e   : > { %v2509_v24 = vpop.f32.mrf.mxu1 }
 0x23f   : > { %v2522_v41 = vmul.f32 %v2634_v10, %v2513_v0  ;;  %v2510_v27 = vadd.f32 %v2509_v24, %v2413_v43 }
 0x240   : > { %v2511_v42 = vpop.f32.mrf.mxu1 }
 0x241   : > { %v2531_v31 = vadd.f32 %v2635_v29, %v2522_v41  ;;  %v2514_v49 = vadd.f32 %v2510_v27, %v1738_v6 }
 0x243   : > { %2533 = vst [vmem:[%s197_s19] sm:$0xff] %v2531_v31  ;;  %v2523_v32 = vmul.f32 %v2634_v10, %v2514_v49 }
 0x245   : > { %v2532_v33 = vadd.f32 %v2635_v29, %v2523_v32 }
 0x247   : > { %2534 = vst [vmem:[%s197_s19 + $0x8] sm:$0xff] %v2532_v33 }
 0x248 PF: > { %s14_s15 = sadd.s32 1, %s2661_s15  }
 0x249   : > { %p11_p4 = scmp.ge.s32.totalorder %s14_s15, 4  }
 0x24b   :  { %13 = sbr.rel (!%p11_p4) target bundleno = 1 (0x1), region = 68 }

</bundles_post_ra>
